<compile_context>
chip_gen: v7x
topology: tpu7x:2x2x1
jax: 0.10.0
libtpu: 0.0.40
codegen_flags: <defaults>
</compile_context>

<pallas_src>
import functools
import math

import jax
import jax.numpy as jnp
from jax.experimental import pallas as pl
from jax.experimental.pallas import tpu as pltpu


MASK_VALUE = -1e30  # additive key-padding mask value; kept in f32, never cast to bf16


# ----------------------------- Pallas kernels -----------------------------

def _mm_bias_kernel(x_ref, w_ref, b_ref, o_ref, *, activation):
    # Single-block matmul + bias (+ optional ReLU). bf16 operands on the MXU,
    # f32 accumulation; bias / activation stay in f32 on the VPU.
    y = jnp.dot(x_ref[...].astype(jnp.bfloat16),
                w_ref[...].astype(jnp.bfloat16),
                preferred_element_type=jnp.float32)
    y = y + b_ref[...]
    if activation == "relu":
        y = jnp.maximum(y, 0.0)
    o_ref[...] = y


def matmul_bias(x, w, b, activation=None):
    M, K = x.shape
    K2, N = w.shape
    assert K == K2
    return pl.pallas_call(
        functools.partial(_mm_bias_kernel, activation=activation),
        out_shape=jax.ShapeDtypeStruct((M, N), jnp.float32),
        grid=(1,),                                   # single full-size block
        in_specs=[
            pl.BlockSpec((M, K), lambda i: (0, 0)),
            pl.BlockSpec((K, N), lambda i: (0, 0)),
            pl.BlockSpec((1, N), lambda i: (0, 0)),
        ],
        out_specs=pl.BlockSpec((M, N), lambda i: (0, 0)),
    )(x, w, b.reshape(1, N))


def _ln(x, g, b, eps):
    mu = jnp.mean(x, axis=-1, keepdims=True)
    xc = x - mu
    var = jnp.mean(xc * xc, axis=-1, keepdims=True)
    return xc * jax.lax.rsqrt(var + eps) * g + b


def _ln_kernel(x_ref, g_ref, b_ref, o_ref, *, eps):
    o_ref[...] = _ln(x_ref[...], g_ref[...], b_ref[...], eps)


def layernorm(x, g, b, eps=1e-5):
    M, D = x.shape
    return pl.pallas_call(
        functools.partial(_ln_kernel, eps=eps),
        out_shape=jax.ShapeDtypeStruct((M, D), jnp.float32),
        grid=(1,),                                   # single full-size block
        in_specs=[
            pl.BlockSpec((M, D), lambda i: (0, 0)),
            pl.BlockSpec((1, D), lambda i: (0, 0)),
            pl.BlockSpec((1, D), lambda i: (0, 0)),
        ],
        out_specs=pl.BlockSpec((M, D), lambda i: (0, 0)),
    )(x, g.reshape(1, D), b.reshape(1, D))


def _fuse_kernel(t_ref, pe_ref, img_ref, o_ref):
    # transcripts + positional embedding + broadcast image embedding
    o_ref[...] = t_ref[...] + pe_ref[...] + img_ref[...]


def fuse_nodes(transcripts, pe, img):
    BN, T, D = transcripts.shape
    return pl.pallas_call(
        _fuse_kernel,
        out_shape=jax.ShapeDtypeStruct((BN, T, D), jnp.float32),
        grid=(1,),                                   # one block, no per-node steps
        in_specs=[
            pl.BlockSpec((BN, T, D), lambda i: (0, 0, 0)),
            pl.BlockSpec((1, T, D), lambda i: (0, 0, 0)),
            pl.BlockSpec((BN, 1, D), lambda i: (0, 0, 0)),
        ],
        out_specs=pl.BlockSpec((BN, T, D), lambda i: (0, 0, 0)),
    )(transcripts, pe.reshape(1, T, D), img.reshape(BN, 1, D))


def _encoder_layer_kernel(x_ref, mask_ref,
                          wq_ref, bq_ref, wk_ref, bk_ref, wv_ref, bv_ref,
                          wo_ref, bo_ref, ln1g_ref, ln1b_ref,
                          wff1_ref, bff1_ref, wff2_ref, bff2_ref,
                          ln2g_ref, ln2b_ref, o_ref, *, nhead, scale, eps):
    # One fused PyTorch TransformerEncoderLayer (post-norm, ReLU FFN, eval mode)
    # for a chunk of flattened rows R = (BN / nchunks) * T. Everything stays in
    # VMEM / vregs; only x and the final result touch HBM.
    R, D = x_ref.shape
    hd = D // nhead

    x = x_ref[...]                                   # (R, D) f32 residual stream

    def mm(a, w_ref2, b_ref2):                       # bf16 MXU matmul, f32 accumulate
        return jnp.dot(a.astype(jnp.bfloat16), w_ref2[...].astype(jnp.bfloat16),
                       preferred_element_type=jnp.float32) + b_ref2[...]

    # ---- multi-head self-attention ------------------------------------
    q = mm(x, wq_ref, bq_ref) * scale                # scale folded into q once
    k = mm(x, wk_ref, bk_ref)
    v = mm(x, wv_ref, bv_ref)

    # combined additive mask (key padding + block-diagonal over sequences),
    # precomputed per chunk in the wrapper; 0 = attend, -1e30 = masked. f32.
    mask = mask_ref[0]                               # (R, R)

    lane = jax.lax.broadcasted_iota(jnp.int32, (1, D), 1)   # hoisted out of the loop

    attn = jnp.zeros((R, D), jnp.float32)
    for h in range(nhead):
        # Block-diagonal head trick: zero every lane of q outside head h, then a
        # full-D MXU contraction yields exactly head h's scores. Avoids feeding a
        # head_dim=4 contraction to the MXU and needs no reshapes / slices.
        hm = (lane >= h * hd) & (lane < (h + 1) * hd)        # (1, D)
        qh = jnp.where(hm, q, 0.0)
        s = jax.lax.dot_general(qh, k, (((1,), (1,)), ((), ())),
                                preferred_element_type=jnp.float32)   # (R, R)
        s = s + mask
        s = s - jnp.max(s, axis=-1, keepdims=True)
        p = jnp.exp(s)
        p = p * pl.reciprocal(jnp.sum(p, axis=-1, keepdims=True), approx=True)
        pv = jnp.dot(p, v, preferred_element_type=jnp.float32)        # (R, D)
        attn = attn + jnp.where(hm, pv, 0.0)         # keep only head-h lanes

    attn = mm(attn, wo_ref, bo_ref)                  # output projection
    x = _ln(x + attn, ln1g_ref[...], ln1b_ref[...], eps)   # residual + LN1 (post-norm)

    # ---- feed-forward ---------------------------------------------------
    h1 = jnp.maximum(mm(x, wff1_ref, bff1_ref), 0.0)
    ff = mm(h1, wff2_ref, bff2_ref)
    x = _ln(x + ff, ln2g_ref[...], ln2b_ref[...], eps)     # residual + LN2

    o_ref[...] = x


def encoder_layer(x, mask3, lp, *, nhead):
    M, D = x.shape                                   # M = BN * T (flattened rows)
    nchunks = mask3.shape[0]
    R = M // nchunks
    ff = lp["w_ff1"].shape[1]
    scale = 1.0 / math.sqrt(D // nhead)

    def full(shape):
        n = len(shape)
        return pl.BlockSpec(shape, lambda i: (0,) * n)

    # NOTE(v7x): full per-layer working set here is « 1 MiB, far below the 64 MiB
    # VMEM / 32 MiB scoped default; no explicit vmem_limit_bytes needed at this size.
    return pl.pallas_call(
        functools.partial(_encoder_layer_kernel, nhead=nhead, scale=scale, eps=1e-5),
        out_shape=jax.ShapeDtypeStruct((M, D), jnp.float32),
        grid=(nchunks,),
        in_specs=[
            pl.BlockSpec((R, D), lambda i: (i, 0)),          # activation row chunk
            pl.BlockSpec((1, R, R), lambda i: (i, 0, 0)),    # per-chunk attention mask
            full((D, D)), full((1, D)),                      # wq, bq
            full((D, D)), full((1, D)),                      # wk, bk
            full((D, D)), full((1, D)),                      # wv, bv
            full((D, D)), full((1, D)),                      # wo, bo
            full((1, D)), full((1, D)),                      # ln1 gamma / beta
            full((D, ff)), full((1, ff)),                    # ff1
            full((ff, D)), full((1, D)),                     # ff2
            full((1, D)), full((1, D)),                      # ln2 gamma / beta
        ],
        out_specs=pl.BlockSpec((R, D), lambda i: (i, 0)),
        compiler_params=pltpu.CompilerParams(
            dimension_semantics=("parallel",)),              # v7x: one chunk per TC
    )(x, mask3,
      lp["w_q"], lp["b_q"].reshape(1, D),
      lp["w_k"], lp["b_k"].reshape(1, D),
      lp["w_v"], lp["b_v"].reshape(1, D),
      lp["w_o"], lp["b_o"].reshape(1, D),
      lp["ln1_g"].reshape(1, D), lp["ln1_b"].reshape(1, D),
      lp["w_ff1"], lp["b_ff1"].reshape(1, ff),
      lp["w_ff2"], lp["b_ff2"].reshape(1, D),
      lp["ln2_g"].reshape(1, D), lp["ln2_b"].reshape(1, D))


# ------------------------------- JAX glue ---------------------------------

def simple_cnn(images, w, b):
    # TODO(synk): the resnet50 backbone is replaced by a single 4x4-patchify
    # (stride-4) conv + ReLU producing `image_feature_dim` channels; the conv
    # itself runs as a single-block Pallas matmul.
    B, C, H, W = images.shape
    P = 4
    x = images.reshape(B, C, H // P, P, W // P, P)
    x = x.transpose(0, 2, 4, 1, 3, 5).reshape(B * (H // P) * (W // P), C * P * P)
    y = matmul_bias(x, w, b, activation="relu")
    Cf = w.shape[1]
    return y.reshape(B, H // P, W // P, Cf).transpose(0, 3, 1, 2)   # NCHW


def roi_align(features, rois, output_size, spatial_scale, sampling_ratio=2):
    # TODO(synk): gather-heavy roi_align kept in plain JAX (fixed sampling_ratio=2
    # instead of torchvision's adaptive -1); aligned=False semantics.
    B, C, H, W = features.shape
    ph, pw = output_size

    def bilinear(fmap, y, x):
        valid = (y > -1.0) & (y < H) & (x > -1.0) & (x < W)
        y = jnp.clip(y, 0.0, H - 1.0)
        x = jnp.clip(x, 0.0, W - 1.0)
        y0f = jnp.floor(y)
        x0f = jnp.floor(x)
        y0 = y0f.astype(jnp.int32)
        x0 = x0f.astype(jnp.int32)
        y1 = jnp.minimum(y0 + 1, H - 1)
        x1 = jnp.minimum(x0 + 1, W - 1)
        ly = y - y0f
        lx = x - x0f
        hy = 1.0 - ly
        hx = 1.0 - lx
        v = (fmap[:, y0, x0] * hy * hx + fmap[:, y0, x1] * hy * lx
             + fmap[:, y1, x0] * ly * hx + fmap[:, y1, x1] * ly * lx)
        return jnp.where(valid, v, 0.0)

    def one_roi(roi):
        b = roi[0].astype(jnp.int32)
        x1 = roi[1] * spatial_scale
        y1 = roi[2] * spatial_scale
        x2 = roi[3] * spatial_scale
        y2 = roi[4] * spatial_scale
        roi_w = jnp.maximum(x2 - x1, 1.0)
        roi_h = jnp.maximum(y2 - y1, 1.0)
        bin_w = roi_w / pw
        bin_h = roi_h / ph
        frac = (jnp.arange(sampling_ratio, dtype=jnp.float32) + 0.5) / sampling_ratio
        ys = y1 + (jnp.arange(ph, dtype=jnp.float32)[:, None] + frac[None, :]) * bin_h
        xs = x1 + (jnp.arange(pw, dtype=jnp.float32)[:, None] + frac[None, :]) * bin_w
        yy = jnp.broadcast_to(ys[:, :, None, None], (ph, sampling_ratio, pw, sampling_ratio))
        xx = jnp.broadcast_to(xs[None, None, :, :], (ph, sampling_ratio, pw, sampling_ratio))
        fmap = features[b]
        vals = bilinear(fmap, yy, xx)            # (C, ph, s, pw, s)
        return vals.mean(axis=(2, 4))            # (C, ph, pw)

    return jax.vmap(one_roi)(rois)


def make_position_embedding(max_len, d):
    position = jnp.arange(max_len, dtype=jnp.float32)[:, None]
    div_term = jnp.exp(jnp.arange(0, d, 2, dtype=jnp.float32) * -(math.log(10000.0) / d))
    pe = jnp.zeros((max_len, d), dtype=jnp.float32)
    pe = pe.at[:, 0::2].set(jnp.sin(position * div_term))
    pe = pe.at[:, 1::2].set(jnp.cos(position * div_term))
    return pe


def init_params(key, cfg):
    D = cfg["char_embedding_dim"]
    out_dim = cfg["out_dim"]
    Cf = cfg["image_feature_dim"]
    ff = cfg["feedforward_dim"]
    ph, pw = cfg["roi_pooling_size"]
    keys = iter(jax.random.split(key, 16 + 8 * cfg["nlayers"]))

    def rnd(shape, s=0.02):
        return (s * jax.random.normal(next(keys), shape)).astype(jnp.float32)

    # BatchNorm (eval) folded into the conv weights once at init:
    #   relu(bn(conv(x))) == relu(x @ (w * bn_scale) + (b * bn_scale + bn_shift))
    bn_eps = 1e-5
    gamma = jnp.ones((out_dim,), jnp.float32)
    beta = jnp.zeros((out_dim,), jnp.float32)
    running_mean = jnp.zeros((out_dim,), jnp.float32)
    running_var = jnp.ones((out_dim,), jnp.float32)
    bn_scale = gamma / jnp.sqrt(running_var + bn_eps)
    bn_shift = beta - running_mean * bn_scale
    conv_w = rnd((Cf * ph * pw, out_dim))
    conv_b = jnp.zeros((out_dim,), jnp.float32)

    params = {
        "cnn_w": rnd((3 * 4 * 4, Cf)),
        "cnn_b": jnp.zeros((Cf,), jnp.float32),
        "conv_w": conv_w * bn_scale[None, :],
        "conv_b": conv_b * bn_scale + bn_shift,
        "norm_g": jnp.ones((D,), jnp.float32),
        "norm_b": jnp.zeros((D,), jnp.float32),
        "pos_emb": make_position_embedding(cfg["max_len"], D),
        "layers": [],
    }
    for _ in range(cfg["nlayers"]):
        params["layers"].append({
            "w_q": rnd((D, D)), "b_q": jnp.zeros((D,), jnp.float32),
            "w_k": rnd((D, D)), "b_k": jnp.zeros((D,), jnp.float32),
            "w_v": rnd((D, D)), "b_v": jnp.zeros((D,), jnp.float32),
            "w_o": rnd((D, D)), "b_o": jnp.zeros((D,), jnp.float32),
            "ln1_g": jnp.ones((D,), jnp.float32), "ln1_b": jnp.zeros((D,), jnp.float32),
            "w_ff1": rnd((D, ff)), "b_ff1": jnp.zeros((ff,), jnp.float32),
            "w_ff2": rnd((ff, D)), "b_ff2": jnp.zeros((D,), jnp.float32),
            "ln2_g": jnp.ones((D,), jnp.float32), "ln2_b": jnp.zeros((D,), jnp.float32),
        })
    return params


def encoder_forward(params, images, boxes_coordinate, transcripts, src_key_padding_mask, cfg):
    B, N, T, D = transcripts.shape
    _, _, origin_H, origin_W = images.shape
    nhead = cfg["nheaders"]
    BN = B * N

    # ---- image branch: (simplified) CNN -> roi_align -> conv (+folded BN) + ReLU ----
    feat = simple_cnn(images, params["cnn_w"], params["cnn_b"])        # (B, Cf, H', W')
    _, C, H, W = feat.shape

    boxes = boxes_coordinate.reshape(BN, 8)
    pos = jnp.stack([boxes[:, 0], boxes[:, 1], boxes[:, 4], boxes[:, 5]], axis=1)
    batch_idx = jnp.repeat(jnp.arange(B, dtype=jnp.float32), N)[:, None]
    rois = jnp.concatenate([batch_idx, pos], axis=1)                   # (B*N, 5)

    spatial_scale = float(H) / float(origin_H)
    roi_feats = roi_align(feat, rois, cfg["roi_pooling_size"], spatial_scale)  # (BN, Cf, ph, pw)

    ph, pw = cfg["roi_pooling_size"]
    x_img = roi_feats.reshape(BN, C * ph * pw)
    img_emb = matmul_bias(x_img, params["conv_w"], params["conv_b"],
                          activation="relu")                           # (BN, out_dim)

    # ---- text branch: transcripts + positional embedding + image embedding ----
    pe = params["pos_emb"][:T]
    trans = transcripts.reshape(BN, T, D).astype(jnp.float32)
    x = fuse_nodes(trans, pe, img_emb).reshape(BN * T, D)              # (BN*T, D)

    # ---- per-chunk additive attention mask (key padding + block-diag over sequences)
    nchunks = 2 if (BN % 2 == 0 and BN >= 2) else 1                    # parallel axis for v7x
    R = (BN // nchunks) * T
    pad_add = jnp.where(src_key_padding_mask.reshape(BN * T), MASK_VALUE, 0.0)
    pad_add = pad_add.astype(jnp.float32).reshape(nchunks, 1, R)
    seq_id = jnp.arange(R, dtype=jnp.int32) // T
    same_seq = seq_id[:, None] == seq_id[None, :]                      # (R, R)
    mask3 = jnp.where(same_seq[None, :, :], pad_add, MASK_VALUE)       # (nchunks, R, R) f32

    # ---- transformer encoder: ONE fused pallas_call per layer ----
    for lp in params["layers"]:
        x = encoder_layer(x, mask3, lp, nhead=nhead)

    # final LayerNorm (output_dropout is identity in eval)
    out = layernorm(x, params["norm_g"], params["norm_b"])
    return out.reshape(BN, T, D)


# --------------------------------- main ------------------------------------

if __name__ == "__main__":
    cfg = dict(
        char_embedding_dim=32,
        out_dim=32,
        image_feature_dim=32,
        nheaders=8,
        nlayers=2,
        feedforward_dim=64,
        max_len=100,
        roi_pooling_size=(7, 7),
    )
    B, N, T, D = 2, 4, 8, cfg["char_embedding_dim"]
    H = W = 16

    key = jax.random.PRNGKey(0)
    k_img, k_box1, k_box2, k_txt, k_len, k_par = jax.random.split(key, 6)

    images = jax.random.normal(k_img, (B, 3, H, W), dtype=jnp.float32)

    # quadrilateral boxes (x1,y1,x2,y2,x3,y3,x4,y4); forward uses corners (x1,y1) & (x3,y3)
    tl = jax.random.uniform(k_box1, (B, N, 2), minval=0.0, maxval=7.0)
    wh = jax.random.uniform(k_box2, (B, N, 2), minval=4.0, maxval=8.0)
    br = tl + wh
    boxes_coordinate = jnp.concatenate(
        [
            tl,                                              # x1, y1
            jnp.stack([br[..., 0], tl[..., 1]], axis=-1),    # x2, y2
            br,                                              # x3, y3
            jnp.stack([tl[..., 0], br[..., 1]], axis=-1),    # x4, y4
        ],
        axis=-1,
    ).astype(jnp.float32)

    transcripts = jax.random.normal(k_txt, (B, N, T, D), dtype=jnp.float32)
    lengths = jax.random.randint(k_len, (B * N,), minval=4, maxval=T + 1)
    src_key_padding_mask = jnp.arange(T)[None, :] >= lengths[:, None]   # (B*N, T), True = pad

    params = init_params(k_par, cfg)

    fwd = jax.jit(lambda p, im, bx, tr, msk: encoder_forward(p, im, bx, tr, msk, cfg))
    out = fwd(params, images, boxes_coordinate, transcripts, src_key_padding_mask)
    out = jax.block_until_ready(out)
    assert out.shape == (B * N, T, D), out.shape
    assert jnp.all(jnp.isfinite(out))
    print("KERNEL_OK")
</pallas_src>

<mosaic_0001>
module attributes {stable_mosaic.version = 11 : i64} {
  func.func @_mm_bias_kernel(%arg0: i32, %arg1: memref<32x48xf32, #tpu.memory_space<vmem>>, %arg2: memref<48x32xf32, #tpu.memory_space<vmem>>, %arg3: memref<1x32xf32, #tpu.memory_space<vmem>>, %arg4: memref<32x32xf32, #tpu.memory_space<vmem>>) attributes {dimension_semantics = [#tpu.dimension_semantics<arbitrary>], iteration_bounds = array<i64: 1>, scalar_prefetch = 0 : i64, scratch_operands = 0 : i64, tpu.core_type = #tpu.core_type<tc>, window_params = [{pipeline_mode = #tpu.pipeline_mode<synchronous>, transform_indices = @transform_0, window_bounds = array<i64: 32, 48>}, {pipeline_mode = #tpu.pipeline_mode<synchronous>, transform_indices = @transform_1, window_bounds = array<i64: 48, 32>}, {pipeline_mode = #tpu.pipeline_mode<synchronous>, transform_indices = @transform_2, window_bounds = array<i64: 1, 32>}, {pipeline_mode = #tpu.pipeline_mode<synchronous>, transform_indices = @transform_3, window_bounds = array<i64: 32, 32>}]} {
    %c0 = arith.constant 0 : index
    %c0_0 = arith.constant 0 : index
    %0 = vector.load %arg1[%c0, %c0_0] : memref<32x48xf32, #tpu.memory_space<vmem>>, vector<32x48xf32>
    %1 = arith.truncf %0 : vector<32x48xf32> to vector<32x48xbf16>
    %c0_1 = arith.constant 0 : index
    %c0_2 = arith.constant 0 : index
    %2 = vector.load %arg2[%c0_1, %c0_2] : memref<48x32xf32, #tpu.memory_space<vmem>>, vector<48x32xf32>
    %3 = arith.truncf %2 : vector<48x32xf32> to vector<48x32xbf16>
    %cst = arith.constant dense<0.000000e+00> : vector<32x32xf32>
    %4 = tpu.matmul %1, %3, %cst {dimension_numbers = #tpu.dot_dimension_numbers<[1], [0], [0], [1], [0, 0, 1, 1], [], []>} : vector<32x48xbf16>, vector<48x32xbf16>, vector<32x32xf32> -> vector<32x32xf32>
    %c0_3 = arith.constant 0 : index
    %c0_4 = arith.constant 0 : index
    %5 = vector.load %arg3[%c0_3, %c0_4] : memref<1x32xf32, #tpu.memory_space<vmem>>, vector<1x32xf32>
    %6 = vector.broadcast %5 : vector<1x32xf32> to vector<32x32xf32>
    %7 = arith.addf %4, %6 : vector<32x32xf32>
    %cst_5 = arith.constant 0.000000e+00 : f32
    %8 = vector.broadcast %cst_5 : f32 to vector<32x32xf32>
    %9 = arith.maximumf %7, %8 : vector<32x32xf32>
    %c0_6 = arith.constant 0 : index
    %c0_7 = arith.constant 0 : index
    %10 = vector.load %arg4[%c0_6, %c0_7] : memref<32x32xf32, #tpu.memory_space<vmem>>, vector<32x32xf32>
    tpu.vector_store %arg4[%c0_6, %c0_7], %9 {strides = array<i32>} : memref<32x32xf32, #tpu.memory_space<vmem>>, vector<32x32xf32>,
    return
  }
  func.func @transform_0(%arg0: i32) -> (i32, i32) {
    %c0_i32 = arith.constant 0 : i32
    %c0_i32_0 = arith.constant 0 : i32
    %c0_i32_1 = arith.constant 0 : i32
    return %c0_i32, %c0_i32_0 : i32, i32
  }
  func.func @transform_1(%arg0: i32) -> (i32, i32) {
    %c0_i32 = arith.constant 0 : i32
    %c0_i32_0 = arith.constant 0 : i32
    %c0_i32_1 = arith.constant 0 : i32
    return %c0_i32, %c0_i32_0 : i32, i32
  }
  func.func @transform_2(%arg0: i32) -> (i32, i32) {
    %c0_i32 = arith.constant 0 : i32
    %c0_i32_0 = arith.constant 0 : i32
    %c0_i32_1 = arith.constant 0 : i32
    return %c0_i32, %c0_i32_0 : i32, i32
  }
  func.func @transform_3(%arg0: i32) -> (i32, i32) {
    %c0_i32 = arith.constant 0 : i32
    %c0_i32_0 = arith.constant 0 : i32
    %c0_i32_1 = arith.constant 0 : i32
    return %c0_i32, %c0_i32_0 : i32, i32
  }
}

module attributes {stable_mosaic.version = 11 : i64} {
  func.func @_mm_bias_kernel(%arg0: i32, %arg1: memref<8x1568xf32, #tpu.memory_space<vmem>>, %arg2: memref<1568x32xf32, #tpu.memory_space<vmem>>, %arg3: memref<1x32xf32, #tpu.memory_space<vmem>>, %arg4: memref<8x32xf32, #tpu.memory_space<vmem>>) attributes {dimension_semantics = [#tpu.dimension_semantics<arbitrary>], iteration_bounds = array<i64: 1>, scalar_prefetch = 0 : i64, scratch_operands = 0 : i64, tpu.core_type = #tpu.core_type<tc>, window_params = [{pipeline_mode = #tpu.pipeline_mode<synchronous>, transform_indices = @transform_0, window_bounds = array<i64: 8, 1568>}, {pipeline_mode = #tpu.pipeline_mode<synchronous>, transform_indices = @transform_1, window_bounds = array<i64: 1568, 32>}, {pipeline_mode = #tpu.pipeline_mode<synchronous>, transform_indices = @transform_2, window_bounds = array<i64: 1, 32>}, {pipeline_mode = #tpu.pipeline_mode<synchronous>, transform_indices = @transform_3, window_bounds = array<i64: 8, 32>}]} {
    %c0 = arith.constant 0 : index
    %c0_0 = arith.constant 0 : index
    %0 = vector.load %arg1[%c0, %c0_0] : memref<8x1568xf32, #tpu.memory_space<vmem>>, vector<8x1568xf32>
    %1 = arith.truncf %0 : vector<8x1568xf32> to vector<8x1568xbf16>
    %c0_1 = arith.constant 0 : index
    %c0_2 = arith.constant 0 : index
    %2 = vector.load %arg2[%c0_1, %c0_2] : memref<1568x32xf32, #tpu.memory_space<vmem>>, vector<1568x32xf32>
    %3 = arith.truncf %2 : vector<1568x32xf32> to vector<1568x32xbf16>
    %cst = arith.constant dense<0.000000e+00> : vector<8x32xf32>
    %4 = tpu.matmul %1, %3, %cst {dimension_numbers = #tpu.dot_dimension_numbers<[1], [0], [0], [1], [0, 0, 1, 1], [], []>} : vector<8x1568xbf16>, vector<1568x32xbf16>, vector<8x32xf32> -> vector<8x32xf32>
    %c0_3 = arith.constant 0 : index
    %c0_4 = arith.constant 0 : index
    %5 = vector.load %arg3[%c0_3, %c0_4] : memref<1x32xf32, #tpu.memory_space<vmem>>, vector<1x32xf32>
    %6 = vector.broadcast %5 : vector<1x32xf32> to vector<8x32xf32>
    %7 = arith.addf %4, %6 : vector<8x32xf32>
    %cst_5 = arith.constant 0.000000e+00 : f32
    %8 = vector.broadcast %cst_5 : f32 to vector<8x32xf32>
    %9 = arith.maximumf %7, %8 : vector<8x32xf32>
    %c0_6 = arith.constant 0 : index
    %c0_7 = arith.constant 0 : index
    %10 = vector.load %arg4[%c0_6, %c0_7] : memref<8x32xf32, #tpu.memory_space<vmem>>, vector<8x32xf32>
    tpu.vector_store %arg4[%c0_6, %c0_7], %9 {strides = array<i32>} : memref<8x32xf32, #tpu.memory_space<vmem>>, vector<8x32xf32>,
    return
  }
  func.func @transform_0(%arg0: i32) -> (i32, i32) {
    %c0_i32 = arith.constant 0 : i32
    %c0_i32_0 = arith.constant 0 : i32
    %c0_i32_1 = arith.constant 0 : i32
    return %c0_i32, %c0_i32_0 : i32, i32
  }
  func.func @transform_1(%arg0: i32) -> (i32, i32) {
    %c0_i32 = arith.constant 0 : i32
    %c0_i32_0 = arith.constant 0 : i32
    %c0_i32_1 = arith.constant 0 : i32
    return %c0_i32, %c0_i32_0 : i32, i32
  }
  func.func @transform_2(%arg0: i32) -> (i32, i32) {
    %c0_i32 = arith.constant 0 : i32
    %c0_i32_0 = arith.constant 0 : i32
    %c0_i32_1 = arith.constant 0 : i32
    return %c0_i32, %c0_i32_0 : i32, i32
  }
  func.func @transform_3(%arg0: i32) -> (i32, i32) {
    %c0_i32 = arith.constant 0 : i32
    %c0_i32_0 = arith.constant 0 : i32
    %c0_i32_1 = arith.constant 0 : i32
    return %c0_i32, %c0_i32_0 : i32, i32
  }
}

module attributes {stable_mosaic.version = 11 : i64} {
  func.func @_fuse_kernel(%arg0: i32, %arg1: memref<8x8x32xf32, #tpu.memory_space<vmem>>, %arg2: memref<1x8x32xf32, #tpu.memory_space<vmem>>, %arg3: memref<8x1x32xf32, #tpu.memory_space<vmem>>, %arg4: memref<8x8x32xf32, #tpu.memory_space<vmem>>) attributes {dimension_semantics = [#tpu.dimension_semantics<arbitrary>], iteration_bounds = array<i64: 1>, scalar_prefetch = 0 : i64, scratch_operands = 0 : i64, tpu.core_type = #tpu.core_type<tc>, window_params = [{pipeline_mode = #tpu.pipeline_mode<synchronous>, transform_indices = @transform_0, window_bounds = array<i64: 8, 8, 32>}, {pipeline_mode = #tpu.pipeline_mode<synchronous>, transform_indices = @transform_1, window_bounds = array<i64: 1, 8, 32>}, {pipeline_mode = #tpu.pipeline_mode<synchronous>, transform_indices = @transform_2, window_bounds = array<i64: 8, 1, 32>}, {pipeline_mode = #tpu.pipeline_mode<synchronous>, transform_indices = @transform_3, window_bounds = array<i64: 8, 8, 32>}]} {
    %c0 = arith.constant 0 : index
    %c0_0 = arith.constant 0 : index
    %c0_1 = arith.constant 0 : index
    %0 = vector.load %arg1[%c0, %c0_0, %c0_1] : memref<8x8x32xf32, #tpu.memory_space<vmem>>, vector<8x8x32xf32>
    %c0_2 = arith.constant 0 : index
    %c0_3 = arith.constant 0 : index
    %c0_4 = arith.constant 0 : index
    %1 = vector.load %arg2[%c0_2, %c0_3, %c0_4] : memref<1x8x32xf32, #tpu.memory_space<vmem>>, vector<1x8x32xf32>
    %2 = vector.broadcast %1 : vector<1x8x32xf32> to vector<8x8x32xf32>
    %3 = arith.addf %0, %2 : vector<8x8x32xf32>
    %c0_5 = arith.constant 0 : index
    %c0_6 = arith.constant 0 : index
    %c0_7 = arith.constant 0 : index
    %4 = vector.load %arg3[%c0_5, %c0_6, %c0_7] : memref<8x1x32xf32, #tpu.memory_space<vmem>>, vector<8x1x32xf32>
    %5 = vector.broadcast %4 : vector<8x1x32xf32> to vector<8x8x32xf32>
    %6 = arith.addf %3, %5 : vector<8x8x32xf32>
    %c0_8 = arith.constant 0 : index
    %c0_9 = arith.constant 0 : index
    %c0_10 = arith.constant 0 : index
    %7 = vector.load %arg4[%c0_8, %c0_9, %c0_10] : memref<8x8x32xf32, #tpu.memory_space<vmem>>, vector<8x8x32xf32>
    tpu.vector_store %arg4[%c0_8, %c0_9, %c0_10], %6 {strides = array<i32>} : memref<8x8x32xf32, #tpu.memory_space<vmem>>, vector<8x8x32xf32>,
    return
  }
  func.func @transform_0(%arg0: i32) -> (i32, i32, i32) {
    %c0_i32 = arith.constant 0 : i32
    %c0_i32_0 = arith.constant 0 : i32
    %c0_i32_1 = arith.constant 0 : i32
    %c0_i32_2 = arith.constant 0 : i32
    return %c0_i32, %c0_i32_0, %c0_i32_1 : i32, i32, i32
  }
  func.func @transform_1(%arg0: i32) -> (i32, i32, i32) {
    %c0_i32 = arith.constant 0 : i32
    %c0_i32_0 = arith.constant 0 : i32
    %c0_i32_1 = arith.constant 0 : i32
    %c0_i32_2 = arith.constant 0 : i32
    return %c0_i32, %c0_i32_0, %c0_i32_1 : i32, i32, i32
  }
  func.func @transform_2(%arg0: i32) -> (i32, i32, i32) {
    %c0_i32 = arith.constant 0 : i32
    %c0_i32_0 = arith.constant 0 : i32
    %c0_i32_1 = arith.constant 0 : i32
    %c0_i32_2 = arith.constant 0 : i32
    return %c0_i32, %c0_i32_0, %c0_i32_1 : i32, i32, i32
  }
  func.func @transform_3(%arg0: i32) -> (i32, i32, i32) {
    %c0_i32 = arith.constant 0 : i32
    %c0_i32_0 = arith.constant 0 : i32
    %c0_i32_1 = arith.constant 0 : i32
    %c0_i32_2 = arith.constant 0 : i32
    return %c0_i32, %c0_i32_0, %c0_i32_1 : i32, i32, i32
  }
}

module attributes {stable_mosaic.version = 11 : i64} {
  func.func @_encoder_layer_kernel(%arg0: i32, %arg1: memref<32x32xf32, #tpu.memory_space<vmem>>, %arg2: memref<1x32x32xf32, #tpu.memory_space<vmem>>, %arg3: memref<32x32xf32, #tpu.memory_space<vmem>>, %arg4: memref<1x32xf32, #tpu.memory_space<vmem>>, %arg5: memref<32x32xf32, #tpu.memory_space<vmem>>, %arg6: memref<1x32xf32, #tpu.memory_space<vmem>>, %arg7: memref<32x32xf32, #tpu.memory_space<vmem>>, %arg8: memref<1x32xf32, #tpu.memory_space<vmem>>, %arg9: memref<32x32xf32, #tpu.memory_space<vmem>>, %arg10: memref<1x32xf32, #tpu.memory_space<vmem>>, %arg11: memref<1x32xf32, #tpu.memory_space<vmem>>, %arg12: memref<1x32xf32, #tpu.memory_space<vmem>>, %arg13: memref<32x64xf32, #tpu.memory_space<vmem>>, %arg14: memref<1x64xf32, #tpu.memory_space<vmem>>, %arg15: memref<64x32xf32, #tpu.memory_space<vmem>>, %arg16: memref<1x32xf32, #tpu.memory_space<vmem>>, %arg17: memref<1x32xf32, #tpu.memory_space<vmem>>, %arg18: memref<1x32xf32, #tpu.memory_space<vmem>>, %arg19: memref<32x32xf32, #tpu.memory_space<vmem>>) attributes {dimension_semantics = [#tpu.dimension_semantics<parallel>], iteration_bounds = array<i64: 2>, scalar_prefetch = 0 : i64, scratch_operands = 0 : i64, tpu.core_type = #tpu.core_type<tc>, window_params = [{transform_indices = @transform_0, window_bounds = array<i64: 32, 32>}, {transform_indices = @transform_1, window_bounds = array<i64: 1, 32, 32>}, {pipeline_mode = #tpu.pipeline_mode<synchronous>, transform_indices = @transform_2, window_bounds = array<i64: 32, 32>}, {pipeline_mode = #tpu.pipeline_mode<synchronous>, transform_indices = @transform_3, window_bounds = array<i64: 1, 32>}, {pipeline_mode = #tpu.pipeline_mode<synchronous>, transform_indices = @transform_4, window_bounds = array<i64: 32, 32>}, {pipeline_mode = #tpu.pipeline_mode<synchronous>, transform_indices = @transform_5, window_bounds = array<i64: 1, 32>}, {pipeline_mode = #tpu.pipeline_mode<synchronous>, transform_indices = @transform_6, window_bounds = array<i64: 32, 32>}, {pipeline_mode = #tpu.pipeline_mode<synchronous>, transform_indices = @transform_7, window_bounds = array<i64: 1, 32>}, {pipeline_mode = #tpu.pipeline_mode<synchronous>, transform_indices = @transform_8, window_bounds = array<i64: 32, 32>}, {pipeline_mode = #tpu.pipeline_mode<synchronous>, transform_indices = @transform_9, window_bounds = array<i64: 1, 32>}, {pipeline_mode = #tpu.pipeline_mode<synchronous>, transform_indices = @transform_10, window_bounds = array<i64: 1, 32>}, {pipeline_mode = #tpu.pipeline_mode<synchronous>, transform_indices = @transform_11, window_bounds = array<i64: 1, 32>}, {pipeline_mode = #tpu.pipeline_mode<synchronous>, transform_indices = @transform_12, window_bounds = array<i64: 32, 64>}, {pipeline_mode = #tpu.pipeline_mode<synchronous>, transform_indices = @transform_13, window_bounds = array<i64: 1, 64>}, {pipeline_mode = #tpu.pipeline_mode<synchronous>, transform_indices = @transform_14, window_bounds = array<i64: 64, 32>}, {pipeline_mode = #tpu.pipeline_mode<synchronous>, transform_indices = @transform_15, window_bounds = array<i64: 1, 32>}, {pipeline_mode = #tpu.pipeline_mode<synchronous>, transform_indices = @transform_16, window_bounds = array<i64: 1, 32>}, {pipeline_mode = #tpu.pipeline_mode<synchronous>, transform_indices = @transform_17, window_bounds = array<i64: 1, 32>}, {transform_indices = @transform_18, window_bounds = array<i64: 32, 32>}]} {
    %c0 = arith.constant 0 : index
    %c0_0 = arith.constant 0 : index
    %0 = vector.load %arg1[%c0, %c0_0] : memref<32x32xf32, #tpu.memory_space<vmem>>, vector<32x32xf32>
    %1 = arith.truncf %0 : vector<32x32xf32> to vector<32x32xbf16>
    %c0_1 = arith.constant 0 : index
    %c0_2 = arith.constant 0 : index
    %2 = vector.load %arg3[%c0_1, %c0_2] : memref<32x32xf32, #tpu.memory_space<vmem>>, vector<32x32xf32>
    %3 = arith.truncf %2 : vector<32x32xf32> to vector<32x32xbf16>
    %cst = arith.constant dense<0.000000e+00> : vector<32x32xf32>
    %4 = tpu.matmul %1, %3, %cst {dimension_numbers = #tpu.dot_dimension_numbers<[1], [0], [0], [1], [0, 0, 1, 1], [], []>} : vector<32x32xbf16>, vector<32x32xbf16>, vector<32x32xf32> -> vector<32x32xf32>
    %c0_3 = arith.constant 0 : index
    %c0_4 = arith.constant 0 : index
    %5 = vector.load %arg4[%c0_3, %c0_4] : memref<1x32xf32, #tpu.memory_space<vmem>>, vector<1x32xf32>
    %6 = vector.broadcast %5 : vector<1x32xf32> to vector<32x32xf32>
    %7 = arith.addf %4, %6 : vector<32x32xf32>
    %cst_5 = arith.constant 5.000000e-01 : f32
    %8 = vector.broadcast %cst_5 : f32 to vector<32x32xf32>
    %9 = arith.mulf %7, %8 : vector<32x32xf32>
    %10 = arith.truncf %0 : vector<32x32xf32> to vector<32x32xbf16>
    %c0_6 = arith.constant 0 : index
    %c0_7 = arith.constant 0 : index
    %11 = vector.load %arg5[%c0_6, %c0_7] : memref<32x32xf32, #tpu.memory_space<vmem>>, vector<32x32xf32>
    %12 = arith.truncf %11 : vector<32x32xf32> to vector<32x32xbf16>
    %cst_8 = arith.constant dense<0.000000e+00> : vector<32x32xf32>
    %13 = tpu.matmul %10, %12, %cst_8 {dimension_numbers = #tpu.dot_dimension_numbers<[1], [0], [0], [1], [0, 0, 1, 1], [], []>} : vector<32x32xbf16>, vector<32x32xbf16>, vector<32x32xf32> -> vector<32x32xf32>
    %c0_9 = arith.constant 0 : index
    %c0_10 = arith.constant 0 : index
    %14 = vector.load %arg6[%c0_9, %c0_10] : memref<1x32xf32, #tpu.memory_space<vmem>>, vector<1x32xf32>
    %15 = vector.broadcast %14 : vector<1x32xf32> to vector<32x32xf32>
    %16 = arith.addf %13, %15 : vector<32x32xf32>
    %17 = arith.truncf %0 : vector<32x32xf32> to vector<32x32xbf16>
    %c0_11 = arith.constant 0 : index
    %c0_12 = arith.constant 0 : index
    %18 = vector.load %arg7[%c0_11, %c0_12] : memref<32x32xf32, #tpu.memory_space<vmem>>, vector<32x32xf32>
    %19 = arith.truncf %18 : vector<32x32xf32> to vector<32x32xbf16>
    %cst_13 = arith.constant dense<0.000000e+00> : vector<32x32xf32>
    %20 = tpu.matmul %17, %19, %cst_13 {dimension_numbers = #tpu.dot_dimension_numbers<[1], [0], [0], [1], [0, 0, 1, 1], [], []>} : vector<32x32xbf16>, vector<32x32xbf16>, vector<32x32xf32> -> vector<32x32xf32>
    %c0_14 = arith.constant 0 : index
    %c0_15 = arith.constant 0 : index
    %21 = vector.load %arg8[%c0_14, %c0_15] : memref<1x32xf32, #tpu.memory_space<vmem>>, vector<1x32xf32>
    %22 = vector.broadcast %21 : vector<1x32xf32> to vector<32x32xf32>
    %23 = arith.addf %20, %22 : vector<32x32xf32>
    %c0_16 = arith.constant 0 : index
    %c0_17 = arith.constant 0 : index
    %c0_18 = arith.constant 0 : index
    %24 = vector.load %arg2[%c0_16, %c0_17, %c0_18] : memref<1x32x32xf32, #tpu.memory_space<vmem>>, vector<1x32x32xf32>
    %25 = vector.shape_cast %24 : vector<1x32x32xf32> to vector<32x32xf32>
    %26 = tpu.iota {dimensions = array<i32: 1>} : vector<1x32xi32>
    %cst_19 = arith.constant 0.000000e+00 : f32
    %27 = vector.broadcast %cst_19 : f32 to vector<32x32xf32>
    %c0_i32 = arith.constant 0 : i32
    %28 = vector.broadcast %c0_i32 : i32 to vector<1x32xi32>
    %29 = arith.cmpi sge, %26, %28 : vector<1x32xi32>
    %c4_i32 = arith.constant 4 : i32
    %30 = vector.broadcast %c4_i32 : i32 to vector<1x32xi32>
    %31 = arith.cmpi slt, %26, %30 : vector<1x32xi32>
    %32 = arith.andi %29, %31 : vector<1x32xi1>
    %cst_20 = arith.constant 0.000000e+00 : f32
    %33 = vector.shape_cast %32 : vector<1x32xi1> to vector<1x32xi1>
    %34 = vector.broadcast %33 : vector<1x32xi1> to vector<32x32xi1>
    %35 = vector.broadcast %cst_20 : f32 to vector<32x32xf32>
    %36 = arith.select %34, %9, %35 : vector<32x32xi1>, vector<32x32xf32>
    %cst_21 = arith.constant dense<0.000000e+00> : vector<32x32xf32>
    %37 = tpu.matmul %36, %16, %cst_21 {dimension_numbers = #tpu.dot_dimension_numbers<[1], [1], [0], [0], [0, 0, 1, 0], [], []>} : vector<32x32xf32>, vector<32x32xf32>, vector<32x32xf32> -> vector<32x32xf32>
    %38 = arith.addf %37, %25 : vector<32x32xf32>
    %cst_22 = arith.constant dense<0xFF800000> : vector<32xf32>
    %39 = vector.multi_reduction <maximumf>, %38, %cst_22 [1] : vector<32x32xf32> to vector<32xf32>
    %40 = vector.shape_cast %39 : vector<32xf32> to vector<32x1xf32>
    %41 = vector.broadcast %40 : vector<32x1xf32> to vector<32x32xf32>
    %42 = arith.subf %38, %41 : vector<32x32xf32>
    %43 = math.exp %42 : vector<32x32xf32>
    %cst_23 = arith.constant dense<0.000000e+00> : vector<32xf32>
    %44 = vector.multi_reduction <add>, %43, %cst_23 [1] : vector<32x32xf32> to vector<32xf32>
    %45 = vector.shape_cast %44 : vector<32xf32> to vector<32x1xf32>
    %46 = tpu.reciprocal %45 {approx = true} : vector<32x1xf32> -> vector<32x1xf32>
    %47 = vector.broadcast %46 : vector<32x1xf32> to vector<32x32xf32>
    %48 = arith.mulf %43, %47 : vector<32x32xf32>
    %cst_24 = arith.constant dense<0.000000e+00> : vector<32x32xf32>
    %49 = tpu.matmul %48, %23, %cst_24 {dimension_numbers = #tpu.dot_dimension_numbers<[1], [0], [0], [1], [0, 0, 1, 1], [], []>} : vector<32x32xf32>, vector<32x32xf32>, vector<32x32xf32> -> vector<32x32xf32>
    %cst_25 = arith.constant 0.000000e+00 : f32
    %50 = vector.shape_cast %32 : vector<1x32xi1> to vector<1x32xi1>
    %51 = vector.broadcast %50 : vector<1x32xi1> to vector<32x32xi1>
    %52 = vector.broadcast %cst_25 : f32 to vector<32x32xf32>
    %53 = arith.select %51, %49, %52 : vector<32x32xi1>, vector<32x32xf32>
    %54 = arith.addf %27, %53 : vector<32x32xf32>
    %c4_i32_26 = arith.constant 4 : i32
    %55 = vector.broadcast %c4_i32_26 : i32 to vector<1x32xi32>
    %56 = arith.cmpi sge, %26, %55 : vector<1x32xi32>
    %c8_i32 = arith.constant 8 : i32
    %57 = vector.broadcast %c8_i32 : i32 to vector<1x32xi32>
    %58 = arith.cmpi slt, %26, %57 : vector<1x32xi32>
    %59 = arith.andi %56, %58 : vector<1x32xi1>
    %cst_27 = arith.constant 0.000000e+00 : f32
    %60 = vector.shape_cast %59 : vector<1x32xi1> to vector<1x32xi1>
    %61 = vector.broadcast %60 : vector<1x32xi1> to vector<32x32xi1>
    %62 = vector.broadcast %cst_27 : f32 to vector<32x32xf32>
    %63 = arith.select %61, %9, %62 : vector<32x32xi1>, vector<32x32xf32>
    %cst_28 = arith.constant dense<0.000000e+00> : vector<32x32xf32>
    %64 = tpu.matmul %63, %16, %cst_28 {dimension_numbers = #tpu.dot_dimension_numbers<[1], [1], [0], [0], [0, 0, 1, 0], [], []>} : vector<32x32xf32>, vector<32x32xf32>, vector<32x32xf32> -> vector<32x32xf32>
    %65 = arith.addf %64, %25 : vector<32x32xf32>
    %cst_29 = arith.constant dense<0xFF800000> : vector<32xf32>
    %66 = vector.multi_reduction <maximumf>, %65, %cst_29 [1] : vector<32x32xf32> to vector<32xf32>
    %67 = vector.shape_cast %66 : vector<32xf32> to vector<32x1xf32>
    %68 = vector.broadcast %67 : vector<32x1xf32> to vector<32x32xf32>
    %69 = arith.subf %65, %68 : vector<32x32xf32>
    %70 = math.exp %69 : vector<32x32xf32>
    %cst_30 = arith.constant dense<0.000000e+00> : vector<32xf32>
    %71 = vector.multi_reduction <add>, %70, %cst_30 [1] : vector<32x32xf32> to vector<32xf32>
    %72 = vector.shape_cast %71 : vector<32xf32> to vector<32x1xf32>
    %73 = tpu.reciprocal %72 {approx = true} : vector<32x1xf32> -> vector<32x1xf32>
    %74 = vector.broadcast %73 : vector<32x1xf32> to vector<32x32xf32>
    %75 = arith.mulf %70, %74 : vector<32x32xf32>
    %cst_31 = arith.constant dense<0.000000e+00> : vector<32x32xf32>
    %76 = tpu.matmul %75, %23, %cst_31 {dimension_numbers = #tpu.dot_dimension_numbers<[1], [0], [0], [1], [0, 0, 1, 1], [], []>} : vector<32x32xf32>, vector<32x32xf32>, vector<32x32xf32> -> vector<32x32xf32>
    %cst_32 = arith.constant 0.000000e+00 : f32
    %77 = vector.shape_cast %59 : vector<1x32xi1> to vector<1x32xi1>
    %78 = vector.broadcast %77 : vector<1x32xi1> to vector<32x32xi1>
    %79 = vector.broadcast %cst_32 : f32 to vector<32x32xf32>
    %80 = arith.select %78, %76, %79 : vector<32x32xi1>, vector<32x32xf32>
    %81 = arith.addf %54, %80 : vector<32x32xf32>
    %c8_i32_33 = arith.constant 8 : i32
    %82 = vector.broadcast %c8_i32_33 : i32 to vector<1x32xi32>
    %83 = arith.cmpi sge, %26, %82 : vector<1x32xi32>
    %c12_i32 = arith.constant 12 : i32
    %84 = vector.broadcast %c12_i32 : i32 to vector<1x32xi32>
    %85 = arith.cmpi slt, %26, %84 : vector<1x32xi32>
    %86 = arith.andi %83, %85 : vector<1x32xi1>
    %cst_34 = arith.constant 0.000000e+00 : f32
    %87 = vector.shape_cast %86 : vector<1x32xi1> to vector<1x32xi1>
    %88 = vector.broadcast %87 : vector<1x32xi1> to vector<32x32xi1>
    %89 = vector.broadcast %cst_34 : f32 to vector<32x32xf32>
    %90 = arith.select %88, %9, %89 : vector<32x32xi1>, vector<32x32xf32>
    %cst_35 = arith.constant dense<0.000000e+00> : vector<32x32xf32>
    %91 = tpu.matmul %90, %16, %cst_35 {dimension_numbers = #tpu.dot_dimension_numbers<[1], [1], [0], [0], [0, 0, 1, 0], [], []>} : vector<32x32xf32>, vector<32x32xf32>, vector<32x32xf32> -> vector<32x32xf32>
    %92 = arith.addf %91, %25 : vector<32x32xf32>
    %cst_36 = arith.constant dense<0xFF800000> : vector<32xf32>
    %93 = vector.multi_reduction <maximumf>, %92, %cst_36 [1] : vector<32x32xf32> to vector<32xf32>
    %94 = vector.shape_cast %93 : vector<32xf32> to vector<32x1xf32>
    %95 = vector.broadcast %94 : vector<32x1xf32> to vector<32x32xf32>
    %96 = arith.subf %92, %95 : vector<32x32xf32>
    %97 = math.exp %96 : vector<32x32xf32>
    %cst_37 = arith.constant dense<0.000000e+00> : vector<32xf32>
    %98 = vector.multi_reduction <add>, %97, %cst_37 [1] : vector<32x32xf32> to vector<32xf32>
    %99 = vector.shape_cast %98 : vector<32xf32> to vector<32x1xf32>
    %100 = tpu.reciprocal %99 {approx = true} : vector<32x1xf32> -> vector<32x1xf32>
    %101 = vector.broadcast %100 : vector<32x1xf32> to vector<32x32xf32>
    %102 = arith.mulf %97, %101 : vector<32x32xf32>
    %cst_38 = arith.constant dense<0.000000e+00> : vector<32x32xf32>
    %103 = tpu.matmul %102, %23, %cst_38 {dimension_numbers = #tpu.dot_dimension_numbers<[1], [0], [0], [1], [0, 0, 1, 1], [], []>} : vector<32x32xf32>, vector<32x32xf32>, vector<32x32xf32> -> vector<32x32xf32>
    %cst_39 = arith.constant 0.000000e+00 : f32
    %104 = vector.shape_cast %86 : vector<1x32xi1> to vector<1x32xi1>
    %105 = vector.broadcast %104 : vector<1x32xi1> to vector<32x32xi1>
    %106 = vector.broadcast %cst_39 : f32 to vector<32x32xf32>
    %107 = arith.select %105, %103, %106 : vector<32x32xi1>, vector<32x32xf32>
    %108 = arith.addf %81, %107 : vector<32x32xf32>
    %c12_i32_40 = arith.constant 12 : i32
    %109 = vector.broadcast %c12_i32_40 : i32 to vector<1x32xi32>
    %110 = arith.cmpi sge, %26, %109 : vector<1x32xi32>
    %c16_i32 = arith.constant 16 : i32
    %111 = vector.broadcast %c16_i32 : i32 to vector<1x32xi32>
    %112 = arith.cmpi slt, %26, %111 : vector<1x32xi32>
    %113 = arith.andi %110, %112 : vector<1x32xi1>
    %cst_41 = arith.constant 0.000000e+00 : f32
    %114 = vector.shape_cast %113 : vector<1x32xi1> to vector<1x32xi1>
    %115 = vector.broadcast %114 : vector<1x32xi1> to vector<32x32xi1>
    %116 = vector.broadcast %cst_41 : f32 to vector<32x32xf32>
    %117 = arith.select %115, %9, %116 : vector<32x32xi1>, vector<32x32xf32>
    %cst_42 = arith.constant dense<0.000000e+00> : vector<32x32xf32>
    %118 = tpu.matmul %117, %16, %cst_42 {dimension_numbers = #tpu.dot_dimension_numbers<[1], [1], [0], [0], [0, 0, 1, 0], [], []>} : vector<32x32xf32>, vector<32x32xf32>, vector<32x32xf32> -> vector<32x32xf32>
    %119 = arith.addf %118, %25 : vector<32x32xf32>
    %cst_43 = arith.constant dense<0xFF800000> : vector<32xf32>
    %120 = vector.multi_reduction <maximumf>, %119, %cst_43 [1] : vector<32x32xf32> to vector<32xf32>
    %121 = vector.shape_cast %120 : vector<32xf32> to vector<32x1xf32>
    %122 = vector.broadcast %121 : vector<32x1xf32> to vector<32x32xf32>
    %123 = arith.subf %119, %122 : vector<32x32xf32>
    %124 = math.exp %123 : vector<32x32xf32>
    %cst_44 = arith.constant dense<0.000000e+00> : vector<32xf32>
    %125 = vector.multi_reduction <add>, %124, %cst_44 [1] : vector<32x32xf32> to vector<32xf32>
    %126 = vector.shape_cast %125 : vector<32xf32> to vector<32x1xf32>
    %127 = tpu.reciprocal %126 {approx = true} : vector<32x1xf32> -> vector<32x1xf32>
    %128 = vector.broadcast %127 : vector<32x1xf32> to vector<32x32xf32>
    %129 = arith.mulf %124, %128 : vector<32x32xf32>
    %cst_45 = arith.constant dense<0.000000e+00> : vector<32x32xf32>
    %130 = tpu.matmul %129, %23, %cst_45 {dimension_numbers = #tpu.dot_dimension_numbers<[1], [0], [0], [1], [0, 0, 1, 1], [], []>} : vector<32x32xf32>, vector<32x32xf32>, vector<32x32xf32> -> vector<32x32xf32>
    %cst_46 = arith.constant 0.000000e+00 : f32
    %131 = vector.shape_cast %113 : vector<1x32xi1> to vector<1x32xi1>
    %132 = vector.broadcast %131 : vector<1x32xi1> to vector<32x32xi1>
    %133 = vector.broadcast %cst_46 : f32 to vector<32x32xf32>
    %134 = arith.select %132, %130, %133 : vector<32x32xi1>, vector<32x32xf32>
    %135 = arith.addf %108, %134 : vector<32x32xf32>
    %c16_i32_47 = arith.constant 16 : i32
    %136 = vector.broadcast %c16_i32_47 : i32 to vector<1x32xi32>
    %137 = arith.cmpi sge, %26, %136 : vector<1x32xi32>
    %c20_i32 = arith.constant 20 : i32
    %138 = vector.broadcast %c20_i32 : i32 to vector<1x32xi32>
    %139 = arith.cmpi slt, %26, %138 : vector<1x32xi32>
    %140 = arith.andi %137, %139 : vector<1x32xi1>
    %cst_48 = arith.constant 0.000000e+00 : f32
    %141 = vector.shape_cast %140 : vector<1x32xi1> to vector<1x32xi1>
    %142 = vector.broadcast %141 : vector<1x32xi1> to vector<32x32xi1>
    %143 = vector.broadcast %cst_48 : f32 to vector<32x32xf32>
    %144 = arith.select %142, %9, %143 : vector<32x32xi1>, vector<32x32xf32>
    %cst_49 = arith.constant dense<0.000000e+00> : vector<32x32xf32>
    %145 = tpu.matmul %144, %16, %cst_49 {dimension_numbers = #tpu.dot_dimension_numbers<[1], [1], [0], [0], [0, 0, 1, 0], [], []>} : vector<32x32xf32>, vector<32x32xf32>, vector<32x32xf32> -> vector<32x32xf32>
    %146 = arith.addf %145, %25 : vector<32x32xf32>
    %cst_50 = arith.constant dense<0xFF800000> : vector<32xf32>
    %147 = vector.multi_reduction <maximumf>, %146, %cst_50 [1] : vector<32x32xf32> to vector<32xf32>
    %148 = vector.shape_cast %147 : vector<32xf32> to vector<32x1xf32>
    %149 = vector.broadcast %148 : vector<32x1xf32> to vector<32x32xf32>
    %150 = arith.subf %146, %149 : vector<32x32xf32>
    %151 = math.exp %150 : vector<32x32xf32>
    %cst_51 = arith.constant dense<0.000000e+00> : vector<32xf32>
    %152 = vector.multi_reduction <add>, %151, %cst_51 [1] : vector<32x32xf32> to vector<32xf32>
    %153 = vector.shape_cast %152 : vector<32xf32> to vector<32x1xf32>
    %154 = tpu.reciprocal %153 {approx = true} : vector<32x1xf32> -> vector<32x1xf32>
    %155 = vector.broadcast %154 : vector<32x1xf32> to vector<32x32xf32>
    %156 = arith.mulf %151, %155 : vector<32x32xf32>
    %cst_52 = arith.constant dense<0.000000e+00> : vector<32x32xf32>
    %157 = tpu.matmul %156, %23, %cst_52 {dimension_numbers = #tpu.dot_dimension_numbers<[1], [0], [0], [1], [0, 0, 1, 1], [], []>} : vector<32x32xf32>, vector<32x32xf32>, vector<32x32xf32> -> vector<32x32xf32>
    %cst_53 = arith.constant 0.000000e+00 : f32
    %158 = vector.shape_cast %140 : vector<1x32xi1> to vector<1x32xi1>
    %159 = vector.broadcast %158 : vector<1x32xi1> to vector<32x32xi1>
    %160 = vector.broadcast %cst_53 : f32 to vector<32x32xf32>
    %161 = arith.select %159, %157, %160 : vector<32x32xi1>, vector<32x32xf32>
    %162 = arith.addf %135, %161 : vector<32x32xf32>
    %c20_i32_54 = arith.constant 20 : i32
    %163 = vector.broadcast %c20_i32_54 : i32 to vector<1x32xi32>
    %164 = arith.cmpi sge, %26, %163 : vector<1x32xi32>
    %c24_i32 = arith.constant 24 : i32
    %165 = vector.broadcast %c24_i32 : i32 to vector<1x32xi32>
    %166 = arith.cmpi slt, %26, %165 : vector<1x32xi32>
    %167 = arith.andi %164, %166 : vector<1x32xi1>
    %cst_55 = arith.constant 0.000000e+00 : f32
    %168 = vector.shape_cast %167 : vector<1x32xi1> to vector<1x32xi1>
    %169 = vector.broadcast %168 : vector<1x32xi1> to vector<32x32xi1>
    %170 = vector.broadcast %cst_55 : f32 to vector<32x32xf32>
    %171 = arith.select %169, %9, %170 : vector<32x32xi1>, vector<32x32xf32>
    %cst_56 = arith.constant dense<0.000000e+00> : vector<32x32xf32>
    %172 = tpu.matmul %171, %16, %cst_56 {dimension_numbers = #tpu.dot_dimension_numbers<[1], [1], [0], [0], [0, 0, 1, 0], [], []>} : vector<32x32xf32>, vector<32x32xf32>, vector<32x32xf32> -> vector<32x32xf32>
    %173 = arith.addf %172, %25 : vector<32x32xf32>
    %cst_57 = arith.constant dense<0xFF800000> : vector<32xf32>
    %174 = vector.multi_reduction <maximumf>, %173, %cst_57 [1] : vector<32x32xf32> to vector<32xf32>
    %175 = vector.shape_cast %174 : vector<32xf32> to vector<32x1xf32>
    %176 = vector.broadcast %175 : vector<32x1xf32> to vector<32x32xf32>
    %177 = arith.subf %173, %176 : vector<32x32xf32>
    %178 = math.exp %177 : vector<32x32xf32>
    %cst_58 = arith.constant dense<0.000000e+00> : vector<32xf32>
    %179 = vector.multi_reduction <add>, %178, %cst_58 [1] : vector<32x32xf32> to vector<32xf32>
    %180 = vector.shape_cast %179 : vector<32xf32> to vector<32x1xf32>
    %181 = tpu.reciprocal %180 {approx = true} : vector<32x1xf32> -> vector<32x1xf32>
    %182 = vector.broadcast %181 : vector<32x1xf32> to vector<32x32xf32>
    %183 = arith.mulf %178, %182 : vector<32x32xf32>
    %cst_59 = arith.constant dense<0.000000e+00> : vector<32x32xf32>
    %184 = tpu.matmul %183, %23, %cst_59 {dimension_numbers = #tpu.dot_dimension_numbers<[1], [0], [0], [1], [0, 0, 1, 1], [], []>} : vector<32x32xf32>, vector<32x32xf32>, vector<32x32xf32> -> vector<32x32xf32>
    %cst_60 = arith.constant 0.000000e+00 : f32
    %185 = vector.shape_cast %167 : vector<1x32xi1> to vector<1x32xi1>
    %186 = vector.broadcast %185 : vector<1x32xi1> to vector<32x32xi1>
    %187 = vector.broadcast %cst_60 : f32 to vector<32x32xf32>
    %188 = arith.select %186, %184, %187 : vector<32x32xi1>, vector<32x32xf32>
    %189 = arith.addf %162, %188 : vector<32x32xf32>
    %c24_i32_61 = arith.constant 24 : i32
    %190 = vector.broadcast %c24_i32_61 : i32 to vector<1x32xi32>
    %191 = arith.cmpi sge, %26, %190 : vector<1x32xi32>
    %c28_i32 = arith.constant 28 : i32
    %192 = vector.broadcast %c28_i32 : i32 to vector<1x32xi32>
    %193 = arith.cmpi slt, %26, %192 : vector<1x32xi32>
    %194 = arith.andi %191, %193 : vector<1x32xi1>
    %cst_62 = arith.constant 0.000000e+00 : f32
    %195 = vector.shape_cast %194 : vector<1x32xi1> to vector<1x32xi1>
    %196 = vector.broadcast %195 : vector<1x32xi1> to vector<32x32xi1>
    %197 = vector.broadcast %cst_62 : f32 to vector<32x32xf32>
    %198 = arith.select %196, %9, %197 : vector<32x32xi1>, vector<32x32xf32>
    %cst_63 = arith.constant dense<0.000000e+00> : vector<32x32xf32>
    %199 = tpu.matmul %198, %16, %cst_63 {dimension_numbers = #tpu.dot_dimension_numbers<[1], [1], [0], [0], [0, 0, 1, 0], [], []>} : vector<32x32xf32>, vector<32x32xf32>, vector<32x32xf32> -> vector<32x32xf32>
    %200 = arith.addf %199, %25 : vector<32x32xf32>
    %cst_64 = arith.constant dense<0xFF800000> : vector<32xf32>
    %201 = vector.multi_reduction <maximumf>, %200, %cst_64 [1] : vector<32x32xf32> to vector<32xf32>
    %202 = vector.shape_cast %201 : vector<32xf32> to vector<32x1xf32>
    %203 = vector.broadcast %202 : vector<32x1xf32> to vector<32x32xf32>
    %204 = arith.subf %200, %203 : vector<32x32xf32>
    %205 = math.exp %204 : vector<32x32xf32>
    %cst_65 = arith.constant dense<0.000000e+00> : vector<32xf32>
    %206 = vector.multi_reduction <add>, %205, %cst_65 [1] : vector<32x32xf32> to vector<32xf32>
    %207 = vector.shape_cast %206 : vector<32xf32> to vector<32x1xf32>
    %208 = tpu.reciprocal %207 {approx = true} : vector<32x1xf32> -> vector<32x1xf32>
    %209 = vector.broadcast %208 : vector<32x1xf32> to vector<32x32xf32>
    %210 = arith.mulf %205, %209 : vector<32x32xf32>
    %cst_66 = arith.constant dense<0.000000e+00> : vector<32x32xf32>
    %211 = tpu.matmul %210, %23, %cst_66 {dimension_numbers = #tpu.dot_dimension_numbers<[1], [0], [0], [1], [0, 0, 1, 1], [], []>} : vector<32x32xf32>, vector<32x32xf32>, vector<32x32xf32> -> vector<32x32xf32>
    %cst_67 = arith.constant 0.000000e+00 : f32
    %212 = vector.shape_cast %194 : vector<1x32xi1> to vector<1x32xi1>
    %213 = vector.broadcast %212 : vector<1x32xi1> to vector<32x32xi1>
    %214 = vector.broadcast %cst_67 : f32 to vector<32x32xf32>
    %215 = arith.select %213, %211, %214 : vector<32x32xi1>, vector<32x32xf32>
    %216 = arith.addf %189, %215 : vector<32x32xf32>
    %c28_i32_68 = arith.constant 28 : i32
    %217 = vector.broadcast %c28_i32_68 : i32 to vector<1x32xi32>
    %218 = arith.cmpi sge, %26, %217 : vector<1x32xi32>
    %c32_i32 = arith.constant 32 : i32
    %219 = vector.broadcast %c32_i32 : i32 to vector<1x32xi32>
    %220 = arith.cmpi slt, %26, %219 : vector<1x32xi32>
    %221 = arith.andi %218, %220 : vector<1x32xi1>
    %cst_69 = arith.constant 0.000000e+00 : f32
    %222 = vector.shape_cast %221 : vector<1x32xi1> to vector<1x32xi1>
    %223 = vector.broadcast %222 : vector<1x32xi1> to vector<32x32xi1>
    %224 = vector.broadcast %cst_69 : f32 to vector<32x32xf32>
    %225 = arith.select %223, %9, %224 : vector<32x32xi1>, vector<32x32xf32>
    %cst_70 = arith.constant dense<0.000000e+00> : vector<32x32xf32>
    %226 = tpu.matmul %225, %16, %cst_70 {dimension_numbers = #tpu.dot_dimension_numbers<[1], [1], [0], [0], [0, 0, 1, 0], [], []>} : vector<32x32xf32>, vector<32x32xf32>, vector<32x32xf32> -> vector<32x32xf32>
    %227 = arith.addf %226, %25 : vector<32x32xf32>
    %cst_71 = arith.constant dense<0xFF800000> : vector<32xf32>
    %228 = vector.multi_reduction <maximumf>, %227, %cst_71 [1] : vector<32x32xf32> to vector<32xf32>
    %229 = vector.shape_cast %228 : vector<32xf32> to vector<32x1xf32>
    %230 = vector.broadcast %229 : vector<32x1xf32> to vector<32x32xf32>
    %231 = arith.subf %227, %230 : vector<32x32xf32>
    %232 = math.exp %231 : vector<32x32xf32>
    %cst_72 = arith.constant dense<0.000000e+00> : vector<32xf32>
    %233 = vector.multi_reduction <add>, %232, %cst_72 [1] : vector<32x32xf32> to vector<32xf32>
    %234 = vector.shape_cast %233 : vector<32xf32> to vector<32x1xf32>
    %235 = tpu.reciprocal %234 {approx = true} : vector<32x1xf32> -> vector<32x1xf32>
    %236 = vector.broadcast %235 : vector<32x1xf32> to vector<32x32xf32>
    %237 = arith.mulf %232, %236 : vector<32x32xf32>
    %cst_73 = arith.constant dense<0.000000e+00> : vector<32x32xf32>
    %238 = tpu.matmul %237, %23, %cst_73 {dimension_numbers = #tpu.dot_dimension_numbers<[1], [0], [0], [1], [0, 0, 1, 1], [], []>} : vector<32x32xf32>, vector<32x32xf32>, vector<32x32xf32> -> vector<32x32xf32>
    %cst_74 = arith.constant 0.000000e+00 : f32
    %239 = vector.shape_cast %221 : vector<1x32xi1> to vector<1x32xi1>
    %240 = vector.broadcast %239 : vector<1x32xi1> to vector<32x32xi1>
    %241 = vector.broadcast %cst_74 : f32 to vector<32x32xf32>
    %242 = arith.select %240, %238, %241 : vector<32x32xi1>, vector<32x32xf32>
    %243 = arith.addf %216, %242 : vector<32x32xf32>
    %244 = arith.truncf %243 : vector<32x32xf32> to vector<32x32xbf16>
    %c0_75 = arith.constant 0 : index
    %c0_76 = arith.constant 0 : index
    %245 = vector.load %arg9[%c0_75, %c0_76] : memref<32x32xf32, #tpu.memory_space<vmem>>, vector<32x32xf32>
    %246 = arith.truncf %245 : vector<32x32xf32> to vector<32x32xbf16>
    %cst_77 = arith.constant dense<0.000000e+00> : vector<32x32xf32>
    %247 = tpu.matmul %244, %246, %cst_77 {dimension_numbers = #tpu.dot_dimension_numbers<[1], [0], [0], [1], [0, 0, 1, 1], [], []>} : vector<32x32xbf16>, vector<32x32xbf16>, vector<32x32xf32> -> vector<32x32xf32>
    %c0_78 = arith.constant 0 : index
    %c0_79 = arith.constant 0 : index
    %248 = vector.load %arg10[%c0_78, %c0_79] : memref<1x32xf32, #tpu.memory_space<vmem>>, vector<1x32xf32>
    %249 = vector.broadcast %248 : vector<1x32xf32> to vector<32x32xf32>
    %250 = arith.addf %247, %249 : vector<32x32xf32>
    %251 = arith.addf %0, %250 : vector<32x32xf32>
    %c0_80 = arith.constant 0 : index
    %c0_81 = arith.constant 0 : index
    %252 = vector.load %arg11[%c0_80, %c0_81] : memref<1x32xf32, #tpu.memory_space<vmem>>, vector<1x32xf32>
    %c0_82 = arith.constant 0 : index
    %c0_83 = arith.constant 0 : index
    %253 = vector.load %arg12[%c0_82, %c0_83] : memref<1x32xf32, #tpu.memory_space<vmem>>, vector<1x32xf32>
    %cst_84 = arith.constant dense<0.000000e+00> : vector<32xf32>
    %254 = vector.multi_reduction <add>, %251, %cst_84 [1] : vector<32x32xf32> to vector<32xf32>
    %255 = vector.shape_cast %254 : vector<32xf32> to vector<32x1xf32>
    %cst_85 = arith.constant 3.200000e+01 : f32
    %256 = vector.broadcast %cst_85 : f32 to vector<32x1xf32>
    %257 = arith.divf %255, %256 : vector<32x1xf32>
    %258 = vector.broadcast %257 : vector<32x1xf32> to vector<32x32xf32>
    %259 = arith.subf %251, %258 : vector<32x32xf32>
    %260 = arith.mulf %259, %259 : vector<32x32xf32>
    %cst_86 = arith.constant dense<0.000000e+00> : vector<32xf32>
    %261 = vector.multi_reduction <add>, %260, %cst_86 [1] : vector<32x32xf32> to vector<32xf32>
    %262 = vector.shape_cast %261 : vector<32xf32> to vector<32x1xf32>
    %cst_87 = arith.constant 3.200000e+01 : f32
    %263 = vector.broadcast %cst_87 : f32 to vector<32x1xf32>
    %264 = arith.divf %262, %263 : vector<32x1xf32>
    %cst_88 = arith.constant 9.99999974E-6 : f32
    %265 = vector.broadcast %cst_88 : f32 to vector<32x1xf32>
    %266 = arith.addf %264, %265 : vector<32x1xf32>
    %267 = math.rsqrt %266 : vector<32x1xf32>
    %268 = vector.broadcast %267 : vector<32x1xf32> to vector<32x32xf32>
    %269 = arith.mulf %259, %268 : vector<32x32xf32>
    %270 = vector.broadcast %252 : vector<1x32xf32> to vector<32x32xf32>
    %271 = arith.mulf %269, %270 : vector<32x32xf32>
    %272 = vector.broadcast %253 : vector<1x32xf32> to vector<32x32xf32>
    %273 = arith.addf %271, %272 : vector<32x32xf32>
    %274 = arith.truncf %273 : vector<32x32xf32> to vector<32x32xbf16>
    %c0_89 = arith.constant 0 : index
    %c0_90 = arith.constant 0 : index
    %275 = vector.load %arg13[%c0_89, %c0_90] : memref<32x64xf32, #tpu.memory_space<vmem>>, vector<32x64xf32>
    %276 = arith.truncf %275 : vector<32x64xf32> to vector<32x64xbf16>
    %cst_91 = arith.constant dense<0.000000e+00> : vector<32x64xf32>
    %277 = tpu.matmul %274, %276, %cst_91 {dimension_numbers = #tpu.dot_dimension_numbers<[1], [0], [0], [1], [0, 0, 1, 1], [], []>} : vector<32x32xbf16>, vector<32x64xbf16>, vector<32x64xf32> -> vector<32x64xf32>
    %c0_92 = arith.constant 0 : index
    %c0_93 = arith.constant 0 : index
    %278 = vector.load %arg14[%c0_92, %c0_93] : memref<1x64xf32, #tpu.memory_space<vmem>>, vector<1x64xf32>
    %279 = vector.broadcast %278 : vector<1x64xf32> to vector<32x64xf32>
    %280 = arith.addf %277, %279 : vector<32x64xf32>
    %cst_94 = arith.constant 0.000000e+00 : f32
    %281 = vector.broadcast %cst_94 : f32 to vector<32x64xf32>
    %282 = arith.maximumf %280, %281 : vector<32x64xf32>
    %283 = arith.truncf %282 : vector<32x64xf32> to vector<32x64xbf16>
    %c0_95 = arith.constant 0 : index
    %c0_96 = arith.constant 0 : index
    %284 = vector.load %arg15[%c0_95, %c0_96] : memref<64x32xf32, #tpu.memory_space<vmem>>, vector<64x32xf32>
    %285 = arith.truncf %284 : vector<64x32xf32> to vector<64x32xbf16>
    %cst_97 = arith.constant dense<0.000000e+00> : vector<32x32xf32>
    %286 = tpu.matmul %283, %285, %cst_97 {dimension_numbers = #tpu.dot_dimension_numbers<[1], [0], [0], [1], [0, 0, 1, 1], [], []>} : vector<32x64xbf16>, vector<64x32xbf16>, vector<32x32xf32> -> vector<32x32xf32>
    %c0_98 = arith.constant 0 : index
    %c0_99 = arith.constant 0 : index
    %287 = vector.load %arg16[%c0_98, %c0_99] : memref<1x32xf32, #tpu.memory_space<vmem>>, vector<1x32xf32>
    %288 = vector.broadcast %287 : vector<1x32xf32> to vector<32x32xf32>
    %289 = arith.addf %286, %288 : vector<32x32xf32>
    %290 = arith.addf %273, %289 : vector<32x32xf32>
    %c0_100 = arith.constant 0 : index
    %c0_101 = arith.constant 0 : index
    %291 = vector.load %arg17[%c0_100, %c0_101] : memref<1x32xf32, #tpu.memory_space<vmem>>, vector<1x32xf32>
    %c0_102 = arith.constant 0 : index
    %c0_103 = arith.constant 0 : index
    %292 = vector.load %arg18[%c0_102, %c0_103] : memref<1x32xf32, #tpu.memory_space<vmem>>, vector<1x32xf32>
    %cst_104 = arith.constant dense<0.000000e+00> : vector<32xf32>
    %293 = vector.multi_reduction <add>, %290, %cst_104 [1] : vector<32x32xf32> to vector<32xf32>
    %294 = vector.shape_cast %293 : vector<32xf32> to vector<32x1xf32>
    %cst_105 = arith.constant 3.200000e+01 : f32
    %295 = vector.broadcast %cst_105 : f32 to vector<32x1xf32>
    %296 = arith.divf %294, %295 : vector<32x1xf32>
    %297 = vector.broadcast %296 : vector<32x1xf32> to vector<32x32xf32>
    %298 = arith.subf %290, %297 : vector<32x32xf32>
    %299 = arith.mulf %298, %298 : vector<32x32xf32>
    %cst_106 = arith.constant dense<0.000000e+00> : vector<32xf32>
    %300 = vector.multi_reduction <add>, %299, %cst_106 [1] : vector<32x32xf32> to vector<32xf32>
    %301 = vector.shape_cast %300 : vector<32xf32> to vector<32x1xf32>
    %cst_107 = arith.constant 3.200000e+01 : f32
    %302 = vector.broadcast %cst_107 : f32 to vector<32x1xf32>
    %303 = arith.divf %301, %302 : vector<32x1xf32>
    %cst_108 = arith.constant 9.99999974E-6 : f32
    %304 = vector.broadcast %cst_108 : f32 to vector<32x1xf32>
    %305 = arith.addf %303, %304 : vector<32x1xf32>
    %306 = math.rsqrt %305 : vector<32x1xf32>
    %307 = vector.broadcast %306 : vector<32x1xf32> to vector<32x32xf32>
    %308 = arith.mulf %298, %307 : vector<32x32xf32>
    %309 = vector.broadcast %291 : vector<1x32xf32> to vector<32x32xf32>
    %310 = arith.mulf %308, %309 : vector<32x32xf32>
    %311 = vector.broadcast %292 : vector<1x32xf32> to vector<32x32xf32>
    %312 = arith.addf %310, %311 : vector<32x32xf32>
    %c0_109 = arith.constant 0 : index
    %c0_110 = arith.constant 0 : index
    %313 = vector.load %arg19[%c0_109, %c0_110] : memref<32x32xf32, #tpu.memory_space<vmem>>, vector<32x32xf32>
    tpu.vector_store %arg19[%c0_109, %c0_110], %312 {strides = array<i32>} : memref<32x32xf32, #tpu.memory_space<vmem>>, vector<32x32xf32>,
    return
  }
  func.func @transform_0(%arg0: i32) -> (i32, i32) {
    %c0_i32 = arith.constant 0 : i32
    %c0_i32_0 = arith.constant 0 : i32
    return %arg0, %c0_i32 : i32, i32
  }
  func.func @transform_1(%arg0: i32) -> (i32, i32, i32) {
    %c0_i32 = arith.constant 0 : i32
    %c0_i32_0 = arith.constant 0 : i32
    %c0_i32_1 = arith.constant 0 : i32
    return %arg0, %c0_i32, %c0_i32_0 : i32, i32, i32
  }
  func.func @transform_2(%arg0: i32) -> (i32, i32) {
    %c0_i32 = arith.constant 0 : i32
    %c0_i32_0 = arith.constant 0 : i32
    %c0_i32_1 = arith.constant 0 : i32
    return %c0_i32, %c0_i32_0 : i32, i32
  }
  func.func @transform_3(%arg0: i32) -> (i32, i32) {
    %c0_i32 = arith.constant 0 : i32
    %c0_i32_0 = arith.constant 0 : i32
    %c0_i32_1 = arith.constant 0 : i32
    return %c0_i32, %c0_i32_0 : i32, i32
  }
  func.func @transform_4(%arg0: i32) -> (i32, i32) {
    %c0_i32 = arith.constant 0 : i32
    %c0_i32_0 = arith.constant 0 : i32
    %c0_i32_1 = arith.constant 0 : i32
    return %c0_i32, %c0_i32_0 : i32, i32
  }
  func.func @transform_5(%arg0: i32) -> (i32, i32) {
    %c0_i32 = arith.constant 0 : i32
    %c0_i32_0 = arith.constant 0 : i32
    %c0_i32_1 = arith.constant 0 : i32
    return %c0_i32, %c0_i32_0 : i32, i32
  }
  func.func @transform_6(%arg0: i32) -> (i32, i32) {
    %c0_i32 = arith.constant 0 : i32
    %c0_i32_0 = arith.constant 0 : i32
    %c0_i32_1 = arith.constant 0 : i32
    return %c0_i32, %c0_i32_0 : i32, i32
  }
  func.func @transform_7(%arg0: i32) -> (i32, i32) {
    %c0_i32 = arith.constant 0 : i32
    %c0_i32_0 = arith.constant 0 : i32
    %c0_i32_1 = arith.constant 0 : i32
    return %c0_i32, %c0_i32_0 : i32, i32
  }
  func.func @transform_8(%arg0: i32) -> (i32, i32) {
    %c0_i32 = arith.constant 0 : i32
    %c0_i32_0 = arith.constant 0 : i32
    %c0_i32_1 = arith.constant 0 : i32
    return %c0_i32, %c0_i32_0 : i32, i32
  }
  func.func @transform_9(%arg0: i32) -> (i32, i32) {
    %c0_i32 = arith.constant 0 : i32
    %c0_i32_0 = arith.constant 0 : i32
    %c0_i32_1 = arith.constant 0 : i32
    return %c0_i32, %c0_i32_0 : i32, i32
  }
  func.func @transform_10(%arg0: i32) -> (i32, i32) {
    %c0_i32 = arith.constant 0 : i32
    %c0_i32_0 = arith.constant 0 : i32
    %c0_i32_1 = arith.constant 0 : i32
    return %c0_i32, %c0_i32_0 : i32, i32
  }
  func.func @transform_11(%arg0: i32) -> (i32, i32) {
    %c0_i32 = arith.constant 0 : i32
    %c0_i32_0 = arith.constant 0 : i32
    %c0_i32_1 = arith.constant 0 : i32
    return %c0_i32, %c0_i32_0 : i32, i32
  }
  func.func @transform_12(%arg0: i32) -> (i32, i32) {
    %c0_i32 = arith.constant 0 : i32
    %c0_i32_0 = arith.constant 0 : i32
    %c0_i32_1 = arith.constant 0 : i32
    return %c0_i32, %c0_i32_0 : i32, i32
  }
  func.func @transform_13(%arg0: i32) -> (i32, i32) {
    %c0_i32 = arith.constant 0 : i32
    %c0_i32_0 = arith.constant 0 : i32
    %c0_i32_1 = arith.constant 0 : i32
    return %c0_i32, %c0_i32_0 : i32, i32
  }
  func.func @transform_14(%arg0: i32) -> (i32, i32) {
    %c0_i32 = arith.constant 0 : i32
    %c0_i32_0 = arith.constant 0 : i32
    %c0_i32_1 = arith.constant 0 : i32
    return %c0_i32, %c0_i32_0 : i32, i32
  }
  func.func @transform_15(%arg0: i32) -> (i32, i32) {
    %c0_i32 = arith.constant 0 : i32
    %c0_i32_0 = arith.constant 0 : i32
    %c0_i32_1 = arith.constant 0 : i32
    return %c0_i32, %c0_i32_0 : i32, i32
  }
  func.func @transform_16(%arg0: i32) -> (i32, i32) {
    %c0_i32 = arith.constant 0 : i32
    %c0_i32_0 = arith.constant 0 : i32
    %c0_i32_1 = arith.constant 0 : i32
    return %c0_i32, %c0_i32_0 : i32, i32
  }
  func.func @transform_17(%arg0: i32) -> (i32, i32) {
    %c0_i32 = arith.constant 0 : i32
    %c0_i32_0 = arith.constant 0 : i32
    %c0_i32_1 = arith.constant 0 : i32
    return %c0_i32, %c0_i32_0 : i32, i32
  }
  func.func @transform_18(%arg0: i32) -> (i32, i32) {
    %c0_i32 = arith.constant 0 : i32
    %c0_i32_0 = arith.constant 0 : i32
    return %arg0, %c0_i32 : i32, i32
  }
}

module attributes {stable_mosaic.version = 11 : i64} {
  func.func @_ln_kernel(%arg0: i32, %arg1: memref<64x32xf32, #tpu.memory_space<vmem>>, %arg2: memref<1x32xf32, #tpu.memory_space<vmem>>, %arg3: memref<1x32xf32, #tpu.memory_space<vmem>>, %arg4: memref<64x32xf32, #tpu.memory_space<vmem>>) attributes {dimension_semantics = [#tpu.dimension_semantics<arbitrary>], iteration_bounds = array<i64: 1>, scalar_prefetch = 0 : i64, scratch_operands = 0 : i64, tpu.core_type = #tpu.core_type<tc>, window_params = [{pipeline_mode = #tpu.pipeline_mode<synchronous>, transform_indices = @transform_0, window_bounds = array<i64: 64, 32>}, {pipeline_mode = #tpu.pipeline_mode<synchronous>, transform_indices = @transform_1, window_bounds = array<i64: 1, 32>}, {pipeline_mode = #tpu.pipeline_mode<synchronous>, transform_indices = @transform_2, window_bounds = array<i64: 1, 32>}, {pipeline_mode = #tpu.pipeline_mode<synchronous>, transform_indices = @transform_3, window_bounds = array<i64: 64, 32>}]} {
    %c0 = arith.constant 0 : index
    %c0_0 = arith.constant 0 : index
    %0 = vector.load %arg1[%c0, %c0_0] : memref<64x32xf32, #tpu.memory_space<vmem>>, vector<64x32xf32>
    %c0_1 = arith.constant 0 : index
    %c0_2 = arith.constant 0 : index
    %1 = vector.load %arg2[%c0_1, %c0_2] : memref<1x32xf32, #tpu.memory_space<vmem>>, vector<1x32xf32>
    %c0_3 = arith.constant 0 : index
    %c0_4 = arith.constant 0 : index
    %2 = vector.load %arg3[%c0_3, %c0_4] : memref<1x32xf32, #tpu.memory_space<vmem>>, vector<1x32xf32>
    %cst = arith.constant dense<0.000000e+00> : vector<64xf32>
    %3 = vector.multi_reduction <add>, %0, %cst [1] : vector<64x32xf32> to vector<64xf32>
    %4 = vector.shape_cast %3 : vector<64xf32> to vector<64x1xf32>
    %cst_5 = arith.constant 3.200000e+01 : f32
    %5 = vector.broadcast %cst_5 : f32 to vector<64x1xf32>
    %6 = arith.divf %4, %5 : vector<64x1xf32>
    %7 = vector.broadcast %6 : vector<64x1xf32> to vector<64x32xf32>
    %8 = arith.subf %0, %7 : vector<64x32xf32>
    %9 = arith.mulf %8, %8 : vector<64x32xf32>
    %cst_6 = arith.constant dense<0.000000e+00> : vector<64xf32>
    %10 = vector.multi_reduction <add>, %9, %cst_6 [1] : vector<64x32xf32> to vector<64xf32>
    %11 = vector.shape_cast %10 : vector<64xf32> to vector<64x1xf32>
    %cst_7 = arith.constant 3.200000e+01 : f32
    %12 = vector.broadcast %cst_7 : f32 to vector<64x1xf32>
    %13 = arith.divf %11, %12 : vector<64x1xf32>
    %cst_8 = arith.constant 9.99999974E-6 : f32
    %14 = vector.broadcast %cst_8 : f32 to vector<64x1xf32>
    %15 = arith.addf %13, %14 : vector<64x1xf32>
    %16 = math.rsqrt %15 : vector<64x1xf32>
    %17 = vector.broadcast %16 : vector<64x1xf32> to vector<64x32xf32>
    %18 = arith.mulf %8, %17 : vector<64x32xf32>
    %19 = vector.broadcast %1 : vector<1x32xf32> to vector<64x32xf32>
    %20 = arith.mulf %18, %19 : vector<64x32xf32>
    %21 = vector.broadcast %2 : vector<1x32xf32> to vector<64x32xf32>
    %22 = arith.addf %20, %21 : vector<64x32xf32>
    %c0_9 = arith.constant 0 : index
    %c0_10 = arith.constant 0 : index
    %23 = vector.load %arg4[%c0_9, %c0_10] : memref<64x32xf32, #tpu.memory_space<vmem>>, vector<64x32xf32>
    tpu.vector_store %arg4[%c0_9, %c0_10], %22 {strides = array<i32>} : memref<64x32xf32, #tpu.memory_space<vmem>>, vector<64x32xf32>,
    return
  }
  func.func @transform_0(%arg0: i32) -> (i32, i32) {
    %c0_i32 = arith.constant 0 : i32
    %c0_i32_0 = arith.constant 0 : i32
    %c0_i32_1 = arith.constant 0 : i32
    return %c0_i32, %c0_i32_0 : i32, i32
  }
  func.func @transform_1(%arg0: i32) -> (i32, i32) {
    %c0_i32 = arith.constant 0 : i32
    %c0_i32_0 = arith.constant 0 : i32
    %c0_i32_1 = arith.constant 0 : i32
    return %c0_i32, %c0_i32_0 : i32, i32
  }
  func.func @transform_2(%arg0: i32) -> (i32, i32) {
    %c0_i32 = arith.constant 0 : i32
    %c0_i32_0 = arith.constant 0 : i32
    %c0_i32_1 = arith.constant 0 : i32
    return %c0_i32, %c0_i32_0 : i32, i32
  }
  func.func @transform_3(%arg0: i32) -> (i32, i32) {
    %c0_i32 = arith.constant 0 : i32
    %c0_i32_0 = arith.constant 0 : i32
    %c0_i32_1 = arith.constant 0 : i32
    return %c0_i32, %c0_i32_0 : i32, i32
  }
}

</mosaic_0001>

<bundles_post_ra>
// kernel: _lambda_.6
= control target key start
LH: loop header
LB: loop body
LE: loop exit
PB: predicated region body
PF: predicated region fallthrough
CT: control target
= control target key end

     0   :  { %vm37_vm0 = vcmask 392192   ;;  %vm97_vm1 = vcmask 261120   ;;  %s189_s1 = inlined_call_operand.vmem [shape: f32[48,32], index: 1, kind: input, shape index: {}]   ;;  %s190_s0 = inlined_call_operand.vmem [shape: f32[32,48], index: 0, kind: input, shape index: {}]   ;;  %s191_s2 = inlined_call_operand.vmem [shape: f32[1,32], index: 2, kind: input, shape index: {}]   ;;  %s192_s3 = inlined_call_operand.vmem [shape: f32[32,32], index: 3, kind: output, shape index: {}]  }
   0x1   :  { %v21_v0 = vld [vmem:[%s189_s1] sm:$0xff]  ;;  %v22_v1 = vld [vmem:[%s189_s1 + $0x8] sm:$0xff]  ;;  %v23_v2 = vld [vmem:[%s189_s1 + $0x10] sm:$0xff] }
   0x2   :  { %v27_v3 = vpack.c.bf16 %v22_v1, %v21_v0  ;;  %v24_v4 = vld [vmem:[%s189_s1 + $0x18] sm:$0xff]  ;;  %v25_v5 = vld [vmem:[%s189_s1 + $0x20] sm:$0xff]  ;;  %v26_v7 = vld [vmem:[%s189_s1 + $0x28] sm:$0xff] }
   0x3   :  { %v28_v6 = vpack.c.bf16 %v24_v4, %v23_v2  ;;  %v15_v8 = vld [vmem:[%s190_s0] sm:$0xff]  ;;  %v16_v9 = vld [vmem:[%s190_s0 + $0x8] sm:$0xff]  ;;  %v29_v11 = vpack.c.bf16 %v26_v7, %v25_v5  ;;  %v17_v12 = vld [vmem:[%s190_s0 + $0x10] sm:$0xff] }
   0x4   :  { %114 = vmatprep.subr.bf16.mxu0 %v27_v3  ;;  %v19_v10 = vpack.c.bf16 %v16_v9, %v15_v8  ;;  %v18_v13 = vld [vmem:[%s190_s0 + $0x18] sm:$0xff]  ;;  %v106_v15 = vld [vmem:[%s191_s2] ss:$0 sm:$0xff] }
   0x5   :  { %115 = vmatpush3.bf16.msra.mxu0 %v27_v3  ;;  %v20_v14 = vpack.c.bf16 %v18_v13, %v17_v12 }
   0x6   :  { %116 = vmatprep.subr.bf16.mxu0 %v28_v6  ;;  %120 = vmatprep.mubr.msk.bf16.mxu0 %vm37_vm0, %v19_v10 }
   0x9   :  { %117 = vmatpush3.bf16.msra.mxu0 %v28_v6 }
   0xa   :  { %118 = vmatprep.subr.bf16.mxu0 %v29_v11 }
   0xd   :  { %119 = vmatpush3.bf16.msra.mxu0 %v29_v11 }
  0x10   :  { %121 = vmatmul.mubr.msk.bf16.vlgmr.msra.gmra.mrb[0].mxu0 %vm37_vm0, %v20_v14 }
  0xe3   :  { %v122_v16 = vpop.f32.mrb[0].mxu0 }
  0xe4   :  { %v87_v17 = vadd.f32 %v122_v16, %v106_v15  ;;  %v78_v18 = vpop.f32.mrb[1].mxu0 }
  0xe5   :  { %v79_v19 = vadd.f32 %v106_v15, %v78_v18  ;;  %v123_v20 = vpop.f32.mrb[2].mxu0 }
  0xe6   :  { %v95_v21 = vmax.f32 %v87_v17, 0.0  ;;  %v90_v22 = vadd.f32 %v123_v20, %v106_v15  ;;  %v81_v23 = vpop.f32.mrb[3].mxu0 }
  0xe7   :  { %v93_v24 = vmax.f32 %v79_v19, 0.0  ;;  %v82_v25 = vadd.f32 %v106_v15, %v81_v23 }
  0xe8   :  { %100 = vst.msk [vmem:[%s192_s3 + $0x10] sm:$0xff] %vm97_vm1, %v95_v21  ;;  %v96_v26 = vmax.f32 %v90_v22, 0.0 }
  0xe9   :  { %98 = vst.msk [vmem:[%s192_s3] sm:$0xff] %vm97_vm1, %v93_v24  ;;  %v94_v27 = vmax.f32 %v82_v25, 0.0 }
  0xea   :  { %101 = vst.msk [vmem:[%s192_s3 + $0x18] sm:$0xff] %vm97_vm1, %v96_v26 }
  0xeb   :  { %99 = vst.msk [vmem:[%s192_s3 + $0x8] sm:$0xff] %vm97_vm1, %v94_v27 }

// kernel: _lambda_.8
= control target key start
LH: loop header
LB: loop body
LE: loop exit
PB: predicated region body
PF: predicated region fallthrough
CT: control target
= control target key end

     0   :  { %vm95_vm0 = vcmask 261120   ;;  %s219_s0 = inlined_call_operand.vmem [shape: f32[8,8,32], index: 0, kind: input, shape index: {}]   ;;  %s220_s1 = inlined_call_operand.vmem [shape: f32[1,8,32], index: 1, kind: input, shape index: {}]   ;;  %s221_s2 = inlined_call_operand.vmem [shape: f32[8,1,32], index: 2, kind: input, shape index: {}]   ;;  %s222_s3 = inlined_call_operand.vmem [shape: f32[8,8,32], index: 3, kind: output, shape index: {}]  }
   0x1   :  { %v14_v0 = vld [vmem:[%s219_s0] sm:$0xff]  ;;  %v15_v4 = vld [vmem:[%s219_s0 + $0x8] sm:$0xff]  ;;  %v16_v6 = vld [vmem:[%s219_s0 + $0x10] sm:$0xff] }
   0x2   :  { %v22_v1 = vld [vmem:[%s220_s1] sm:$0xff]  ;;  %v17_v10 = vld [vmem:[%s219_s0 + $0x18] sm:$0xff]  ;;  %v19_v16 = vld [vmem:[%s219_s0 + $0x28] sm:$0xff] }
   0x3   :  { %v108_v2 = vld [vmem:[%s221_s2] ss:$0 sm:$0xff]  ;;  %v23_v3 = vadd.f32 %v22_v1, %v14_v0  ;;  %v109_v5 = vld [vmem:[%s221_s2 + $0x1] ss:$0 sm:$0xff]  ;;  %v24_v7 = vadd.f32 %v22_v1, %v15_v4  ;;  %v25_v8 = vadd.f32 %v22_v1, %v16_v6  ;;  %v110_v9 = vld [vmem:[%s221_s2 + $0x2] ss:$0 sm:$0xff]  ;;  %v26_v13 = vadd.f32 %v22_v1, %v17_v10 }
   0x4   :  { %v111_v11 = vld [vmem:[%s221_s2 + $0x3] ss:$0 sm:$0xff]  ;;  %v112_v15 = vld [vmem:[%s221_s2 + $0x4] ss:$0 sm:$0xff]  ;;  %v28_v20 = vadd.f32 %v22_v1, %v19_v16  ;;  %v113_v21 = vld [vmem:[%s221_s2 + $0x5] ss:$0 sm:$0xff] }
   0x5   :  { %v87_v12 = vadd.f32 %v108_v2, %v23_v3  ;;  %v18_v14 = vld [vmem:[%s219_s0 + $0x20] sm:$0xff]  ;;  %v88_v17 = vadd.f32 %v109_v5, %v24_v7  ;;  %v89_v18 = vadd.f32 %v110_v9, %v25_v8  ;;  %v20_v22 = vld [vmem:[%s219_s0 + $0x30] sm:$0xff]  ;;  %v90_v24 = vadd.f32 %v111_v11, %v26_v13  ;;  %v21_v26 = vld [vmem:[%s219_s0 + $0x38] sm:$0xff] }
   0x6   :  { %v27_v19 = vadd.f32 %v22_v1, %v18_v14  ;;  %v114_v23 = vld [vmem:[%s221_s2 + $0x6] ss:$0 sm:$0xff]  ;;  %v29_v25 = vadd.f32 %v22_v1, %v20_v22  ;;  %v115_v27 = vld [vmem:[%s221_s2 + $0x7] ss:$0 sm:$0xff]  ;;  %v92_v29 = vadd.f32 %v113_v21, %v28_v20  ;;  %v30_v30 = vadd.f32 %v22_v1, %v21_v26 }
   0x7   :  { %96 = vst.msk [vmem:[%s222_s3] sm:$0xff] %vm95_vm0, %v87_v12  ;;  %97 = vst.msk [vmem:[%s222_s3 + $0x8] sm:$0xff] %vm95_vm0, %v88_v17 }
   0x8   :  { %98 = vst.msk [vmem:[%s222_s3 + $0x10] sm:$0xff] %vm95_vm0, %v89_v18  ;;  %v91_v28 = vadd.f32 %v112_v15, %v27_v19  ;;  %99 = vst.msk [vmem:[%s222_s3 + $0x18] sm:$0xff] %vm95_vm0, %v90_v24  ;;  %v93_v31 = vadd.f32 %v114_v23, %v29_v25  ;;  %v94_v32 = vadd.f32 %v115_v27, %v30_v30 }
   0x9   :  { %101 = vst.msk [vmem:[%s222_s3 + $0x28] sm:$0xff] %vm95_vm0, %v92_v29 }
   0xa   :  { %100 = vst.msk [vmem:[%s222_s3 + $0x20] sm:$0xff] %vm95_vm0, %v91_v28  ;;  %102 = vst.msk [vmem:[%s222_s3 + $0x30] sm:$0xff] %vm95_vm0, %v93_v31 }
   0xb   :  { %103 = vst.msk [vmem:[%s222_s3 + $0x38] sm:$0xff] %vm95_vm0, %v94_v32 }

// kernel: _lambda_.7
= control target key start
LH: loop header
LB: loop body
LE: loop exit
PB: predicated region body
PF: predicated region fallthrough
CT: control target
= control target key end

     0   :  { %vm780_vm0 = vmmov 0   ;;  %vm342_vm1 = vcmask 261120   ;;  %s1436_s1 = inlined_call_operand.vmem [shape: f32[1568,32], index: 1, kind: input, shape index: {}]   ;;  %s1437_s0 = inlined_call_operand.vmem [shape: f32[8,1568], index: 0, kind: input, shape index: {}]   ;;  %s1438_s2 = inlined_call_operand.vmem [shape: f32[1,32], index: 2, kind: input, shape index: {}]   ;;  %s1439_s3 = inlined_call_operand.vmem [shape: f32[8,32], index: 3, kind: output, shape index: {}]  }
   0x1   :  { %v57_v0 = vld [vmem:[%s1436_s1 + $0x80] sm:$0xff]  ;;  %v58_v1 = vld [vmem:[%s1436_s1 + $0x88] sm:$0xff]  ;;  %v59_v11 = vld [vmem:[%s1436_s1 + $0x90] sm:$0xff] }
   0x2   :  { %v41_v2 = vld [vmem:[%s1436_s1] sm:$0xff]  ;;  %v245_v3 = vpack.c.bf16 %v58_v1, %v57_v0  ;;  %v42_v4 = vld [vmem:[%s1436_s1 + $0x8] sm:$0xff]  ;;  %v60_v13 = vld [vmem:[%s1436_s1 + $0x98] sm:$0xff] }
   0x3   :  { %v89_v5 = vld [vmem:[%s1436_s1 + $0x180] sm:$0xff]  ;;  %v90_v6 = vld [vmem:[%s1436_s1 + $0x188] sm:$0xff]  ;;  %v237_v7 = vpack.c.bf16 %v42_v4, %v41_v2  ;;  %v43_v14 = vld [vmem:[%s1436_s1 + $0x10] sm:$0xff]  ;;  %v246_v16 = vpack.c.bf16 %v60_v13, %v59_v11 }
   0x4   :  { %v261_v8 = vpack.c.bf16 %v90_v6, %v89_v5  ;;  %v73_v9 = vld [vmem:[%s1436_s1 + $0x100] sm:$0xff]  ;;  %v74_v10 = vld [vmem:[%s1436_s1 + $0x108] sm:$0xff]  ;;  %634 = vmatprep.subr.bf16.mxu0 %v245_v3  ;;  %v44_v15 = vld [vmem:[%s1436_s1 + $0x18] sm:$0xff] }
   0x5   :  { %v253_v12 = vpack.c.bf16 %v74_v10, %v73_v9  ;;  %635 = vmatpush3.bf16.msra.mxu0 %v237_v7  ;;  %v238_v17 = vpack.c.bf16 %v44_v15, %v43_v14  ;;  %v91_v18 = vld [vmem:[%s1436_s1 + $0x190] sm:$0xff]  ;;  %v92_v19 = vld [vmem:[%s1436_s1 + $0x198] sm:$0xff]  ;;  %v61_v23 = vld [vmem:[%s1436_s1 + $0xa0] sm:$0xff] }
   0x6   :  { %656 = vmatprep.subr.bf16.mxu1 %v261_v8  ;;  %v75_v20 = vld [vmem:[%s1436_s1 + $0x110] sm:$0xff]  ;;  %v262_v21 = vpack.c.bf16 %v92_v19, %v91_v18  ;;  %v76_v22 = vld [vmem:[%s1436_s1 + $0x118] sm:$0xff]  ;;  %v62_v24 = vld [vmem:[%s1436_s1 + $0xa8] sm:$0xff]  ;;  %636 = vmatprep.subr.bf16.mxu0 %v246_v16 }
   0x7   :  { %657 = vmatpush3.bf16.msra.mxu1 %v253_v12  ;;  %v254_v25 = vpack.c.bf16 %v76_v22, %v75_v20  ;;  %v247_v26 = vpack.c.bf16 %v62_v24, %v61_v23  ;;  %v45_v27 = vld [vmem:[%s1436_s1 + $0x20] sm:$0xff]  ;;  %v46_v28 = vld [vmem:[%s1436_s1 + $0x28] sm:$0xff]  ;;  %v63_v35 = vld [vmem:[%s1436_s1 + $0xb0] sm:$0xff] }
   0x8   :  { %v93_v29 = vld [vmem:[%s1436_s1 + $0x1a0] sm:$0xff]  ;;  %658 = vmatprep.subr.bf16.mxu1 %v262_v21  ;;  %v94_v30 = vld [vmem:[%s1436_s1 + $0x1a8] sm:$0xff]  ;;  %v239_v33 = vpack.c.bf16 %v46_v28, %v45_v27  ;;  %v64_v36 = vld [vmem:[%s1436_s1 + $0xb8] sm:$0xff] }
   0x9   :  { %v77_v31 = vld [vmem:[%s1436_s1 + $0x120] sm:$0xff]  ;;  %v78_v32 = vld [vmem:[%s1436_s1 + $0x128] sm:$0xff]  ;;  %637 = vmatpush3.bf16.msra.mxu0 %v238_v17  ;;  %v263_v34 = vpack.c.bf16 %v94_v30, %v93_v29  ;;  %v47_v37 = vld [vmem:[%s1436_s1 + $0x30] sm:$0xff]  ;;  %v248_v39 = vpack.c.bf16 %v64_v36, %v63_v35 }
   0xa   :  { %638 = vmatprep.subr.bf16.mxu0 %v247_v26  ;;  %v255_v38 = vpack.c.bf16 %v78_v32, %v77_v31  ;;  %v48_v40 = vld [vmem:[%s1436_s1 + $0x38] sm:$0xff]  ;;  %v95_v41 = vld [vmem:[%s1436_s1 + $0x1b0] sm:$0xff]  ;;  %v65_v46 = vld [vmem:[%s1436_s1 + $0xc0] sm:$0xff] }
   0xb   :  { %659 = vmatpush3.bf16.msra.mxu1 %v254_v25  ;;  %v96_v42 = vld [vmem:[%s1436_s1 + $0x1b8] sm:$0xff]  ;;  %v79_v44 = vld [vmem:[%s1436_s1 + $0x130] sm:$0xff]  ;;  %v66_v47 = vld [vmem:[%s1436_s1 + $0xc8] sm:$0xff]  ;;  %v240_v48 = vpack.c.bf16 %v48_v40, %v47_v37 }
   0xc   :  { %660 = vmatprep.subr.bf16.mxu1 %v263_v34  ;;  %v264_v43 = vpack.c.bf16 %v96_v42, %v95_v41  ;;  %v80_v45 = vld [vmem:[%s1436_s1 + $0x138] sm:$0xff]  ;;  %v97_v49 = vld [vmem:[%s1436_s1 + $0x1c0] sm:$0xff]  ;;  %v98_v50 = vld [vmem:[%s1436_s1 + $0x1c8] sm:$0xff]  ;;  %v249_v52 = vpack.c.bf16 %v66_v47, %v65_v46 }
   0xd   :  { %639 = vmatpush3.bf16.msra.mxu0 %v239_v33  ;;  %v256_v51 = vpack.c.bf16 %v80_v45, %v79_v44  ;;  %v49_v53 = vld [vmem:[%s1436_s1 + $0x40] sm:$0xff]  ;;  %v50_v54 = vld [vmem:[%s1436_s1 + $0x48] sm:$0xff]  ;;  %v265_v56 = vpack.c.bf16 %v98_v50, %v97_v49  ;;  %v67_v58 = vld [vmem:[%s1436_s1 + $0xd0] sm:$0xff] }
   0xe   :  { %640 = vmatprep.subr.bf16.mxu0 %v248_v39  ;;  %v81_v55 = vld [vmem:[%s1436_s1 + $0x140] sm:$0xff]  ;;  %v82_v57 = vld [vmem:[%s1436_s1 + $0x148] sm:$0xff]  ;;  %v68_v59 = vld [vmem:[%s1436_s1 + $0xd8] sm:$0xff]  ;;  %v241_v62 = vpack.c.bf16 %v50_v54, %v49_v53 }
   0xf   :  { %661 = vmatpush3.bf16.msra.mxu1 %v255_v38  ;;  %v99_v60 = vld [vmem:[%s1436_s1 + $0x1d0] sm:$0xff]  ;;  %v100_v61 = vld [vmem:[%s1436_s1 + $0x1d8] sm:$0xff]  ;;  %v257_v63 = vpack.c.bf16 %v82_v57, %v81_v55  ;;  %v250_v0 = vpack.c.bf16 %v68_v59, %v67_v58  ;;  %v69_v6 = vld [vmem:[%s1436_s1 + $0xe0] sm:$0xff] }
  0x10   :  { %662 = vmatprep.subr.bf16.mxu1 %v264_v43  ;;  %v51_v1 = vld [vmem:[%s1436_s1 + $0x50] sm:$0xff]  ;;  %v52_v2 = vld [vmem:[%s1436_s1 + $0x58] sm:$0xff]  ;;  %v266_v4 = vpack.c.bf16 %v100_v61, %v99_v60  ;;  %v70_v7 = vld [vmem:[%s1436_s1 + $0xe8] sm:$0xff] }
  0x11   :  { %641 = vmatpush3.bf16.msra.mxu0 %v240_v48  ;;  %v83_v3 = vld [vmem:[%s1436_s1 + $0x150] sm:$0xff]  ;;  %v84_v5 = vld [vmem:[%s1436_s1 + $0x158] sm:$0xff]  ;;  %v101_v8 = vld [vmem:[%s1436_s1 + $0x1e0] sm:$0xff]  ;;  %v242_v10 = vpack.c.bf16 %v52_v2, %v51_v1  ;;  %v251_v14 = vpack.c.bf16 %v70_v7, %v69_v6 }
  0x12   :  { %642 = vmatprep.subr.bf16.mxu0 %v249_v52  ;;  %v102_v9 = vld [vmem:[%s1436_s1 + $0x1e8] sm:$0xff]  ;;  %v53_v11 = vld [vmem:[%s1436_s1 + $0x60] sm:$0xff]  ;;  %v258_v13 = vpack.c.bf16 %v84_v5, %v83_v3  ;;  %v71_v19 = vld [vmem:[%s1436_s1 + $0xf0] sm:$0xff] }
  0x13   :  { %663 = vmatpush3.bf16.msra.mxu1 %v256_v51  ;;  %v54_v12 = vld [vmem:[%s1436_s1 + $0x68] sm:$0xff]  ;;  %v85_v15 = vld [vmem:[%s1436_s1 + $0x160] sm:$0xff]  ;;  %v267_v18 = vpack.c.bf16 %v102_v9, %v101_v8  ;;  %v72_v20 = vld [vmem:[%s1436_s1 + $0xf8] sm:$0xff] }
  0x14   :  { %664 = vmatprep.subr.bf16.mxu1 %v265_v56  ;;  %v86_v16 = vld [vmem:[%s1436_s1 + $0x168] sm:$0xff]  ;;  %v18_v22 = vld [vmem:[%s1437_s0 + $0x18] sm:$0xff]  ;;  %v103_v23 = vld [vmem:[%s1436_s1 + $0x1f0] sm:$0xff]  ;;  %v243_v26 = vpack.c.bf16 %v54_v12, %v53_v11  ;;  %v252_v28 = vpack.c.bf16 %v72_v20, %v71_v19 }
  0x15   :  { %643 = vmatpush3.bf16.msra.mxu0 %v241_v62  ;;  %v16_v17 = vld [vmem:[%s1437_s0 + $0x8] sm:$0xff]  ;;  %v104_v24 = vld [vmem:[%s1436_s1 + $0x1f8] sm:$0xff]  ;;  %v31_v25 = vpack.c.bf16 %v18_v22, %v18_v22  ;;  %v259_v27 = vpack.c.bf16 %v86_v16, %v85_v15  ;;  %v55_v29 = vld [vmem:[%s1436_s1 + $0x70] sm:$0xff] }
  0x16   :  { %644 = vmatprep.subr.bf16.mxu0 %v250_v0  ;;  %v29_v21 = vpack.c.bf16 %v16_v17, %v16_v17  ;;  %v56_v30 = vld [vmem:[%s1436_s1 + $0x78] sm:$0xff]  ;;  %v87_v31 = vld [vmem:[%s1436_s1 + $0x170] sm:$0xff]  ;;  %v268_v32 = vpack.c.bf16 %v104_v24, %v103_v23  ;;  %v121_v34 = vld [vmem:[%s1436_s1 + $0x280] sm:$0xff] }
  0x17   :  { %665 = vmatpush3.bf16.msra.mxu1 %v257_v63  ;;  %v88_v33 = vld [vmem:[%s1436_s1 + $0x178] sm:$0xff]  ;;  %v122_v35 = vld [vmem:[%s1436_s1 + $0x288] sm:$0xff]  ;;  %418 = vmatprep.mubr.bf16.mxu1 %v31_v25  ;;  %v153_v36 = vld [vmem:[%s1436_s1 + $0x380] sm:$0xff]  ;;  %v244_v38 = vpack.c.bf16 %v56_v30, %v55_v29 }
  0x18   :  { %666 = vmatprep.subr.bf16.mxu1 %v266_v4  ;;  %378 = vmatprep.mubr.bf16.mxu0 %v29_v21  ;;  %v154_v37 = vld [vmem:[%s1436_s1 + $0x388] sm:$0xff]  ;;  %v15_v39 = vld [vmem:[%s1437_s0] sm:$0xff]  ;;  %v260_v41 = vpack.c.bf16 %v88_v33, %v87_v31  ;;  %v277_v42 = vpack.c.bf16 %v122_v35, %v121_v34  ;;  %v17_v44 = vld [vmem:[%s1437_s0 + $0x10] sm:$0xff] }
  0x19   :  { %645 = vmatpush3.bf16.msra.mxu0 %v242_v10  ;;  %v105_v40 = vld [vmem:[%s1436_s1 + $0x200] sm:$0xff]  ;;  %v106_v43 = vld [vmem:[%s1436_s1 + $0x208] sm:$0xff]  ;;  %v293_v46 = vpack.c.bf16 %v154_v37, %v153_v36  ;;  %v123_v48 = vld [vmem:[%s1436_s1 + $0x290] sm:$0xff]  ;;  %v28_v50 = vpack.c.bf16 %v15_v39, %v15_v39  ;;  %v30_v54 = vpack.c.bf16 %v17_v44, %v17_v44 }
  0x1a   :  { %646 = vmatprep.subr.bf16.mxu0 %v251_v14  ;;  %v137_v45 = vld [vmem:[%s1436_s1 + $0x300] sm:$0xff]  ;;  %v138_v47 = vld [vmem:[%s1436_s1 + $0x308] sm:$0xff]  ;;  %v124_v49 = vld [vmem:[%s1436_s1 + $0x298] sm:$0xff]  ;;  %v269_v53 = vpack.c.bf16 %v106_v43, %v105_v40 }
  0x1b   :  { %667 = vmatpush3.bf16.msra.mxu1 %v258_v13  ;;  %v155_v51 = vld [vmem:[%s1436_s1 + $0x390] sm:$0xff]  ;;  %v156_v52 = vld [vmem:[%s1436_s1 + $0x398] sm:$0xff]  ;;  %v285_v55 = vpack.c.bf16 %v138_v47, %v137_v45  ;;  %v278_v56 = vpack.c.bf16 %v124_v49, %v123_v48  ;;  %v125_v62 = vld [vmem:[%s1436_s1 + $0x2a0] sm:$0xff] }
  0x1c   :  { %668 = vmatprep.subr.bf16.mxu1 %v267_v18  ;;  %v107_v57 = vld [vmem:[%s1436_s1 + $0x210] sm:$0xff]  ;;  %v108_v58 = vld [vmem:[%s1436_s1 + $0x218] sm:$0xff]  ;;  %v294_v60 = vpack.c.bf16 %v156_v52, %v155_v51  ;;  %v126_v63 = vld [vmem:[%s1436_s1 + $0x2a8] sm:$0xff] }
  0x1d   :  { %647 = vmatpush3.bf16.msra.mxu0 %v243_v26  ;;  %v139_v59 = vld [vmem:[%s1436_s1 + $0x310] sm:$0xff]  ;;  %v140_v61 = vld [vmem:[%s1436_s1 + $0x318] sm:$0xff]  ;;  %v157_v0 = vld [vmem:[%s1436_s1 + $0x3a0] sm:$0xff]  ;;  %v270_v2 = vpack.c.bf16 %v108_v58, %v107_v57  ;;  %v279_v4 = vpack.c.bf16 %v126_v63, %v125_v62 }
  0x1e   :  { %648 = vmatprep.subr.bf16.mxu0 %v252_v28  ;;  %v158_v1 = vld [vmem:[%s1436_s1 + $0x3a8] sm:$0xff]  ;;  %v286_v3 = vpack.c.bf16 %v140_v61, %v139_v59  ;;  %v109_v5 = vld [vmem:[%s1436_s1 + $0x220] sm:$0xff]  ;;  %v127_v10 = vld [vmem:[%s1436_s1 + $0x2b0] sm:$0xff] }
  0x1f   :  { %669 = vmatpush3.bf16.msra.mxu1 %v259_v27  ;;  %v110_v6 = vld [vmem:[%s1436_s1 + $0x228] sm:$0xff]  ;;  %v141_v7 = vld [vmem:[%s1436_s1 + $0x320] sm:$0xff]  ;;  %v295_v8 = vpack.c.bf16 %v158_v1, %v157_v0  ;;  %v128_v11 = vld [vmem:[%s1436_s1 + $0x2b8] sm:$0xff] }
  0x20   :  { %670 = vmatprep.subr.bf16.mxu1 %v268_v32  ;;  %v142_v9 = vld [vmem:[%s1436_s1 + $0x328] sm:$0xff]  ;;  %v159_v12 = vld [vmem:[%s1436_s1 + $0x3b0] sm:$0xff]  ;;  %v160_v13 = vld [vmem:[%s1436_s1 + $0x3b8] sm:$0xff]  ;;  %v271_v14 = vpack.c.bf16 %v110_v6, %v109_v5  ;;  %v280_v16 = vpack.c.bf16 %v128_v11, %v127_v10 }
  0x21   :  { %649 = vmatpush3.bf16.msra.mxu0 %v244_v38  ;;  %v287_v15 = vpack.c.bf16 %v142_v9, %v141_v7  ;;  %v111_v17 = vld [vmem:[%s1436_s1 + $0x230] sm:$0xff]  ;;  %v112_v18 = vld [vmem:[%s1436_s1 + $0x238] sm:$0xff]  ;;  %v296_v20 = vpack.c.bf16 %v160_v13, %v159_v12  ;;  %v129_v22 = vld [vmem:[%s1436_s1 + $0x2c0] sm:$0xff] }
  0x22   :  { %678 = vmatprep.subr.bf16.mxu0 %v277_v42  ;;  %v143_v19 = vld [vmem:[%s1436_s1 + $0x330] sm:$0xff]  ;;  %v144_v21 = vld [vmem:[%s1436_s1 + $0x338] sm:$0xff]  ;;  %v130_v23 = vld [vmem:[%s1436_s1 + $0x2c8] sm:$0xff]  ;;  %v272_v26 = vpack.c.bf16 %v112_v18, %v111_v17 }
  0x23   :  { %671 = vmatpush3.bf16.msra.mxu1 %v260_v41  ;;  %v161_v24 = vld [vmem:[%s1436_s1 + $0x3c0] sm:$0xff]  ;;  %v162_v25 = vld [vmem:[%s1436_s1 + $0x3c8] sm:$0xff]  ;;  %v288_v29 = vpack.c.bf16 %v144_v21, %v143_v19  ;;  %v281_v30 = vpack.c.bf16 %v130_v23, %v129_v22  ;;  %v22_v34 = vld [vmem:[%s1437_s0 + $0x38] sm:$0xff] }
  0x24   :  { %700 = vmatprep.subr.bf16.mxu1 %v293_v46  ;;  %379 = vmatmul.mubr.bf16.vlgmr.msra.gmra.mrb[0].mxu0 %v28_v50  ;;  %v113_v27 = vld [vmem:[%s1436_s1 + $0x240] sm:$0xff]  ;;  %v20_v28 = vld [vmem:[%s1437_s0 + $0x28] sm:$0xff]  ;;  %v297_v35 = vpack.c.bf16 %v162_v25, %v161_v24  ;;  %v131_v37 = vld [vmem:[%s1436_s1 + $0x2d0] sm:$0xff]  ;;  %v35_v39 = vpack.c.bf16 %v22_v34, %v22_v34 }
  0x25   :  { %679 = vmatpush3.bf16.msra.mxu0 %v269_v53  ;;  %v114_v31 = vld [vmem:[%s1436_s1 + $0x248] sm:$0xff]  ;;  %v145_v32 = vld [vmem:[%s1436_s1 + $0x340] sm:$0xff]  ;;  %v33_v33 = vpack.c.bf16 %v20_v28, %v20_v28  ;;  %v132_v38 = vld [vmem:[%s1436_s1 + $0x2d8] sm:$0xff] }
  0x26   :  { %419 = vmatmul.mubr.bf16.vlgmr.msra.gmra.mrb[0].mxu1 %v30_v54  ;;  %680 = vmatprep.subr.bf16.mxu0 %v278_v56  ;;  %v146_v36 = vld [vmem:[%s1436_s1 + $0x348] sm:$0xff]  ;;  %v163_v40 = vld [vmem:[%s1436_s1 + $0x3d0] sm:$0xff]  ;;  %v164_v41 = vld [vmem:[%s1436_s1 + $0x3d8] sm:$0xff]  ;;  %v273_v42 = vpack.c.bf16 %v114_v31, %v113_v27  ;;  %v282_v44 = vpack.c.bf16 %v132_v38, %v131_v37 }
  0x27   :  { %701 = vmatpush3.bf16.msra.mxu1 %v285_v55  ;;  %458 = vmatprep.mubr.bf16.mxu0 %v33_v33  ;;  %v289_v43 = vpack.c.bf16 %v146_v36, %v145_v32  ;;  %v115_v45 = vld [vmem:[%s1436_s1 + $0x250] sm:$0xff]  ;;  %v116_v46 = vld [vmem:[%s1436_s1 + $0x258] sm:$0xff]  ;;  %v298_v48 = vpack.c.bf16 %v164_v41, %v163_v40  ;;  %v133_v50 = vld [vmem:[%s1436_s1 + $0x2e0] sm:$0xff] }
  0x28   :  { %702 = vmatprep.subr.bf16.mxu1 %v294_v60  ;;  %498 = vmatprep.mubr.bf16.mxu1 %v35_v39  ;;  %v147_v47 = vld [vmem:[%s1436_s1 + $0x350] sm:$0xff]  ;;  %v148_v49 = vld [vmem:[%s1436_s1 + $0x358] sm:$0xff]  ;;  %v134_v51 = vld [vmem:[%s1436_s1 + $0x2e8] sm:$0xff]  ;;  %v274_v54 = vpack.c.bf16 %v116_v46, %v115_v45 }
  0x29   :  { %681 = vmatpush3.bf16.msra.mxu0 %v270_v2  ;;  %v165_v52 = vld [vmem:[%s1436_s1 + $0x3e0] sm:$0xff]  ;;  %v166_v53 = vld [vmem:[%s1436_s1 + $0x3e8] sm:$0xff]  ;;  %v290_v55 = vpack.c.bf16 %v148_v49, %v147_v47  ;;  %v283_v56 = vpack.c.bf16 %v134_v51, %v133_v50  ;;  %v135_v62 = vld [vmem:[%s1436_s1 + $0x2f0] sm:$0xff] }
  0x2a   :  { %682 = vmatprep.subr.bf16.mxu0 %v279_v4  ;;  %v117_v57 = vld [vmem:[%s1436_s1 + $0x260] sm:$0xff]  ;;  %v118_v58 = vld [vmem:[%s1436_s1 + $0x268] sm:$0xff]  ;;  %v299_v60 = vpack.c.bf16 %v166_v53, %v165_v52  ;;  %v136_v63 = vld [vmem:[%s1436_s1 + $0x2f8] sm:$0xff] }
  0x2b   :  { %703 = vmatpush3.bf16.msra.mxu1 %v286_v3  ;;  %v149_v59 = vld [vmem:[%s1436_s1 + $0x360] sm:$0xff]  ;;  %v150_v61 = vld [vmem:[%s1436_s1 + $0x368] sm:$0xff]  ;;  %v167_v0 = vld [vmem:[%s1436_s1 + $0x3f0] sm:$0xff]  ;;  %v275_v2 = vpack.c.bf16 %v118_v58, %v117_v57  ;;  %v284_v4 = vpack.c.bf16 %v136_v63, %v135_v62 }
  0x2c   :  { %704 = vmatprep.subr.bf16.mxu1 %v295_v8  ;;  %v168_v1 = vld [vmem:[%s1436_s1 + $0x3f8] sm:$0xff]  ;;  %v291_v3 = vpack.c.bf16 %v150_v61, %v149_v59  ;;  %v119_v5 = vld [vmem:[%s1436_s1 + $0x270] sm:$0xff]  ;;  %v185_v10 = vld [vmem:[%s1436_s1 + $0x480] sm:$0xff] }
  0x2d   :  { %683 = vmatpush3.bf16.msra.mxu0 %v271_v14  ;;  %v120_v6 = vld [vmem:[%s1436_s1 + $0x278] sm:$0xff]  ;;  %v151_v7 = vld [vmem:[%s1436_s1 + $0x370] sm:$0xff]  ;;  %v300_v8 = vpack.c.bf16 %v168_v1, %v167_v0  ;;  %v186_v11 = vld [vmem:[%s1436_s1 + $0x488] sm:$0xff] }
  0x2e   :  { %684 = vmatprep.subr.bf16.mxu0 %v280_v16  ;;  %v152_v9 = vld [vmem:[%s1436_s1 + $0x378] sm:$0xff]  ;;  %v217_v12 = vld [vmem:[%s1436_s1 + $0x580] sm:$0xff]  ;;  %v218_v13 = vld [vmem:[%s1436_s1 + $0x588] sm:$0xff]  ;;  %v276_v14 = vpack.c.bf16 %v120_v6, %v119_v5  ;;  %v309_v18 = vpack.c.bf16 %v186_v11, %v185_v10 }
  0x2f   :  { %705 = vmatpush3.bf16.msra.mxu1 %v287_v15  ;;  %v19_v15 = vld [vmem:[%s1437_s0 + $0x20] sm:$0xff]  ;;  %v292_v17 = vpack.c.bf16 %v152_v9, %v151_v7  ;;  %v170_v19 = vld [vmem:[%s1436_s1 + $0x408] sm:$0xff]  ;;  %v325_v22 = vpack.c.bf16 %v218_v13, %v217_v12  ;;  %v187_v24 = vld [vmem:[%s1436_s1 + $0x490] sm:$0xff] }
  0x30   :  { %706 = vmatprep.subr.bf16.mxu1 %v296_v20  ;;  %v169_v16 = vld [vmem:[%s1436_s1 + $0x400] sm:$0xff]  ;;  %v21_v20 = vld [vmem:[%s1437_s0 + $0x30] sm:$0xff]  ;;  %v202_v23 = vld [vmem:[%s1436_s1 + $0x508] sm:$0xff] }
  0x31   :  { %685 = vmatpush3.bf16.msra.mxu0 %v272_v26  ;;  %v201_v21 = vld [vmem:[%s1436_s1 + $0x500] sm:$0xff]  ;;  %v188_v25 = vld [vmem:[%s1436_s1 + $0x498] sm:$0xff]  ;;  %v32_v26 = vpack.c.bf16 %v19_v15, %v19_v15  ;;  %v219_v27 = vld [vmem:[%s1436_s1 + $0x590] sm:$0xff] }
  0x32   :  { %686 = vmatprep.subr.bf16.mxu0 %v281_v30  ;;  %v220_v28 = vld [vmem:[%s1436_s1 + $0x598] sm:$0xff]  ;;  %v34_v30 = vpack.c.bf16 %v21_v20, %v21_v20  ;;  %v171_v31 = vld [vmem:[%s1436_s1 + $0x410] sm:$0xff]  ;;  %v317_v32 = vpack.c.bf16 %v202_v23, %v201_v21  ;;  %v310_v33 = vpack.c.bf16 %v188_v25, %v187_v24  ;;  %v189_v38 = vld [vmem:[%s1436_s1 + $0x4a0] sm:$0xff] }
  0x33   :  { %707 = vmatpush3.bf16.msra.mxu1 %v288_v29  ;;  %v301_v29 = vpack.c.bf16 %v170_v19, %v169_v16  ;;  %v172_v34 = vld [vmem:[%s1436_s1 + $0x418] sm:$0xff]  ;;  %v326_v37 = vpack.c.bf16 %v220_v28, %v219_v27  ;;  %v190_v39 = vld [vmem:[%s1436_s1 + $0x4a8] sm:$0xff]  ;;  %v221_v41 = vld [vmem:[%s1436_s1 + $0x5a0] sm:$0xff] }
  0x34   :  { %708 = vmatprep.subr.bf16.mxu1 %v297_v35  ;;  %v203_v35 = vld [vmem:[%s1436_s1 + $0x510] sm:$0xff]  ;;  %v204_v36 = vld [vmem:[%s1436_s1 + $0x518] sm:$0xff]  ;;  %v24_v40 = vld [vmem:[%s1437_s0 + $0x48] sm:$0xff]  ;;  %v302_v45 = vpack.c.bf16 %v172_v34, %v171_v31 }
  0x35   :  { %687 = vmatpush3.bf16.msra.mxu0 %v273_v42  ;;  %v222_v42 = vld [vmem:[%s1436_s1 + $0x5a8] sm:$0xff]  ;;  %v318_v47 = vpack.c.bf16 %v204_v36, %v203_v35  ;;  %v173_v49 = vld [vmem:[%s1436_s1 + $0x420] sm:$0xff]  ;;  %v224_v57 = vld [vmem:[%s1436_s1 + $0x5b8] sm:$0xff] }
  0x36   :  { %688 = vmatprep.subr.bf16.mxu0 %v282_v44  ;;  %v26_v44 = vld [vmem:[%s1437_s0 + $0x58] sm:$0xff]  ;;  %v174_v50 = vld [vmem:[%s1436_s1 + $0x428] sm:$0xff]  ;;  %v205_v51 = vld [vmem:[%s1436_s1 + $0x520] sm:$0xff]  ;;  %v327_v52 = vpack.c.bf16 %v222_v42, %v221_v41 }
  0x37   :  { %709 = vmatpush3.bf16.msra.mxu1 %v289_v43  ;;  %v37_v43 = vpack.c.bf16 %v24_v40, %v24_v40  ;;  %v39_v46 = vpack.c.bf16 %v26_v44, %v26_v44  ;;  %v206_v53 = vld [vmem:[%s1436_s1 + $0x528] sm:$0xff]  ;;  %v303_v58 = vpack.c.bf16 %v174_v50, %v173_v49  ;;  %v175_v61 = vld [vmem:[%s1436_s1 + $0x430] sm:$0xff]  ;;  %v176_v62 = vld [vmem:[%s1436_s1 + $0x438] sm:$0xff] }
  0x38   :  { %710 = vmatprep.subr.bf16.mxu1 %v298_v48  ;;  %v311_v48 = vpack.c.bf16 %v190_v39, %v189_v38  ;;  %v319_v59 = vpack.c.bf16 %v206_v53, %v205_v51  ;;  %v207_v63 = vld [vmem:[%s1436_s1 + $0x530] sm:$0xff]  ;;  %v208_v1 = vld [vmem:[%s1436_s1 + $0x538] sm:$0xff]  ;;  %v226_v5 = vld [vmem:[%s1436_s1 + $0x5c8] sm:$0xff]  ;;  %v304_v6 = vpack.c.bf16 %v176_v62, %v175_v61 }
  0x39   :  { %689 = vmatpush3.bf16.msra.mxu0 %v274_v54  ;;  %v191_v54 = vld [vmem:[%s1436_s1 + $0x4b0] sm:$0xff]  ;;  %v320_v7 = vpack.c.bf16 %v208_v1, %v207_v63  ;;  %v177_v9 = vld [vmem:[%s1436_s1 + $0x440] sm:$0xff]  ;;  %v178_v10 = vld [vmem:[%s1436_s1 + $0x448] sm:$0xff] }
  0x3a   :  { %690 = vmatprep.subr.bf16.mxu0 %v283_v56  ;;  %v223_v56 = vld [vmem:[%s1436_s1 + $0x5b0] sm:$0xff]  ;;  %v209_v11 = vld [vmem:[%s1436_s1 + $0x540] sm:$0xff]  ;;  %v210_v13 = vld [vmem:[%s1436_s1 + $0x548] sm:$0xff] }
  0x3b   :  { %711 = vmatpush3.bf16.msra.mxu1 %v290_v55  ;;  %v192_v55 = vld [vmem:[%s1436_s1 + $0x4b8] sm:$0xff]  ;;  %v328_v0 = vpack.c.bf16 %v224_v57, %v223_v56  ;;  %v227_v16 = vld [vmem:[%s1436_s1 + $0x5d0] sm:$0xff]  ;;  %v321_v19 = vpack.c.bf16 %v210_v13, %v209_v11  ;;  %v198_v27 = vld [vmem:[%s1436_s1 + $0x4e8] sm:$0xff] }
  0x3c   :  { %712 = vmatprep.subr.bf16.mxu1 %v299_v60  ;;  %v312_v60 = vpack.c.bf16 %v192_v55, %v191_v54  ;;  %v196_v15 = vld [vmem:[%s1436_s1 + $0x4d8] sm:$0xff]  ;;  %v179_v21 = vld [vmem:[%s1436_s1 + $0x450] sm:$0xff]  ;;  %v229_v28 = vld [vmem:[%s1436_s1 + $0x5e0] sm:$0xff] }
  0x3d   :  { %691 = vmatpush3.bf16.msra.mxu0 %v275_v2  ;;  %v193_v2 = vld [vmem:[%s1436_s1 + $0x4c0] sm:$0xff]  ;;  %v211_v23 = vld [vmem:[%s1436_s1 + $0x550] sm:$0xff]  ;;  %v212_v25 = vld [vmem:[%s1436_s1 + $0x558] sm:$0xff] }
  0x3e   :  { %692 = vmatprep.subr.bf16.mxu0 %v284_v4  ;;  %v225_v4 = vld [vmem:[%s1436_s1 + $0x5c0] sm:$0xff]  ;;  %v322_v31 = vpack.c.bf16 %v212_v25, %v211_v23  ;;  %v182_v34 = vld [vmem:[%s1436_s1 + $0x468] sm:$0xff]  ;;  %v199_v38 = vld [vmem:[%s1436_s1 + $0x4f0] sm:$0xff] }
  0x3f   :  { %713 = vmatpush3.bf16.msra.mxu1 %v291_v3  ;;  %v194_v3 = vld [vmem:[%s1436_s1 + $0x4c8] sm:$0xff]  ;;  %v329_v12 = vpack.c.bf16 %v226_v5, %v225_v4  ;;  %v213_v35 = vld [vmem:[%s1436_s1 + $0x560] sm:$0xff]  ;;  %v200_v39 = vld [vmem:[%s1436_s1 + $0x4f8] sm:$0xff] }
  0x40   :  { %714 = vmatprep.subr.bf16.mxu1 %v300_v8  ;;  %v313_v8 = vpack.c.bf16 %v194_v3, %v193_v2  ;;  %v231_v40 = vld [vmem:[%s1436_s1 + $0x5f0] sm:$0xff]  ;;  %v232_v41 = vld [vmem:[%s1436_s1 + $0x5f8] sm:$0xff]  ;;  %v316_v44 = vpack.c.bf16 %v200_v39, %v199_v38  ;;  %v23_v51 = vld [vmem:[%s1437_s0 + $0x40] sm:$0xff] }
  0x41   :  { %693 = vmatpush3.bf16.msra.mxu0 %v276_v14  ;;  %v195_v14 = vld [vmem:[%s1436_s1 + $0x4d0] sm:$0xff]  ;;  %v216_v49 = vld [vmem:[%s1436_s1 + $0x578] sm:$0xff]  ;;  %v233_v54 = vld [vmem:[%s1436_s1 + $0x600] sm:$0xff]  ;;  %v36_v56 = vpack.c.bf16 %v23_v51, %v23_v51 }
  0x42   :  { %722 = vmatprep.subr.bf16.mxu0 %v309_v18  ;;  %v305_v18 = vpack.c.bf16 %v178_v10, %v177_v9  ;;  %v314_v20 = vpack.c.bf16 %v196_v15, %v195_v14  ;;  %v25_v53 = vld [vmem:[%s1437_s0 + $0x50] sm:$0xff]  ;;  %v234_v55 = vld [vmem:[%s1436_s1 + $0x608] sm:$0xff]  ;;  %v236_v61 = vld [vmem:[%s1436_s1 + $0x618] sm:$0xff] }
  0x43   :  { %715 = vmatpush3.bf16.msra.mxu1 %v292_v17  ;;  %v228_v17 = vld [vmem:[%s1436_s1 + $0x5d8] sm:$0xff]  ;;  %v38_v57 = vpack.c.bf16 %v25_v53, %v25_v53  ;;  %v27_v63 = vld [vmem:[%s1437_s0 + $0x60] sm:$0xff] }
  0x44   :  { %744 = vmatprep.subr.bf16.mxu1 %v325_v22  ;;  %459 = vmatmul.mubr.bf16.vlgmr.msra.gmra.mrb[4].mxu0 %v32_v26  ;;  %v180_v22 = vld [vmem:[%s1436_s1 + $0x458] sm:$0xff]  ;;  %v330_v24 = vpack.c.bf16 %v228_v17, %v227_v16  ;;  %v197_v26 = vld [vmem:[%s1436_s1 + $0x4e0] sm:$0xff] }
  0x45   :  { %723 = vmatpush3.bf16.msra.mxu0 %v301_v29  ;;  %538 = vmatprep.mubr.bf16.mxu0 %v37_v43  ;;  %v230_v29 = vld [vmem:[%s1436_s1 + $0x5e8] sm:$0xff]  ;;  %v632_v2 = vld [vmem:[%s1438_s2] ss:$0 sm:$0xff] }
  0x46   :  { %499 = vmatmul.mubr.bf16.vlgmr.msra.gmra.mrb[4].mxu1 %v34_v30  ;;  %724 = vmatprep.subr.bf16.mxu0 %v310_v33  ;;  %v306_v30 = vpack.c.bf16 %v180_v22, %v179_v21  ;;  %v181_v33 = vld [vmem:[%s1436_s1 + $0x460] sm:$0xff]  ;;  %v331_v36 = vpack.c.bf16 %v230_v29, %v229_v28 }
  0x47   :  { %745 = vmatpush3.bf16.msra.mxu1 %v317_v32  ;;  %578 = vmatprep.mubr.bf16.mxu1 %v39_v46  ;;  %v315_v32 = vpack.c.bf16 %v198_v27, %v197_v26  ;;  %v307_v42 = vpack.c.bf16 %v182_v34, %v181_v33  ;;  %v184_v46 = vld [vmem:[%s1436_s1 + $0x478] sm:$0xff] }
  0x48   :  { %746 = vmatprep.subr.bf16.mxu1 %v326_v37  ;;  %v214_v37 = vld [vmem:[%s1436_s1 + $0x568] sm:$0xff] }
  0x49   :  { %725 = vmatpush3.bf16.msra.mxu0 %v302_v45  ;;  %v323_v43 = vpack.c.bf16 %v214_v37, %v213_v35  ;;  %v183_v45 = vld [vmem:[%s1436_s1 + $0x470] sm:$0xff] }
  0x4a   :  { %726 = vmatprep.subr.bf16.mxu0 %v311_v48  ;;  %v215_v48 = vld [vmem:[%s1436_s1 + $0x570] sm:$0xff]  ;;  %v308_v50 = vpack.c.bf16 %v184_v46, %v183_v45 }
  0x4b   :  { %747 = vmatpush3.bf16.msra.mxu1 %v318_v47  ;;  %v332_v47 = vpack.c.bf16 %v232_v41, %v231_v40 }
  0x4c   :  { %748 = vmatprep.subr.bf16.mxu1 %v327_v52  ;;  %v324_v52 = vpack.c.bf16 %v216_v49, %v215_v48 }
  0x4d   :  { %727 = vmatpush3.bf16.msra.mxu0 %v303_v58  ;;  %v333_v58 = vpack.c.bf16 %v234_v55, %v233_v54 }
  0x4e   :  { %728 = vmatprep.subr.bf16.mxu0 %v312_v60  ;;  %v235_v60 = vld [vmem:[%s1436_s1 + $0x610] sm:$0xff] }
  0x4f   :  { %749 = vmatpush3.bf16.msra.mxu1 %v319_v59  ;;  %v779_v59 = vmov 0.0   ;;  %v334_v62 = vpack.c.bf16 %v236_v61, %v235_v60 }
  0x50   :  { %750 = vmatprep.subr.bf16.mxu1 %v328_v0  ;;  %v40_v0 = vpack.c.bf16 %v27_v63, %v27_v63 }
  0x51   :  { %729 = vmatpush3.bf16.msra.mxu0 %v304_v6 }
  0x52   :  { %730 = vmatprep.subr.bf16.mxu0 %v313_v8 }
  0x53   :  { %751 = vmatpush3.bf16.msra.mxu1 %v320_v7 }
  0x54   :  { %752 = vmatprep.subr.bf16.mxu1 %v329_v12 }
  0x55   :  { %731 = vmatpush3.bf16.msra.mxu0 %v305_v18 }
  0x56   :  { %732 = vmatprep.subr.bf16.mxu0 %v314_v20 }
  0x57   :  { %753 = vmatpush3.bf16.msra.mxu1 %v321_v19 }
  0x58   :  { %754 = vmatprep.subr.bf16.mxu1 %v330_v24 }
  0x59   :  { %733 = vmatpush3.bf16.msra.mxu0 %v306_v30 }
  0x5a   :  { %734 = vmatprep.subr.bf16.mxu0 %v315_v32 }
  0x5b   :  { %755 = vmatpush3.bf16.msra.mxu1 %v322_v31 }
  0x5c   :  { %756 = vmatprep.subr.bf16.mxu1 %v331_v36 }
  0x5d   :  { %735 = vmatpush3.bf16.msra.mxu0 %v307_v42 }
  0x5e   :  { %736 = vmatprep.subr.bf16.mxu0 %v316_v44 }
  0x5f   :  { %757 = vmatpush3.bf16.msra.mxu1 %v323_v43 }
  0x60   :  { %758 = vmatprep.subr.bf16.mxu1 %v332_v47 }
  0x61   :  { %737 = vmatpush3.bf16.msra.mxu0 %v308_v50 }
  0x62   :  { %769 = vmatprep.subr.bf16.mxu0 %v779_v59 }
  0x63   :  { %759 = vmatpush3.bf16.msra.mxu1 %v324_v52 }
  0x64   :  { %539 = vmatmul.mubr.bf16.vlgmr.msra.gmra.mrb[8].mxu0 %v36_v56 }
  0x65   :  { %770 = vmatpush3.bf16.msra.mxu0 %v333_v58  ;;  %773 = vmatprep.mubr.msk.bf16.mxu0 %vm780_vm0, %v779_v59 }
  0x66   :  { %579 = vmatmul.mubr.bf16.vlgmr.msra.gmra.mrb[8].mxu1 %v38_v57  ;;  %771 = vmatprep.subr.bf16.mxu0 %v779_v59 }
  0x69   :  { %772 = vmatpush3.bf16.msra.mxu0 %v334_v62 }
  0x6c   :  { %774 = vmatmul.mubr.msk.bf16.vlgmr.msra.gmra.mrb[12].mxu0 %vm342_vm1, %v40_v0 }
  0xf7   :  { %v650_v1 = vpop.f32.mrb[0].mxu0 }
  0xf8   :  { %v651_v3 = vpop.f32.mrb[1].mxu0 }
  0xf9   :  { %v672_v4 = vpop.f32.mrb[0].mxu1  ;;  %v652_v5 = vadd.f32 %v651_v3, %v650_v1  ;;  %v653_v6 = vpop.f32.mrb[2].mxu0 }
  0xfa   :  { %v673_v7 = vpop.f32.mrb[1].mxu1  ;;  %v654_v8 = vpop.f32.mrb[3].mxu0 }
  0xfb   :  { %v674_v9 = vadd.f32 %v673_v7, %v672_v4  ;;  %v675_v10 = vpop.f32.mrb[2].mxu1  ;;  %v381_v11 = vadd.f32 %v652_v5, %v632_v2 }
  0xfc   :  { %v676_v12 = vpop.f32.mrb[3].mxu1 }
  0xfd   :  { %v421_v13 = vadd.f32 %v674_v9, %v381_v11 }
 0x117   :  { %v694_v14 = vpop.f32.mrb[4].mxu0 }
 0x118   :  { %v695_v15 = vpop.f32.mrb[5].mxu0 }
 0x119   :  { %v716_v16 = vpop.f32.mrb[4].mxu1  ;;  %v696_v17 = vadd.f32 %v695_v15, %v694_v14  ;;  %v697_v18 = vpop.f32.mrb[6].mxu0 }
 0x11a   :  { %v717_v19 = vpop.f32.mrb[5].mxu1  ;;  %v698_v20 = vpop.f32.mrb[7].mxu0 }
 0x11b   :  { %v718_v21 = vadd.f32 %v717_v19, %v716_v16  ;;  %v719_v22 = vpop.f32.mrb[6].mxu1  ;;  %v461_v23 = vadd.f32 %v696_v17, %v421_v13 }
 0x11c   :  { %v720_v24 = vpop.f32.mrb[7].mxu1 }
 0x11d   :  { %v501_v25 = vadd.f32 %v718_v21, %v461_v23 }
 0x137   :  { %v738_v26 = vpop.f32.mrb[8].mxu0 }
 0x138   :  { %v739_v27 = vpop.f32.mrb[9].mxu0 }
 0x139   :  { %v760_v28 = vpop.f32.mrb[8].mxu1  ;;  %v740_v29 = vadd.f32 %v739_v27, %v738_v26  ;;  %v741_v30 = vpop.f32.mrb[10].mxu0 }
 0x13a   :  { %v761_v31 = vpop.f32.mrb[9].mxu1  ;;  %v742_v33 = vpop.f32.mrb[11].mxu0 }
 0x13b   :  { %v762_v32 = vadd.f32 %v761_v31, %v760_v28  ;;  %v763_v34 = vpop.f32.mrb[10].mxu1  ;;  %v541_v35 = vadd.f32 %v740_v29, %v501_v25 }
 0x13c   :  { %v764_v36 = vpop.f32.mrb[11].mxu1 }
 0x13d   :  { %v581_v37 = vadd.f32 %v762_v32, %v541_v35 }
 0x13f   :  { %v620_v38 = vpop.f32.mrb[12].mxu0 }
 0x140   :  { %v621_v39 = vadd.f32 %v620_v38, %v581_v37  ;;  %v775_v40 = vpop.f32.mrb[13].mxu0 }
 0x141   :  { %v623_v41 = vpop.f32.mrb[14].mxu0 }
 0x142   :  { %v626_v42 = vmax.f32 %v621_v39, 0.0  ;;  %v776_v43 = vpop.f32.mrb[15].mxu0 }
 0x144   :  { %627 = vst.msk [vmem:[%s1439_s3] sm:$0xff] %vm342_vm1, %v626_v42 }

// kernel: _lambda_.11
= control target key start
LH: loop header
LB: loop body
LE: loop exit
PB: predicated region body
PF: predicated region fallthrough
CT: control target
= control target key end

     0   :  { %vm25_vm0 = vcmask 261120   ;;  %s357_s0 = inlined_call_operand.vmem [shape: f32[64,32], index: 0, kind: input, shape index: {}]   ;;  %s358_s1 = inlined_call_operand.vmem [shape: f32[1,32], index: 1, kind: input, shape index: {}]   ;;  %s359_s2 = inlined_call_operand.vmem [shape: f32[1,32], index: 2, kind: input, shape index: {}]   ;;  %s360_s3 = inlined_call_operand.hbm [shape: f32[64,32], index: 3, kind: output, shape index: {}]  }
   0x1   :  { %v15_v0 = vld [vmem:[%s357_s0] sm:$0xff]  ;;  %v17_v1 = vld [vmem:[%s357_s0 + $0x10] sm:$0xff]  ;;  %v16_v2 = vld [vmem:[%s357_s0 + $0x8] sm:$0xff] }
   0x2   :  { %v26_v3 = vsel %vm25_vm0, %v15_v0, 0.0  ;;  %v32_v4 = vsel %vm25_vm0, %v17_v1, 0.0  ;;  %v18_v5 = vld [vmem:[%s357_s0 + $0x18] sm:$0xff]  ;;  %v29_v6 = vsel %vm25_vm0, %v16_v2, 0.0 }
   0x3   :  { %27 = vadd.xlane.f32.xlu0 %v26_v3  ;;  %33 = vadd.xlane.f32.xlu1 %v32_v4  ;;  %v35_v7 = vsel %vm25_vm0, %v18_v5, 0.0 }
   0x4   :  { %8 = vsyncpa [#allocation3], 0  ;;  %v19_v8 = vld [vmem:[%s357_s0 + $0x20] sm:$0xff]  ;;  %v20_v9 = vld [vmem:[%s357_s0 + $0x28] sm:$0xff] }
   0x5   :  { %v38_v10 = vsel %vm25_vm0, %v19_v8, 0.0  ;;  %v41_v11 = vsel %vm25_vm0, %v20_v9, 0.0  ;;  %v21_v12 = vld [vmem:[%s357_s0 + $0x30] sm:$0xff]  ;;  %v22_v13 = vld [vmem:[%s357_s0 + $0x38] sm:$0xff] }
   0x6   :  { %v44_v14 = vsel %vm25_vm0, %v21_v12, 0.0  ;;  %v47_v15 = vsel %vm25_vm0, %v22_v13, 0.0 }
   0x7   :  { %30 = vadd.xlane.f32.xlu0 %v29_v6  ;;  %36 = vadd.xlane.f32.xlu1 %v35_v7 }
   0xb   :  { %39 = vadd.xlane.f32.xlu0 %v38_v10  ;;  %42 = vadd.xlane.f32.xlu1 %v41_v11 }
   0xf   :  { %45 = vadd.xlane.f32.xlu0 %v44_v14  ;;  %48 = vadd.xlane.f32.xlu1 %v47_v15 }
  0x90   :  { %v28_v16 = vpop.xlane.xlu0 %27  ;;  %v34_v17 = vpop.xlane.xlu1 %33 }
  0x91   :  { %v51_v18 = vmul.f32 0.03125, %v28_v16  ;;  %v53_v19 = vmul.f32 0.03125, %v34_v17  ;;  %v184_v17 = vld [vmem:[%s359_s2] ss:$0 sm:$0xff] }
  0x93   :  { %v283_v20 = vsub.f32 %v15_v0, %v51_v18  ;;  %v285_v21 = vsub.f32 %v17_v1, %v53_v19 }
  0x94   :  { %v31_v22 = vpop.xlane.xlu0 %30  ;;  %v37_v23 = vpop.xlane.xlu1 %36 }
  0x95   :  { %v52_v24 = vmul.f32 0.03125, %v31_v22  ;;  %v54_v25 = vmul.f32 0.03125, %v37_v23  ;;  %v67_v26 = vmul.f32 %v283_v20, %v283_v20  ;;  %v69_v27 = vmul.f32 %v285_v21, %v285_v21 }
  0x97   :  { %v291_v28 = vsub.f32 %v16_v2, %v52_v24  ;;  %v293_v29 = vsub.f32 %v18_v5, %v54_v25  ;;  %v75_v30 = vsel %vm25_vm0, %v67_v26, 0.0  ;;  %v81_v33 = vsel %vm25_vm0, %v69_v27, 0.0 }
  0x98   :  { %76 = vadd.xlane.f32.xlu0 %v75_v30  ;;  %v40_v31 = vpop.xlane.xlu0 %39  ;;  %v43_v32 = vpop.xlane.xlu1 %42 }
  0x99   :  { %v55_v34 = vmul.f32 0.03125, %v40_v31  ;;  %v56_v35 = vmul.f32 0.03125, %v43_v32  ;;  %v68_v36 = vmul.f32 %v291_v28, %v291_v28  ;;  %v70_v37 = vmul.f32 %v293_v29, %v293_v29 }
  0x9b   :  { %v301_v38 = vsub.f32 %v19_v8, %v55_v34  ;;  %v303_v39 = vsub.f32 %v20_v9, %v56_v35  ;;  %v78_v40 = vsel %vm25_vm0, %v68_v36, 0.0  ;;  %v84_v43 = vsel %vm25_vm0, %v70_v37, 0.0 }
  0x9c   :  { %82 = vadd.xlane.f32.xlu0 %v81_v33  ;;  %79 = vadd.xlane.f32.xlu1 %v78_v40  ;;  %v46_v41 = vpop.xlane.xlu0 %45  ;;  %v49_v42 = vpop.xlane.xlu1 %48 }
  0x9d   :  { %v57_v44 = vmul.f32 0.03125, %v46_v41  ;;  %v58_v45 = vmul.f32 0.03125, %v49_v42  ;;  %v71_v46 = vmul.f32 %v301_v38, %v301_v38  ;;  %v72_v47 = vmul.f32 %v303_v39, %v303_v39 }
  0x9f   :  { %v311_v48 = vsub.f32 %v21_v12, %v57_v44  ;;  %v313_v49 = vsub.f32 %v22_v13, %v58_v45  ;;  %v87_v50 = vsel %vm25_vm0, %v71_v46, 0.0  ;;  %v90_v51 = vsel %vm25_vm0, %v72_v47, 0.0  ;;  %v183_v12 = vld [vmem:[%s358_s1] ss:$0 sm:$0xff]  ;;  %s228_s1 = smov [#allocation2]  }
  0xa0   :  { %85 = vadd.xlane.f32.xlu1 %v84_v43  ;;  %88 = vadd.xlane.f32.xlu0 %v87_v50  ;;  %s172_s2 = sshll.u32 %s228_s1, 4  ;;  %s173_s2 = int_to_ptr.vmem [resolvable:$true] %s172_s2 }
  0xa1   :  { %v73_v52 = vmul.f32 %v311_v48, %v311_v48  ;;  %v74_v53 = vmul.f32 %v313_v49, %v313_v49  ;;  %s204_s4 = scalar_lea.vmem %s173_s2, 1024  ;;  %p209_p1 = scmp.lt.s32.totalorder %s173_s2, %s173_s2 }
  0xa2   :  { %p205_p0 = scmp.ne.s32.totalorder %s173_s2, %s204_s4  ;;  %p210_p2 = scmp.lt.s32.totalorder %s204_s4, %s204_s4 }
  0xa3   :  { %v93_v54 = vsel %vm25_vm0, %v73_v52, 0.0  ;;  %v96_v55 = vsel %vm25_vm0, %v74_v53, 0.0 }
  0xa4   :  { %91 = vadd.xlane.f32.xlu1 %v90_v51  ;;  %94 = vadd.xlane.f32.xlu0 %v93_v54  ;;  %p211_p3 = por %p210_p2, %p209_p1 }
  0xa6   :  { %p212_p4 = pnand %p211_p3, %p205_p0 }
  0xa8   :  { %97 = vadd.xlane.f32.xlu1 %v96_v55 }
 0x125   :  { %v77_v56 = vpop.xlane.xlu0 %76 }
 0x126   :  { %v99_v57 = vmul.f32 0.03125, %v77_v56 }
 0x128   :  { %v107_v58 = vadd.f32 1e-05, %v99_v57 }
 0x129   :  { %v80_v59 = vpop.xlane.xlu1 %79  ;;  %v83_v60 = vpop.xlane.xlu0 %82 }
 0x12a   :  { %188 = vrsqrt.f32 %v107_v58  ;;  %v100_v61 = vmul.f32 0.03125, %v80_v59  ;;  %v101_v62 = vmul.f32 0.03125, %v83_v60 }
 0x12c   :  { %v108_v63 = vadd.f32 1e-05, %v100_v61  ;;  %v109_v0 = vadd.f32 1e-05, %v101_v62 }
 0x12d   :  { %v86_v1 = vpop.xlane.xlu1 %85  ;;  %v89_v2 = vpop.xlane.xlu0 %88 }
 0x12e   :  { %190 = vrsqrt.f32 %v108_v63  ;;  %v102_v3 = vmul.f32 0.03125, %v86_v1  ;;  %v103_v4 = vmul.f32 0.03125, %v89_v2 }
 0x12f   :  { %192 = vrsqrt.f32 %v109_v0 }
 0x130   :  { %v110_v5 = vadd.f32 1e-05, %v102_v3  ;;  %v111_v6 = vadd.f32 1e-05, %v103_v4 }
 0x131   :  { %v92_v7 = vpop.xlane.xlu1 %91  ;;  %v95_v8 = vpop.xlane.xlu0 %94 }
 0x132   :  { %194 = vrsqrt.f32 %v110_v5  ;;  %v104_v9 = vmul.f32 0.03125, %v92_v7  ;;  %v105_v10 = vmul.f32 0.03125, %v95_v8 }
 0x133   :  { %196 = vrsqrt.f32 %v111_v6 }
 0x134   :  { %v189_v11 = vpop.eup %188  ;;  %v112_v13 = vadd.f32 1e-05, %v104_v9  ;;  %v113_v14 = vadd.f32 1e-05, %v105_v10 }
 0x135   :  { %v123_v15 = vmul.f32 %v189_v11, %v283_v20  ;;  %v98_v16 = vpop.xlane.xlu1 %97 }
 0x136   :  { %198 = vrsqrt.f32 %v112_v13  ;;  %v106_v18 = vmul.f32 0.03125, %v98_v16 }
 0x137   :  { %v137_v19 = vmul.f32 %v183_v12, %v123_v15  ;;  %200 = vrsqrt.f32 %v113_v14 }
 0x138   :  { %v191_v22 = vpop.eup %190  ;;  %v114_v23 = vadd.f32 1e-05, %v106_v18 }
 0x139   :  { %v193_v24 = vpop.eup %192  ;;  %v151_v25 = vadd.f32 %v184_v17, %v137_v19  ;;  %v124_v26 = vmul.f32 %v191_v22, %v291_v28 }
 0x13a   :  { %v125_v27 = vmul.f32 %v193_v24, %v285_v21  ;;  %202 = vrsqrt.f32 %v114_v23 }
 0x13b   :  { %159 = vst.msk [vmem:[#allocation2] sm:$0xff] %vm25_vm0, %v151_v25  ;;  %v138_v20 = vmul.f32 %v183_v12, %v124_v26 }
 0x13c   :  { %v195_v30 = vpop.eup %194  ;;  %v139_v31 = vmul.f32 %v183_v12, %v125_v27 }
 0x13d   :  { %v197_v32 = vpop.eup %196  ;;  %v152_v33 = vadd.f32 %v184_v17, %v138_v20  ;;  %v126_v34 = vmul.f32 %v195_v30, %v293_v29 }
 0x13e   :  { %v153_v35 = vadd.f32 %v184_v17, %v139_v31  ;;  %v127_v36 = vmul.f32 %v197_v32, %v301_v38 }
 0x13f   :  { %160 = vst.msk [vmem:[#allocation2 + $0x8] sm:$0xff] %vm25_vm0, %v152_v33  ;;  %v140_v37 = vmul.f32 %v183_v12, %v126_v34 }
 0x140   :  { %v199_v40 = vpop.eup %198  ;;  %161 = vst.msk [vmem:[#allocation2 + $0x10] sm:$0xff] %vm25_vm0, %v153_v35  ;;  %v141_v21 = vmul.f32 %v183_v12, %v127_v36 }
 0x141   :  { %v201_v28 = vpop.eup %200  ;;  %v154_v41 = vadd.f32 %v184_v17, %v140_v37  ;;  %v128_v42 = vmul.f32 %v199_v40, %v303_v39 }
 0x142   :  { %v155_v43 = vadd.f32 %v184_v17, %v141_v21  ;;  %v129_v44 = vmul.f32 %v201_v28, %v311_v48 }
 0x143   :  { %162 = vst.msk [vmem:[#allocation2 + $0x18] sm:$0xff] %vm25_vm0, %v154_v41  ;;  %v142_v29 = vmul.f32 %v183_v12, %v128_v42 }
 0x144   :  { %v203_v45 = vpop.eup %202  ;;  %163 = vst.msk [vmem:[#allocation2 + $0x20] sm:$0xff] %vm25_vm0, %v155_v43  ;;  %v143_v38 = vmul.f32 %v183_v12, %v129_v44 }
 0x145   :  { %v156_v46 = vadd.f32 %v184_v17, %v142_v29  ;;  %v130_v47 = vmul.f32 %v203_v45, %v313_v49 }
 0x146   :  { %v157_v50 = vadd.f32 %v184_v17, %v143_v38 }
 0x147   :  { %164 = vst.msk [vmem:[#allocation2 + $0x28] sm:$0xff] %vm25_vm0, %v156_v46  ;;  %v144_v51 = vmul.f32 %v183_v12, %v130_v47 }
 0x148   :  { %165 = vst.msk [vmem:[#allocation2 + $0x30] sm:$0xff] %vm25_vm0, %v157_v50 }
 0x149   :  { %v158_v39 = vadd.f32 %v184_v17, %v144_v51 }
 0x14b   :  { %166 = vst.msk [vmem:[#allocation2 + $0x38] sm:$0xff] %vm25_vm0, %v158_v39 }
 0x14c   :  { %215 = shalt.err (!%p212_p4)
}
 0x14d   :  { %s216_s7 = scalar_lea.hbm %s360_s3, 1024 }
 0x14e   :  { %p217_p5 = scmp.ne.s32.totalorder %s360_s3, %s216_s7  ;;  %p220_p6 = scmp.lt.u32.totalorder %s216_s7, %s360_s3 }
 0x150   :  { %p222_p7 = pnand %p220_p6, %p217_p5 }
 0x152   :  { %225 = shalt.err (!%p222_p7)
}
 0x153   :  { %s229_s12 = smov 128   ;;  %s230_s13 = smov 8  }
 0x154   :  { %178 = dma.vmem_to_hbm [thread:$0]  %s173_s2, 1024, %s360_s3, [#allocation3], %s229_s12, %s229_s12, %s230_s13  }
 0x155   :  { %226 = dma.done.wait [#allocation3], 1024  }
 0x156   :  { %227 = vsyncadd [#allocation3], 4294966272 }
 0x157   :  { %182 = vsyncpa [#allocation3], 1 }

// kernel: _lambda_.9
= control target key start
LH: loop header
LB: loop body
LE: loop exit
PB: predicated region body
PF: predicated region fallthrough
CT: control target
= control target key end

     0   :  { %s4296_s27 = smov 0   ;;  %s5107_s0 = inlined_call_operand.vmem [shape: f32[64,32], index: 0, kind: input, shape index: {}]   ;;  %s5108_s1 = inlined_call_operand.vmem [shape: f32[2,32,32], index: 1, kind: input, shape index: {}]   ;;  %s5109_s2 = inlined_call_operand.vmem [shape: f32[32,32], index: 2, kind: input, shape index: {}]   ;;  %s5110_s3 = inlined_call_operand.vmem [shape: f32[1,32], index: 3, kind: input, shape index: {}]   ;;  %s5111_s4 = inlined_call_operand.vmem [shape: f32[32,32], index: 4, kind: input, shape index: {}]   ;;  %s5112_s5 = inlined_call_operand.vmem [shape: f32[1,32], index: 5, kind: input, shape index: {}]   ;;  %s5113_s6 = inlined_call_operand.vmem [shape: f32[32,32], index: 6, kind: input, shape index: {}]   ;;  %s5114_s7 = inlined_call_operand.vmem [shape: f32[1,32], index: 7, kind: input, shape index: {}]   ;;  %s5115_s8 = inlined_call_operand.vmem [shape: f32[32,32], index: 8, kind: input, shape index: {}]   ;;  %s5116_s9 = inlined_call_operand.vmem [shape: f32[1,32], index: 9, kind: input, shape index: {}]   ;;  %s5117_s10 = inlined_call_operand.vmem [shape: f32[1,32], index: 10, kind: input, shape index: {}]   ;;  %s5118_s11 = inlined_call_operand.vmem [shape: f32[1,32], index: 11, kind: input, shape index: {}]   ;;  %s5119_s12 = inlined_call_operand.vmem [shape: f32[32,64], index: 12, kind: input, shape index: {}]   ;;  %s5120_s13 = inlined_call_operand.vmem [shape: f32[1,64], index: 13, kind: input, shape index: {}]   ;;  %s5121_s14 = inlined_call_operand.vmem [shape: f32[64,32], index: 14, kind: input, shape index: {}]   ;;  %s5122_s15 = inlined_call_operand.vmem [shape: f32[1,32], index: 15, kind: input, shape index: {}]   ;;  %s5123_s16 = inlined_call_operand.vmem [shape: f32[1,32], index: 16, kind: input, shape index: {}]   ;;  %s5124_s17 = inlined_call_operand.vmem [shape: f32[1,32], index: 17, kind: input, shape index: {}]   ;;  %s5125_s18 = inlined_call_operand.vmem [shape: f32[64,32], index: 18, kind: output, shape index: {}]  }
   0x1   :  { %5127 = sst [smem:[#allocation2_spill]] %s5107_s0 }
   0x2   :  { %5128 = sst [smem:[#allocation3_spill]] %s5108_s1 }
   0x3   :  { %5129 = sst [smem:[#allocation4_spill]] %s5109_s2 }
   0x4 LB: > { %s4302_s28 = sadd.s32 4294967295, %s4199_s27   ;;  %p3315_p0 = scmp.ge.s32.totalorder %s4199_s27, 1  ;;  %s4199_s27 = sphi %s4296_s27, %s28_s27  }
   0x5   : > { %p523_p1 = scmp.lt.s32.totalorder %s4199_s27, 3 }
   0x7   : > { %p524_p2 = pnand %p3315_p0, %p523_p1 }
   0x8   : > { %s5130_s0 = sld [smem:[#allocation4_spill]] (!%p524_p2)  ;;  %v679_v2 = vld [vmem:[%s5111_s4] sm:$0xff] (!%p524_p2)  ;;  %s3316_s22 = sshll.u32 (!%p524_p2), %s4302_s28, 2  ;;  %v680_v4 = vld [vmem:[%s5111_s4 + $0x8] sm:$0xff] (!%p524_p2)  ;;  %v681_v9 = vld [vmem:[%s5111_s4 + $0x10] sm:$0xff] (!%p524_p2)  ;;  %vm619_vm0 = vcmask (!%p524_p2), 261120   ;;  %v807_v24 = vlaneseq (!%p524_p2) }
   0x9   : > { %527 = sbr.rel (%p524_p2) target bundleno = 6134 (0x17f6), region = 92  ;;  %p583_p3 = scmp.lt.s32.totalorder (!%p524_p2), %s3316_s22, 7  ;;  %v683_v7 = vpack.c.bf16 (!%p524_p2), %v680_v4, %v679_v2  ;;  %v682_v10 = vld [vmem:[%s5111_s4 + $0x18] sm:$0xff] (!%p524_p2)  ;;  %v741_v11 = vld [vmem:[%s5113_s6] sm:$0xff] (!%p524_p2)  ;;  %v742_v13 = vld [vmem:[%s5113_s6 + $0x8] sm:$0xff] (!%p524_p2) }
   0xa   : > { %v684_v12 = vpack.c.bf16 (!%p524_p2), %v682_v10, %v681_v9  ;;  %v745_v14 = vpack.c.bf16 (!%p524_p2), %v742_v13, %v741_v11  ;;  %s5131_s30 = sld [smem:[#allocation2_spill]] (!%p524_p2)  ;;  %v743_v15 = vld [vmem:[%s5113_s6 + $0x10] sm:$0xff] (!%p524_p2)  ;;  %v744_v16 = vld [vmem:[%s5113_s6 + $0x18] sm:$0xff] (!%p524_p2)  ;;  %v3322_v25 = vld [vmem:[%s5110_s3] ss:$0 sm:$0xff] (!%p524_p2)  ;;  %v4366_v26 = vand.u32 (!%p524_p2), 127, %v807_v24 }
   0xb   : > { %3605 = vmatprep.subr.bf16.mxu1 (!%p524_p2), %v683_v7  ;;  %v746_v23 = vpack.c.bf16 (!%p524_p2), %v744_v16, %v743_v15  ;;  %v3325_v29 = vld [vmem:[%s5112_s5] ss:$0 sm:$0xff] (!%p524_p2)  ;;  %vm4378_vm2 = vmpackc.low (!%p524_p2), %vm619_vm0, %vm619_vm0  ;;  %p588_p4 = scmp.lt.s32.totalorder (!%p524_p2), %s4302_s28, 1  ;;  %s5134_s23 = sld [smem:[#allocation3_spill]] (!%p524_p2) }
   0xc   : > { %3606 = vmatpush3.bf16.msra.mxu1 (!%p524_p2), %v683_v7  ;;  %vm810_vm1 = vcmp.lt.s32.totalorder (!%p524_p2), %v4366_v26, 4  ;;  %v3328_v46 = vld [vmem:[%s5114_s7] ss:$0 sm:$0xff] (!%p524_p2)  ;;  %vm1076_vm3 = vcmp.ge.s32.totalorder (!%p524_p2), %v4366_v26, 4  ;;  %vm1077_vm4 = vcmp.lt.s32.totalorder (!%p524_p2), %v4366_v26, 8  ;;  %vm1331_vm6 = vcmp.ge.s32.totalorder (!%p524_p2), %v4366_v26, 8 }
   0xd   : > { %3607 = vmatprep.subr.bf16.mxu1 (!%p524_p2), %v684_v12  ;;  %vm4478_vm5 = vmand (!%p524_p2), %vm1076_vm3, %vm1077_vm4  ;;  %vm1332_vm7 = vcmp.lt.s32.totalorder (!%p524_p2), %v4366_v26, 12  ;;  %vm1586_vm9 = vcmp.ge.s32.totalorder (!%p524_p2), %v4366_v26, 12  ;;  %vm1587_vm10 = vcmp.lt.s32.totalorder (!%p524_p2), %v4366_v26, 16  ;;  %vm1841_vm12 = vcmp.ge.s32.totalorder (!%p524_p2), %v4366_v26, 16 }
   0xe   : > { %v606_v0 = vld [vmem:[%s5130_s0] sm:$0xff] (!%p524_p2)  ;;  %v607_v1 = vld [vmem:[%s5130_s0 + $0x8] sm:$0xff] (!%p524_p2)  ;;  %v608_v5 = vld [vmem:[%s5130_s0 + $0x10] sm:$0xff] (!%p524_p2)  ;;  %vm1842_vm13 = vcmp.lt.s32.totalorder (!%p524_p2), %v4366_v26, 20  ;;  %vm2096_vm15 = vcmp.ge.s32.totalorder (!%p524_p2), %v4366_v26, 20  ;;  %vm2351_vm4 = vcmp.ge.s32.totalorder (!%p524_p2), %v4366_v26, 24 }
   0xf   : > { %v610_v3 = vpack.c.bf16 (!%p524_p2), %v607_v1, %v606_v0  ;;  %v609_v6 = vld [vmem:[%s5130_s0 + $0x18] sm:$0xff] (!%p524_p2)  ;;  %vm4539_vm8 = vmand (!%p524_p2), %vm1331_vm6, %vm1332_vm7  ;;  %vm2606_vm7 = vcmp.ge.s32.totalorder (!%p524_p2), %v4366_v26, 28 }
  0x10   : > { %v611_v8 = vpack.c.bf16 %v609_v6, %v608_v5  ;;  %s5150_s22 = smov (!%p583_p3, %s3316_s22), 7  ;;  %3608 = vmatpush3.bf16.msra.mxu1 %v684_v12  ;;  %s5152_s28 = smov (!%p588_p4, %s4302_s28), 1  ;;  %vm4621_vm11 = vmand %vm1586_vm9, %vm1587_vm10 }
  0x11   : > { %3597 = vmatprep.subr.bf16.mxu0 %v610_v3  ;;  %s3317_s25 = sshll.u32 %s5150_s22, 3  ;;  %s3442_s20 = sshll.u32 %s5152_s28, 5  ;;  %vm4695_vm14 = vmand %vm1841_vm12, %vm1842_vm13 }
  0x12   : > { %3598 = vmatpush3.bf16.msra.mxu0 %v610_v3  ;;  %s4345_s19 = scalar_lea.vmem %s5131_s30, %s3317_s25  ;;  %s4444_s24 = scalar_lea.vmem %s5134_s23, %s3442_s20 }
  0x13   : > { %3599 = vmatprep.subr.bf16.mxu0 %v611_v8  ;;  %v600_v17 = vld [vmem:[%s4345_s19] sm:$0xff]  ;;  %v601_v18 = vld [vmem:[%s4345_s19 + $0x8] sm:$0xff]  ;;  %v602_v19 = vld [vmem:[%s4345_s19 + $0x10] sm:$0xff]  ;;  %s597_s1 = scalar_lea.vmem %s5125_s18, %s3317_s25 }
  0x14   : > { %v604_v20 = vpack.c.bf16 %v601_v18, %v600_v17  ;;  %v603_v21 = vld [vmem:[%s4345_s19 + $0x18] sm:$0xff]  ;;  %v4447_v2 = vld [vmem:[%s4444_s24] sm:$0xff]  ;;  %v4450_v4 = vld [vmem:[%s4444_s24 + $0x8] sm:$0xff] }
  0x15   : > { %v605_v22 = vpack.c.bf16 %v603_v21, %v602_v19  ;;  %v4454_v7 = vld [vmem:[%s4444_s24 + $0x10] sm:$0xff]  ;;  %v4459_v11 = vld [vmem:[%s4444_s24 + $0x18] sm:$0xff] }
  0x16   : > { %3600 = vmatpush3.bf16.msra.mxu0 %v611_v8  ;;  %3601 = vmatprep.mubr.msk.bf16.mxu0 %vm619_vm0, %v604_v20 }
  0x17   : > { %3613 = vmatprep.subr.bf16.mxu0 %v745_v14  ;;  %3609 = vmatprep.mubr.msk.bf16.mxu1 %vm619_vm0, %v604_v20 }
  0x18   : > { %3610 = vmatmul.mubr.msk.bf16.vlgmr.msra.gmra.mrb[0].mxu1 %vm619_vm0, %v605_v22 }
  0x19   : > { %3602 = vmatmul.mubr.msk.bf16.vlgmr.msra.gmra.mrb[0].mxu0 %vm619_vm0, %v605_v22 }
  0x1a   : > { %3614 = vmatpush3.bf16.msra.mxu0 %v745_v14  ;;  %3617 = vmatprep.mubr.msk.bf16.mxu0 %vm619_vm0, %v604_v20 }
  0x1b   : > { %3615 = vmatprep.subr.bf16.mxu0 %v746_v23 }
  0x1e   : > { %3616 = vmatpush3.bf16.msra.mxu0 %v746_v23 }
  0x21   : > { %3618 = vmatmul.mubr.msk.bf16.vlgmr.msra.gmra.mrb[4].mxu0 %vm619_vm0, %v605_v22 }
  0xeb   : > { %v3611_v28 = vpop.f32.mrb[0].mxu1 }
  0xec   : > { %v3603_v27 = vpop.f32.mrb[0].mxu0  ;;  %v726_v31 = vpop.f32.mrb[1].mxu1  ;;  %v735_v36 = vadd.f32 %v3611_v28, %v3325_v29 }
  0xed   : > { %v660_v30 = vpop.f32.mrb[1].mxu0  ;;  %v3612_v34 = vpop.f32.mrb[2].mxu1  ;;  %v727_v40 = vadd.f32 %v3325_v29, %v726_v31  ;;  %v669_v58 = vadd.f32 %v3603_v27, %v3322_v25 }
  0xee   : > { %v661_v32 = vadd.f32 %v3322_v25, %v660_v30  ;;  %v3604_v33 = vpop.f32.mrb[2].mxu0  ;;  %v738_v37 = vadd.f32 %v3612_v34, %v3325_v29  ;;  %v729_v38 = vpop.f32.mrb[3].mxu1 }
  0xef   : > { %v663_v35 = vpop.f32.mrb[3].mxu0  ;;  %v730_v41 = vadd.f32 %v3325_v29, %v729_v38  ;;  %v672_v59 = vadd.f32 %v3604_v33, %v3322_v25  ;;  %v4413_v61 = vmul.f32 0.5, %v669_v58 }
  0xf0   : > { %v4372_v39 = vmul.f32 0.5, %v661_v32  ;;  %v4374_v42 = vpack.c.bf16 %v738_v37, %v735_v36  ;;  %v664_v57 = vadd.f32 %v3322_v25, %v663_v35 }
  0xf1   : > { %v4385_v45 = vpack.c.bf16 %v730_v41, %v727_v40  ;;  %v4419_v62 = vmul.f32 0.5, %v672_v59  ;;  %v816_v0 = vsel %vm810_vm1, %v4413_v61, 0.0 }
  0xf2   : > { %v814_v44 = vsel %vm810_vm1, %v4372_v39, 0.0  ;;  %v4411_v60 = vmul.f32 0.5, %v664_v57  ;;  %v1081_v58 = vsel %vm4478_vm5, %v4372_v39, 0.0 }
  0xf3   : > { %3629 = vmatprep.mubr.msk.f32.mxu1 %vm619_vm0, %v814_v44  ;;  %3875 = vmatprep.subr.msk.bf16.mxu1 %vm4378_vm2, %v4385_v45  ;;  %v817_v1 = vsel %vm810_vm1, %v4419_v62, 0.0 }
  0xf4   : > { %v3619_v47 = vpop.f32.mrb[4].mxu0  ;;  %3878 = vmatpush3.bf16.xpose.msk.msra.mxu1 %vm4378_vm2, %v4385_v45  ;;  %v815_v63 = vsel %vm810_vm1, %v4411_v60, 0.0  ;;  %v1082_v59 = vsel %vm4478_vm5, %v4411_v60, 0.0 }
  0xf5   : > { %v797_v48 = vadd.f32 %v3619_v47, %v3328_v46  ;;  %v788_v49 = vpop.f32.mrb[5].mxu0  ;;  %3881 = vmatprep.subr.msk.bf16.mxu1 %vm4378_vm2, %v4374_v42 }
  0xf6   : > { %v789_v50 = vadd.f32 %v3328_v46, %v788_v49  ;;  %v3620_v51 = vpop.f32.mrb[6].mxu0 }
  0xf7   : > { %v800_v52 = vadd.f32 %v3620_v51, %v3328_v46  ;;  %v791_v53 = vpop.f32.mrb[7].mxu0 }
  0xf8   : > { %v792_v54 = vadd.f32 %v3328_v46, %v791_v53 }
  0xf9   : > { %v4400_v55 = vpack.c.bf16 %v800_v52, %v797_v48 }
  0xfa   : > { %v4402_v56 = vpack.c.bf16 %v792_v54, %v789_v50 }
  0xfc   : > { %3886 = vmatprep.subr.bf16.mxu0 %v4402_v56  ;;  %3884 = vmatpush3.bf16.xpose.msk.msra.mxu1 %vm4378_vm2, %v4374_v42 }
  0xfd   : > { %3888 = vmatpush3.bf16.msra.mxu0 %v4402_v56  ;;  %3906 = vmatprep.subr.bf16.mxu1 %v4402_v56 }
  0xfe   : > { %3890 = vmatprep.subr.bf16.mxu0 %v4400_v55 }
 0x101   : > { %3892 = vmatpush3.bf16.msra.mxu0 %v4400_v55 }
 0x102   : > { %3895 = vmatprep.subr.msk.bf16.mxu0 %vm4378_vm2, %v4385_v45 }
 0x103   : > { %3630 = vmatmul.mubr.msk.f32.vlgmr.msra.gmra.mrb[4].mxu1 %vm619_vm0, %v815_v63  ;;  %v1083_v63 = vsel %vm4478_vm5, %v4413_v61, 0.0 }
 0x104   : > { %3632 = vmatprep.mubr.msk.f32.mxu1 %vm619_vm0, %v816_v0  ;;  %3908 = vmatpush3.bf16.msra.mxu1 %v4402_v56  ;;  %v1084_v0 = vsel %vm4478_vm5, %v4419_v62, 0.0 }
 0x105   : > { %3910 = vmatprep.subr.bf16.mxu1 %v4400_v55 }
 0x107   : > { %3633 = vmatmul.mubr.msk.f32.gmra.mrb[6].mxu1 %vm619_vm0, %v817_v1 }
 0x108   : > { %3912 = vmatpush3.bf16.msra.mxu1 %v4400_v55 }
 0x109   : > { %3915 = vmatprep.subr.msk.bf16.mxu1 %vm4378_vm2, %v4385_v45 }
 0x1d6   : > { %v3631_v3 = vpop.f32.mrb[4].mxu1 }
 0x1d7   : > { %v908_v5 = vpop.f32.mrb[5].mxu1  ;;  %v914_v8 = vadd.f32 %v3631_v3, %v4450_v4 }
 0x1d8   : > { %v909_v6 = vadd.f32 %v908_v5, %v4447_v2 }
 0x1d9   : > { %v930_v16 = vsel %vm619_vm0, %v914_v8, -inf }
 0x1da   : > { %v3634_v9 = vpop.f32.mrb[6].mxu1  ;;  %v927_v10 = vsel %vm619_vm0, %v909_v6, -inf }
 0x1db   : > { %v918_v12 = vpop.f32.mrb[7].mxu1  ;;  %928 = vmax.xlane.f32.xlu0 %v927_v10  ;;  %v924_v14 = vadd.f32 %v3634_v9, %v4459_v11 }
 0x1dc   : > { %v919_v13 = vadd.f32 %v918_v12, %v4454_v7 }
 0x1dd   : > { %v936_v17 = vsel %vm619_vm0, %v924_v14, -inf }
 0x1de   : > { %v933_v15 = vsel %vm619_vm0, %v919_v13, -inf }
 0x1df   : > { %934 = vmax.xlane.f32.xlu1 %v933_v15  ;;  %931 = vmax.xlane.f32.xlu0 %v930_v16 }
 0x1e3   : > { %937 = vmax.xlane.f32.xlu1 %v936_v17 }
 0x268   : > { %v929_v18 = vpop.xlane.xlu0 %928 }
 0x269   : > { %v939_v19 = vsub.f32 %v909_v6, %v929_v18 }
 0x26b   : > { %v943_v20 = vmul.f32 1.442695, %v939_v19 }
 0x26c   : > { %v935_v21 = vpop.xlane.xlu1 %934  ;;  %v932_v22 = vpop.xlane.xlu0 %931 }
 0x26d   : > { %4041 = vpow2.f32 %v943_v20  ;;  %v941_v23 = vsub.f32 %v919_v13, %v935_v21  ;;  %v940_v24 = vsub.f32 %v914_v8, %v932_v22 }
 0x26f   : > { %v947_v25 = vmul.f32 1.442695, %v941_v23  ;;  %v945_v27 = vmul.f32 1.442695, %v940_v24 }
 0x270   : > { %v938_v28 = vpop.xlane.xlu1 %937 }
 0x271   : > { %4043 = vpow2.f32 %v947_v25  ;;  %v942_v29 = vsub.f32 %v924_v14, %v938_v28 }
 0x272   : > { %4045 = vpow2.f32 %v945_v27 }
 0x273   : > { %v949_v30 = vmul.f32 1.442695, %v942_v29 }
 0x275   : > { %4047 = vpow2.f32 %v949_v30 }
 0x277   : > { %v4042_v31 = vpop.eup %4041 }
 0x278   : > { %v951_v32 = vsel %vm619_vm0, %v4042_v31, 0.0 }
 0x279   : > { %952 = vadd.xlane.f32.xlu0 %v951_v32 }
 0x27b   : > { %v4044_v33 = vpop.eup %4043 }
 0x27c   : > { %v4046_v34 = vpop.eup %4045  ;;  %v957_v35 = vsel %vm619_vm0, %v4044_v33, 0.0 }
 0x27d   : > { %958 = vadd.xlane.f32.xlu0 %v957_v35  ;;  %v954_v36 = vsel %vm619_vm0, %v4046_v34, 0.0 }
 0x27e   : > { %955 = vadd.xlane.f32.xlu1 %v954_v36 }
 0x27f   : > { %v4048_v37 = vpop.eup %4047 }
 0x280   : > { %v960_v38 = vsel %vm619_vm0, %v4048_v37, 0.0 }
 0x282   : > { %961 = vadd.xlane.f32.xlu1 %v960_v38 }
 0x306   : > { %v953_v40 = vpop.xlane.xlu0 %952 }
 0x307   : > { %4049 = vrcp.f32 %v953_v40 }
 0x30a   : > { %v959_v41 = vpop.xlane.xlu0 %958 }
 0x30b   : > { %v956_v44 = vpop.xlane.xlu1 %955  ;;  %4051 = vrcp.f32 %v959_v41 }
 0x30c   : > { %4053 = vrcp.f32 %v956_v44 }
 0x30f   : > { %v962_v46 = vpop.xlane.xlu1 %961 }
 0x310   : > { %4055 = vrcp.f32 %v962_v46 }
 0x311   : > { %v4050_v47 = vpop.eup %4049 }
 0x312   : > { %v967_v48 = vmul.f32 %v4050_v47, %v4042_v31 }
 0x314   : > { %3643 = vmatprep.mubr.msk.f32.mxu0 %vm619_vm0, %v967_v48 }
 0x315   : > { %v4052_v49 = vpop.eup %4051 }
 0x316   : > { %v4054_v50 = vpop.eup %4053  ;;  %v969_v51 = vmul.f32 %v4052_v49, %v4044_v33 }
 0x317   : > { %v968_v52 = vmul.f32 %v4054_v50, %v4046_v34 }
 0x319   : > { %3644 = vmatmul.mubr.msk.f32.vlgmr.msra.gmra.mrb[8].mxu0 %vm619_vm0, %v968_v52 }
 0x31a   : > { %v4056_v53 = vpop.eup %4055  ;;  %3898 = vmatpush3.bf16.xpose.msk.msra.mxu0 %vm4378_vm2, %v4385_v45  ;;  %3646 = vmatprep.mubr.msk.f32.mxu0 %vm619_vm0, %v969_v51 }
 0x31b   : > { %3901 = vmatprep.subr.msk.bf16.mxu0 %vm4378_vm2, %v4374_v42  ;;  %v970_v57 = vmul.f32 %v4056_v53, %v4048_v37 }
 0x31d   : > { %3647 = vmatmul.mubr.msk.f32.gmra.mrb[10].mxu0 %vm619_vm0, %v970_v57 }
 0x31e   : > { %3657 = vmatprep.mubr.msk.f32.mxu0 %vm619_vm0, %v1081_v58 }
 0x322   : > { %3904 = vmatpush3.bf16.xpose.msk.msra.mxu0 %vm4378_vm2, %v4374_v42 }
 0x323   : > { %3926 = vmatprep.subr.bf16.mxu0 %v4402_v56 }
 0x329   : > { %3658 = vmatmul.mubr.msk.f32.vlgmr.msra.gmra.mrb[12].mxu0 %vm619_vm0, %v1082_v59 }
 0x32a   : > { %3660 = vmatprep.mubr.msk.f32.mxu0 %vm619_vm0, %v1083_v63  ;;  %3928 = vmatpush3.bf16.msra.mxu0 %v4402_v56 }
 0x32b   : > { %3930 = vmatprep.subr.bf16.mxu0 %v4400_v55 }
 0x32d   : > { %3661 = vmatmul.mubr.msk.f32.gmra.mrb[14].mxu0 %vm619_vm0, %v1084_v0 }
 0x32e   : > { %3932 = vmatpush3.bf16.msra.mxu0 %v4400_v55 }
 0x32f   : > { %3935 = vmatprep.subr.msk.bf16.mxu0 %vm4378_vm2, %v4385_v45 }
 0x3ec   : > { %v4512_v1 = vpop.f32.mrb[8].mxu0 }
 0x3ed   : > { %v4514_v3 = vpop.f32.mrb[9].mxu0 }
 0x3f0   : > { %v4516_v5 = vpop.f32.mrb[10].mxu0 }
 0x3f1   : > { %v4518_v6 = vpop.f32.mrb[11].mxu0 }
 0x3fc   : > { %v3659_v8 = vpop.f32.mrb[12].mxu0 }
 0x3fd   : > { %v1169_v9 = vadd.f32 %v3659_v8, %v4450_v4  ;;  %v1163_v10 = vpop.f32.mrb[13].mxu0  ;;  %v1336_v8 = vsel %vm4539_vm8, %v4372_v39, 0.0 }
 0x3fe   : > { %v1164_v12 = vadd.f32 %v1163_v10, %v4447_v2  ;;  %v1338_v10 = vsel %vm4539_vm8, %v4413_v61, 0.0 }
 0x3ff   : > { %v1185_v13 = vsel %vm619_vm0, %v1169_v9, -inf }
 0x400   : > { %1186 = vmax.xlane.f32.xlu1 %v1185_v13  ;;  %v3662_v14 = vpop.f32.mrb[14].mxu0  ;;  %v1182_v15 = vsel %vm619_vm0, %v1164_v12, -inf }
 0x401   : > { %v1179_v16 = vadd.f32 %v3662_v14, %v4459_v11  ;;  %v1173_v17 = vpop.f32.mrb[15].mxu0  ;;  %1183 = vmax.xlane.f32.xlu0 %v1182_v15  ;;  %v1069_v14 = vsel %vm810_vm1, %v4512_v1, 0.0  ;;  %v1071_v1 = vsel %vm810_vm1, %v4516_v5, 0.0 }
 0x402   : > { %v1174_v18 = vadd.f32 %v1173_v17, %v4454_v7  ;;  %v1068_v17 = vsel %vm810_vm1, %v4514_v3, 0.0  ;;  %v1070_v3 = vsel %vm810_vm1, %v4518_v6, 0.0  ;;  %vm2097_vm1 = vcmp.lt.s32.totalorder %v4366_v26, 24 }
 0x403   : > { %v1191_v19 = vsel %vm619_vm0, %v1179_v16, -inf  ;;  %vm4769_vm3 = vmand %vm2096_vm15, %vm2097_vm1 }
 0x404   : > { %1192 = vmax.xlane.f32.xlu1 %v1191_v19  ;;  %v1188_v20 = vsel %vm619_vm0, %v1174_v18, -inf }
 0x405   : > { %1189 = vmax.xlane.f32.xlu0 %v1188_v20 }
 0x48d   : > { %v1187_v21 = vpop.xlane.xlu1 %1186 }
 0x48e   : > { %v1195_v22 = vsub.f32 %v1169_v9, %v1187_v21  ;;  %v1184_v23 = vpop.xlane.xlu0 %1183  ;;  %v1337_v9 = vsel %vm4539_vm8, %v4411_v60, 0.0 }
 0x48f   : > { %v1194_v24 = vsub.f32 %v1164_v12, %v1184_v23  ;;  %v1339_v12 = vsel %vm4539_vm8, %v4419_v62, 0.0 }
 0x490   : > { %v1200_v25 = vmul.f32 1.442695, %v1195_v22 }
 0x491   : > { %v1198_v27 = vmul.f32 1.442695, %v1194_v24  ;;  %v1193_v28 = vpop.xlane.xlu1 %1192 }
 0x492   : > { %4057 = vpow2.f32 %v1200_v25  ;;  %v1197_v29 = vsub.f32 %v1179_v16, %v1193_v28  ;;  %v1190_v30 = vpop.xlane.xlu0 %1189 }
 0x493   : > { %4059 = vpow2.f32 %v1198_v27  ;;  %v1196_v31 = vsub.f32 %v1174_v18, %v1190_v30 }
 0x494   : > { %v1204_v32 = vmul.f32 1.442695, %v1197_v29 }
 0x495   : > { %v1202_v33 = vmul.f32 1.442695, %v1196_v31 }
 0x496   : > { %4061 = vpow2.f32 %v1204_v32 }
 0x497   : > { %4063 = vpow2.f32 %v1202_v33 }
 0x49c   : > { %v4058_v34 = vpop.eup %4057 }
 0x49d   : > { %v4060_v35 = vpop.eup %4059  ;;  %v1209_v36 = vsel %vm619_vm0, %v4058_v34, 0.0 }
 0x49e   : > { %1210 = vadd.xlane.f32.xlu1 %v1209_v36  ;;  %v1206_v37 = vsel %vm619_vm0, %v4060_v35, 0.0 }
 0x49f   : > { %1207 = vadd.xlane.f32.xlu0 %v1206_v37 }
 0x4a0   : > { %v4062_v38 = vpop.eup %4061 }
 0x4a1   : > { %v4064_v40 = vpop.eup %4063  ;;  %v1215_v41 = vsel %vm619_vm0, %v4062_v38, 0.0 }
 0x4a2   : > { %1216 = vadd.xlane.f32.xlu1 %v1215_v41  ;;  %v1212_v44 = vsel %vm619_vm0, %v4064_v40, 0.0 }
 0x4a3   : > { %1213 = vadd.xlane.f32.xlu0 %v1212_v44 }
 0x52b   : > { %v1211_v46 = vpop.xlane.xlu1 %1210 }
 0x52c   : > { %4065 = vrcp.f32 %v1211_v46  ;;  %v1208_v47 = vpop.xlane.xlu0 %1207 }
 0x52d   : > { %4067 = vrcp.f32 %v1208_v47 }
 0x52f   : > { %v1217_v48 = vpop.xlane.xlu1 %1216 }
 0x530   : > { %4069 = vrcp.f32 %v1217_v48  ;;  %v1214_v49 = vpop.xlane.xlu0 %1213 }
 0x531   : > { %4071 = vrcp.f32 %v1214_v49 }
 0x536   : > { %v4066_v50 = vpop.eup %4065 }
 0x537   : > { %v4068_v51 = vpop.eup %4067  ;;  %v1223_v53 = vmul.f32 %v4066_v50, %v4058_v34 }
 0x538   : > { %v1222_v52 = vmul.f32 %v4068_v51, %v4060_v35 }
 0x53a   : > { %v4070_v57 = vpop.eup %4069  ;;  %3671 = vmatprep.mubr.msk.f32.mxu1 %vm619_vm0, %v1222_v52 }
 0x53b   : > { %v4072_v58 = vpop.eup %4071  ;;  %3672 = vmatmul.mubr.msk.f32.vlgmr.msra.gmra.mrb[8].mxu1 %vm619_vm0, %v1223_v53  ;;  %v1225_v0 = vmul.f32 %v4070_v57, %v4062_v38 }
 0x53c   : > { %3918 = vmatpush3.bf16.xpose.msk.msra.mxu1 %vm4378_vm2, %v4385_v45  ;;  %v1224_v59 = vmul.f32 %v4072_v58, %v4064_v40 }
 0x53d   : > { %3921 = vmatprep.subr.msk.bf16.mxu1 %vm4378_vm2, %v4374_v42 }
 0x53e   : > { %3674 = vmatprep.mubr.msk.f32.mxu1 %vm619_vm0, %v1224_v59 }
 0x53f   : > { %3675 = vmatmul.mubr.msk.f32.gmra.mrb[10].mxu1 %vm619_vm0, %v1225_v0 }
 0x540   : > { %3685 = vmatprep.mubr.msk.f32.mxu1 %vm619_vm0, %v1336_v8 }
 0x544   : > { %3924 = vmatpush3.bf16.xpose.msk.msra.mxu1 %vm4378_vm2, %v4374_v42 }
 0x545   : > { %3946 = vmatprep.subr.bf16.mxu1 %v4402_v56 }
 0x54b   : > { %3686 = vmatmul.mubr.msk.f32.vlgmr.msra.gmra.mrb[12].mxu1 %vm619_vm0, %v1337_v9 }
 0x54c   : > { %3688 = vmatprep.mubr.msk.f32.mxu1 %vm619_vm0, %v1338_v10  ;;  %3948 = vmatpush3.bf16.msra.mxu1 %v4402_v56 }
 0x54d   : > { %3950 = vmatprep.subr.bf16.mxu1 %v4400_v55 }
 0x54f   : > { %3689 = vmatmul.mubr.msk.f32.gmra.mrb[14].mxu1 %vm619_vm0, %v1339_v12 }
 0x550   : > { %3952 = vmatpush3.bf16.msra.mxu1 %v4400_v55 }
 0x551   : > { %3955 = vmatprep.subr.msk.bf16.mxu1 %vm4378_vm2, %v4385_v45 }
 0x60e   : > { %v3673_v13 = vpop.f32.mrb[8].mxu1 }
 0x60f   : > { %v1324_v15 = vsel %vm4478_vm5, %v3673_v13, 0.0  ;;  %v1304_v16 = vpop.f32.mrb[9].mxu1 }
 0x610   : > { %v4582_v18 = vadd.f32 %v1324_v15, %v1069_v14  ;;  %v1323_v19 = vsel %vm4478_vm5, %v1304_v16, 0.0 }
 0x611   : > { %v4586_v20 = vadd.f32 %v1323_v19, %v1068_v17 }
 0x612   : > { %v3676_v21 = vpop.f32.mrb[10].mxu1 }
 0x613   : > { %v1326_v22 = vsel %vm4478_vm5, %v3676_v21, 0.0  ;;  %v1314_v23 = vpop.f32.mrb[11].mxu1 }
 0x614   : > { %v4596_v24 = vadd.f32 %v1326_v22, %v1071_v1  ;;  %v1325_v25 = vsel %vm4478_vm5, %v1314_v23, 0.0  ;;  %vm2352_vm5 = vcmp.lt.s32.totalorder %v4366_v26, 28 }
 0x615   : > { %v4600_v27 = vadd.f32 %v1325_v25, %v1070_v3  ;;  %vm4843_vm6 = vmand %vm2351_vm4, %vm2352_vm5 }
 0x61e   : > { %v3687_v28 = vpop.f32.mrb[12].mxu1 }
 0x61f   : > { %v1424_v29 = vadd.f32 %v3687_v28, %v4450_v4  ;;  %v1418_v30 = vpop.f32.mrb[13].mxu1  ;;  %v1591_v28 = vsel %vm4621_vm11, %v4372_v39, 0.0 }
 0x620   : > { %v1419_v5 = vadd.f32 %v1418_v30, %v4447_v2  ;;  %v1593_v30 = vsel %vm4621_vm11, %v4413_v61, 0.0 }
 0x621   : > { %v1440_v31 = vsel %vm619_vm0, %v1424_v29, -inf }
 0x622   : > { %1441 = vmax.xlane.f32.xlu1 %v1440_v31  ;;  %v3690_v32 = vpop.f32.mrb[14].mxu1  ;;  %v1437_v33 = vsel %vm619_vm0, %v1419_v5, -inf }
 0x623   : > { %v1434_v6 = vadd.f32 %v3690_v32, %v4459_v11  ;;  %v1428_v34 = vpop.f32.mrb[15].mxu1  ;;  %1438 = vmax.xlane.f32.xlu0 %v1437_v33 }
 0x624   : > { %v1429_v54 = vadd.f32 %v1428_v34, %v4454_v7 }
 0x625   : > { %v1446_v35 = vsel %vm619_vm0, %v1434_v6, -inf }
 0x626   : > { %1447 = vmax.xlane.f32.xlu1 %v1446_v35  ;;  %v1443_v36 = vsel %vm619_vm0, %v1429_v54, -inf }
 0x627   : > { %1444 = vmax.xlane.f32.xlu0 %v1443_v36 }
 0x6af   : > { %v1442_v37 = vpop.xlane.xlu1 %1441 }
 0x6b0   : > { %v1450_v38 = vsub.f32 %v1424_v29, %v1442_v37  ;;  %v1439_v40 = vpop.xlane.xlu0 %1438  ;;  %v1592_v29 = vsel %vm4621_vm11, %v4411_v60, 0.0 }
 0x6b1   : > { %v1449_v41 = vsub.f32 %v1419_v5, %v1439_v40  ;;  %v1594_v5 = vsel %vm4621_vm11, %v4419_v62, 0.0 }
 0x6b2   : > { %v1455_v44 = vmul.f32 1.442695, %v1450_v38 }
 0x6b3   : > { %v1453_v46 = vmul.f32 1.442695, %v1449_v41  ;;  %v1448_v47 = vpop.xlane.xlu1 %1447 }
 0x6b4   : > { %4073 = vpow2.f32 %v1455_v44  ;;  %v1452_v48 = vsub.f32 %v1434_v6, %v1448_v47  ;;  %v1445_v49 = vpop.xlane.xlu0 %1444 }
 0x6b5   : > { %4075 = vpow2.f32 %v1453_v46  ;;  %v1451_v50 = vsub.f32 %v1429_v54, %v1445_v49 }
 0x6b6   : > { %v1459_v51 = vmul.f32 1.442695, %v1452_v48 }
 0x6b7   : > { %v1457_v52 = vmul.f32 1.442695, %v1451_v50 }
 0x6b8   : > { %4077 = vpow2.f32 %v1459_v51 }
 0x6b9   : > { %4079 = vpow2.f32 %v1457_v52 }
 0x6be   : > { %v4074_v53 = vpop.eup %4073 }
 0x6bf   : > { %v4076_v57 = vpop.eup %4075  ;;  %v1464_v58 = vsel %vm619_vm0, %v4074_v53, 0.0 }
 0x6c0   : > { %1465 = vadd.xlane.f32.xlu1 %v1464_v58  ;;  %v1461_v59 = vsel %vm619_vm0, %v4076_v57, 0.0 }
 0x6c1   : > { %1462 = vadd.xlane.f32.xlu0 %v1461_v59 }
 0x6c2   : > { %v4078_v0 = vpop.eup %4077 }
 0x6c3   : > { %v4080_v8 = vpop.eup %4079  ;;  %v1470_v9 = vsel %vm619_vm0, %v4078_v0, 0.0 }
 0x6c4   : > { %1471 = vadd.xlane.f32.xlu1 %v1470_v9  ;;  %v1467_v10 = vsel %vm619_vm0, %v4080_v8, 0.0 }
 0x6c5   : > { %1468 = vadd.xlane.f32.xlu0 %v1467_v10 }
 0x74d   : > { %v1466_v12 = vpop.xlane.xlu1 %1465 }
 0x74e   : > { %4081 = vrcp.f32 %v1466_v12  ;;  %v1463_v13 = vpop.xlane.xlu0 %1462 }
 0x74f   : > { %4083 = vrcp.f32 %v1463_v13 }
 0x751   : > { %v1472_v14 = vpop.xlane.xlu1 %1471 }
 0x752   : > { %4085 = vrcp.f32 %v1472_v14  ;;  %v1469_v15 = vpop.xlane.xlu0 %1468 }
 0x753   : > { %4087 = vrcp.f32 %v1469_v15 }
 0x758   : > { %v4082_v16 = vpop.eup %4081 }
 0x759   : > { %v4084_v17 = vpop.eup %4083  ;;  %v1478_v21 = vmul.f32 %v4082_v16, %v4074_v53 }
 0x75a   : > { %v1477_v19 = vmul.f32 %v4084_v17, %v4076_v57 }
 0x75c   : > { %v4086_v1 = vpop.eup %4085  ;;  %3699 = vmatprep.mubr.msk.f32.mxu0 %vm619_vm0, %v1477_v19 }
 0x75d   : > { %v4088_v22 = vpop.eup %4087  ;;  %3700 = vmatmul.mubr.msk.f32.vlgmr.msra.gmra.mrb[16].mxu0 %vm619_vm0, %v1478_v21  ;;  %v1480_v25 = vmul.f32 %v4086_v1, %v4078_v0 }
 0x75e   : > { %3938 = vmatpush3.bf16.xpose.msk.msra.mxu0 %vm4378_vm2, %v4385_v45  ;;  %v1479_v23 = vmul.f32 %v4088_v22, %v4080_v8 }
 0x75f   : > { %3941 = vmatprep.subr.msk.bf16.mxu0 %vm4378_vm2, %v4374_v42 }
 0x760   : > { %3702 = vmatprep.mubr.msk.f32.mxu0 %vm619_vm0, %v1479_v23 }
 0x761   : > { %3703 = vmatmul.mubr.msk.f32.gmra.mrb[18].mxu0 %vm619_vm0, %v1480_v25 }
 0x762   : > { %3713 = vmatprep.mubr.msk.f32.mxu0 %vm619_vm0, %v1591_v28 }
 0x766   : > { %3944 = vmatpush3.bf16.xpose.msk.msra.mxu0 %vm4378_vm2, %v4374_v42 }
 0x767   : > { %3966 = vmatprep.subr.bf16.mxu0 %v4402_v56 }
 0x76d   : > { %3714 = vmatmul.mubr.msk.f32.vlgmr.msra.gmra.mrb[20].mxu0 %vm619_vm0, %v1592_v29 }
 0x76e   : > { %3716 = vmatprep.mubr.msk.f32.mxu0 %vm619_vm0, %v1593_v30  ;;  %3968 = vmatpush3.bf16.msra.mxu0 %v4402_v56 }
 0x76f   : > { %3970 = vmatprep.subr.bf16.mxu0 %v4400_v55 }
 0x771   : > { %3717 = vmatmul.mubr.msk.f32.gmra.mrb[22].mxu0 %vm619_vm0, %v1594_v5 }
 0x772   : > { %3972 = vmatpush3.bf16.msra.mxu0 %v4400_v55 }
 0x773   : > { %3975 = vmatprep.subr.msk.bf16.mxu0 %vm4378_vm2, %v4385_v45 }
 0x830   : > { %v3701_v31 = vpop.f32.mrb[16].mxu0 }
 0x831   : > { %v1579_v32 = vsel %vm4539_vm8, %v3701_v31, 0.0  ;;  %v1559_v33 = vpop.f32.mrb[17].mxu0 }
 0x832   : > { %v4659_v6 = vadd.f32 %v1579_v32, %v4582_v18  ;;  %v1578_v34 = vsel %vm4539_vm8, %v1559_v33, 0.0 }
 0x833   : > { %v4664_v54 = vadd.f32 %v1578_v34, %v4586_v20 }
 0x834   : > { %v3704_v35 = vpop.f32.mrb[18].mxu0 }
 0x835   : > { %v1581_v36 = vsel %vm4539_vm8, %v3704_v35, 0.0  ;;  %v1569_v37 = vpop.f32.mrb[19].mxu0 }
 0x836   : > { %v4669_v38 = vadd.f32 %v1581_v36, %v4596_v24  ;;  %v1580_v40 = vsel %vm4539_vm8, %v1569_v37, 0.0  ;;  %vm2607_vm8 = vcmp.lt.s32.totalorder %v4366_v26, 32 }
 0x837   : > { %v4674_v18 = vadd.f32 %v1580_v40, %v4600_v27  ;;  %vm4926_vm9 = vmand %vm2606_vm7, %vm2607_vm8 }
 0x840   : > { %v3715_v41 = vpop.f32.mrb[20].mxu0 }
 0x841   : > { %v1679_v44 = vadd.f32 %v3715_v41, %v4450_v4  ;;  %v1673_v46 = vpop.f32.mrb[21].mxu0  ;;  %v1846_v41 = vsel %vm4695_vm14, %v4372_v39, 0.0 }
 0x842   : > { %v1674_v20 = vadd.f32 %v1673_v46, %v4447_v2  ;;  %v1848_v46 = vsel %vm4695_vm14, %v4413_v61, 0.0 }
 0x843   : > { %v1695_v47 = vsel %vm619_vm0, %v1679_v44, -inf }
 0x844   : > { %1696 = vmax.xlane.f32.xlu1 %v1695_v47  ;;  %v3718_v48 = vpop.f32.mrb[22].mxu0  ;;  %v1692_v49 = vsel %vm619_vm0, %v1674_v20, -inf }
 0x845   : > { %v1689_v24 = vadd.f32 %v3718_v48, %v4459_v11  ;;  %v1683_v50 = vpop.f32.mrb[23].mxu0  ;;  %1693 = vmax.xlane.f32.xlu0 %v1692_v49 }
 0x846   : > { %v1684_v63 = vadd.f32 %v1683_v50, %v4454_v7 }
 0x847   : > { %v1701_v27 = vsel %vm619_vm0, %v1689_v24, -inf }
 0x848   : > { %1702 = vmax.xlane.f32.xlu1 %v1701_v27  ;;  %v1698_v51 = vsel %vm619_vm0, %v1684_v63, -inf }
 0x849   : > { %1699 = vmax.xlane.f32.xlu0 %v1698_v51 }
 0x8d1   : > { %v1697_v52 = vpop.xlane.xlu1 %1696 }
 0x8d2   : > { %v1705_v53 = vsub.f32 %v1679_v44, %v1697_v52  ;;  %v1694_v57 = vpop.xlane.xlu0 %1693  ;;  %v1847_v44 = vsel %vm4695_vm14, %v4411_v60, 0.0 }
 0x8d3   : > { %v1704_v58 = vsub.f32 %v1674_v20, %v1694_v57  ;;  %v1849_v20 = vsel %vm4695_vm14, %v4419_v62, 0.0 }
 0x8d4   : > { %v1710_v59 = vmul.f32 1.442695, %v1705_v53 }
 0x8d5   : > { %v1708_v0 = vmul.f32 1.442695, %v1704_v58  ;;  %v1703_v8 = vpop.xlane.xlu1 %1702 }
 0x8d6   : > { %4089 = vpow2.f32 %v1710_v59  ;;  %v1707_v9 = vsub.f32 %v1689_v24, %v1703_v8  ;;  %v1700_v10 = vpop.xlane.xlu0 %1699 }
 0x8d7   : > { %4091 = vpow2.f32 %v1708_v0  ;;  %v1706_v12 = vsub.f32 %v1684_v63, %v1700_v10 }
 0x8d8   : > { %v1714_v13 = vmul.f32 1.442695, %v1707_v9 }
 0x8d9   : > { %v1712_v14 = vmul.f32 1.442695, %v1706_v12 }
 0x8da   : > { %4093 = vpow2.f32 %v1714_v13 }
 0x8db   : > { %4095 = vpow2.f32 %v1712_v14 }
 0x8e0   : > { %v4090_v15 = vpop.eup %4089 }
 0x8e1   : > { %v4092_v16 = vpop.eup %4091  ;;  %v1719_v17 = vsel %vm619_vm0, %v4090_v15, 0.0 }
 0x8e2   : > { %1720 = vadd.xlane.f32.xlu1 %v1719_v17  ;;  %v1716_v19 = vsel %vm619_vm0, %v4092_v16, 0.0 }
 0x8e3   : > { %1717 = vadd.xlane.f32.xlu0 %v1716_v19 }
 0x8e4   : > { %v4094_v21 = vpop.eup %4093 }
 0x8e5   : > { %v4096_v1 = vpop.eup %4095  ;;  %v1725_v22 = vsel %vm619_vm0, %v4094_v21, 0.0 }
 0x8e6   : > { %1726 = vadd.xlane.f32.xlu1 %v1725_v22  ;;  %v1722_v23 = vsel %vm619_vm0, %v4096_v1, 0.0 }
 0x8e7   : > { %1723 = vadd.xlane.f32.xlu0 %v1722_v23 }
 0x96f   : > { %v1721_v25 = vpop.xlane.xlu1 %1720 }
 0x970   : > { %4097 = vrcp.f32 %v1721_v25  ;;  %v1718_v28 = vpop.xlane.xlu0 %1717 }
 0x971   : > { %4099 = vrcp.f32 %v1718_v28 }
 0x973   : > { %v1727_v29 = vpop.xlane.xlu1 %1726 }
 0x974   : > { %4101 = vrcp.f32 %v1727_v29  ;;  %v1724_v30 = vpop.xlane.xlu0 %1723 }
 0x975   : > { %4103 = vrcp.f32 %v1724_v30 }
 0x97a   : > { %v4098_v5 = vpop.eup %4097 }
 0x97b   : > { %v4100_v31 = vpop.eup %4099  ;;  %v1733_v33 = vmul.f32 %v4098_v5, %v4090_v15 }
 0x97c   : > { %v1732_v32 = vmul.f32 %v4100_v31, %v4092_v16 }
 0x97e   : > { %v4102_v34 = vpop.eup %4101  ;;  %3727 = vmatprep.mubr.msk.f32.mxu1 %vm619_vm0, %v1732_v32 }
 0x97f   : > { %v4104_v35 = vpop.eup %4103  ;;  %3728 = vmatmul.mubr.msk.f32.vlgmr.msra.gmra.mrb[16].mxu1 %vm619_vm0, %v1733_v33  ;;  %v1735_v40 = vmul.f32 %v4102_v34, %v4094_v21 }
 0x980   : > { %3958 = vmatpush3.bf16.xpose.msk.msra.mxu1 %vm4378_vm2, %v4385_v45  ;;  %v1734_v36 = vmul.f32 %v4104_v35, %v4096_v1 }
 0x981   : > { %3961 = vmatprep.subr.msk.bf16.mxu1 %vm4378_vm2, %v4374_v42 }
 0x982   : > { %3730 = vmatprep.mubr.msk.f32.mxu1 %vm619_vm0, %v1734_v36 }
 0x983   : > { %3731 = vmatmul.mubr.msk.f32.gmra.mrb[18].mxu1 %vm619_vm0, %v1735_v40 }
 0x984   : > { %3741 = vmatprep.mubr.msk.f32.mxu1 %vm619_vm0, %v1846_v41 }
 0x988   : > { %3964 = vmatpush3.bf16.xpose.msk.msra.mxu1 %vm4378_vm2, %v4374_v42 }
 0x989   : > { %3986 = vmatprep.subr.bf16.mxu1 %v4402_v56 }
 0x98f   : > { %3742 = vmatmul.mubr.msk.f32.vlgmr.msra.gmra.mrb[20].mxu1 %vm619_vm0, %v1847_v44 }
 0x990   : > { %3744 = vmatprep.mubr.msk.f32.mxu1 %vm619_vm0, %v1848_v46  ;;  %3988 = vmatpush3.bf16.msra.mxu1 %v4402_v56 }
 0x991   : > { %3990 = vmatprep.subr.bf16.mxu1 %v4400_v55 }
 0x993   : > { %3745 = vmatmul.mubr.msk.f32.gmra.mrb[22].mxu1 %vm619_vm0, %v1849_v20 }
 0x994   : > { %3992 = vmatpush3.bf16.msra.mxu1 %v4400_v55 }
 0x995   : > { %3995 = vmatprep.subr.msk.bf16.mxu1 %vm4378_vm2, %v4385_v45 }
 0xa52   : > { %v3729_v47 = vpop.f32.mrb[16].mxu1 }
 0xa53   : > { %v1834_v48 = vsel %vm4621_vm11, %v3729_v47, 0.0  ;;  %v1814_v49 = vpop.f32.mrb[17].mxu1 }
 0xa54   : > { %v4733_v24 = vadd.f32 %v1834_v48, %v4659_v6  ;;  %v1833_v50 = vsel %vm4621_vm11, %v1814_v49, 0.0 }
 0xa55   : > { %v4738_v63 = vadd.f32 %v1833_v50, %v4664_v54 }
 0xa56   : > { %v3732_v27 = vpop.f32.mrb[18].mxu1 }
 0xa57   : > { %v1836_v51 = vsel %vm4621_vm11, %v3732_v27, 0.0  ;;  %v1824_v52 = vpop.f32.mrb[19].mxu1 }
 0xa58   : > { %v4743_v53 = vadd.f32 %v1836_v51, %v4669_v38  ;;  %v1835_v57 = vsel %vm4621_vm11, %v1824_v52, 0.0 }
 0xa59   : > { %v4748_v6 = vadd.f32 %v1835_v57, %v4674_v18 }
 0xa62   : > { %v3743_v58 = vpop.f32.mrb[20].mxu1 }
 0xa63   : > { %v1934_v59 = vadd.f32 %v3743_v58, %v4450_v4  ;;  %v1928_v0 = vpop.f32.mrb[21].mxu1  ;;  %v2101_v58 = vsel %vm4769_vm3, %v4372_v39, 0.0 }
 0xa64   : > { %v1929_v54 = vadd.f32 %v1928_v0, %v4447_v2  ;;  %v2103_v0 = vsel %vm4769_vm3, %v4413_v61, 0.0 }
 0xa65   : > { %v1950_v8 = vsel %vm619_vm0, %v1934_v59, -inf }
 0xa66   : > { %1951 = vmax.xlane.f32.xlu1 %v1950_v8  ;;  %v3746_v9 = vpop.f32.mrb[22].mxu1  ;;  %v1947_v10 = vsel %vm619_vm0, %v1929_v54, -inf }
 0xa67   : > { %v1944_v38 = vadd.f32 %v3746_v9, %v4459_v11  ;;  %v1938_v12 = vpop.f32.mrb[23].mxu1  ;;  %1948 = vmax.xlane.f32.xlu0 %v1947_v10 }
 0xa68   : > { %v1939_v3 = vadd.f32 %v1938_v12, %v4454_v7 }
 0xa69   : > { %v1956_v18 = vsel %vm619_vm0, %v1944_v38, -inf }
 0xa6a   : > { %1957 = vmax.xlane.f32.xlu1 %v1956_v18  ;;  %v1953_v13 = vsel %vm619_vm0, %v1939_v3, -inf }
 0xa6b   : > { %1954 = vmax.xlane.f32.xlu0 %v1953_v13 }
 0xaf3   : > { %v1952_v14 = vpop.xlane.xlu1 %1951 }
 0xaf4   : > { %v1960_v15 = vsub.f32 %v1934_v59, %v1952_v14  ;;  %v1949_v16 = vpop.xlane.xlu0 %1948  ;;  %v2102_v59 = vsel %vm4769_vm3, %v4411_v60, 0.0 }
 0xaf5   : > { %v1959_v17 = vsub.f32 %v1929_v54, %v1949_v16  ;;  %v2104_v54 = vsel %vm4769_vm3, %v4419_v62, 0.0 }
 0xaf6   : > { %v1965_v19 = vmul.f32 1.442695, %v1960_v15 }
 0xaf7   : > { %v1963_v21 = vmul.f32 1.442695, %v1959_v17  ;;  %v1958_v1 = vpop.xlane.xlu1 %1957 }
 0xaf8   : > { %4105 = vpow2.f32 %v1965_v19  ;;  %v1962_v22 = vsub.f32 %v1944_v38, %v1958_v1  ;;  %v1955_v23 = vpop.xlane.xlu0 %1954 }
 0xaf9   : > { %4107 = vpow2.f32 %v1963_v21  ;;  %v1961_v25 = vsub.f32 %v1939_v3, %v1955_v23 }
 0xafa   : > { %v1969_v28 = vmul.f32 1.442695, %v1962_v22 }
 0xafb   : > { %v1967_v29 = vmul.f32 1.442695, %v1961_v25 }
 0xafc   : > { %4109 = vpow2.f32 %v1969_v28 }
 0xafd   : > { %4111 = vpow2.f32 %v1967_v29 }
 0xb02   : > { %v4106_v30 = vpop.eup %4105 }
 0xb03   : > { %v4108_v5 = vpop.eup %4107  ;;  %v1974_v31 = vsel %vm619_vm0, %v4106_v30, 0.0 }
 0xb04   : > { %1975 = vadd.xlane.f32.xlu1 %v1974_v31  ;;  %v1971_v32 = vsel %vm619_vm0, %v4108_v5, 0.0 }
 0xb05   : > { %1972 = vadd.xlane.f32.xlu0 %v1971_v32 }
 0xb06   : > { %v4110_v33 = vpop.eup %4109 }
 0xb07   : > { %v4112_v34 = vpop.eup %4111  ;;  %v1980_v35 = vsel %vm619_vm0, %v4110_v33, 0.0 }
 0xb08   : > { %1981 = vadd.xlane.f32.xlu1 %v1980_v35  ;;  %v1977_v36 = vsel %vm619_vm0, %v4112_v34, 0.0 }
 0xb09   : > { %1978 = vadd.xlane.f32.xlu0 %v1977_v36 }
 0xb91   : > { %v1976_v40 = vpop.xlane.xlu1 %1975 }
 0xb92   : > { %4113 = vrcp.f32 %v1976_v40  ;;  %v1973_v41 = vpop.xlane.xlu0 %1972 }
 0xb93   : > { %4115 = vrcp.f32 %v1973_v41 }
 0xb95   : > { %v1982_v44 = vpop.xlane.xlu1 %1981 }
 0xb96   : > { %4117 = vrcp.f32 %v1982_v44  ;;  %v1979_v46 = vpop.xlane.xlu0 %1978 }
 0xb97   : > { %4119 = vrcp.f32 %v1979_v46 }
 0xb9c   : > { %v4114_v20 = vpop.eup %4113 }
 0xb9d   : > { %v4116_v47 = vpop.eup %4115  ;;  %v1988_v49 = vmul.f32 %v4114_v20, %v4106_v30 }
 0xb9e   : > { %v1987_v48 = vmul.f32 %v4116_v47, %v4108_v5 }
 0xba0   : > { %v4118_v50 = vpop.eup %4117  ;;  %3755 = vmatprep.mubr.msk.f32.mxu0 %vm619_vm0, %v1987_v48 }
 0xba1   : > { %v4120_v27 = vpop.eup %4119  ;;  %3756 = vmatmul.mubr.msk.f32.vlgmr.msra.gmra.mrb[24].mxu0 %vm619_vm0, %v1988_v49  ;;  %v1990_v57 = vmul.f32 %v4118_v50, %v4110_v33 }
 0xba2   : > { %3978 = vmatpush3.bf16.xpose.msk.msra.mxu0 %vm4378_vm2, %v4385_v45  ;;  %v1989_v51 = vmul.f32 %v4120_v27, %v4112_v34 }
 0xba3   : > { %3981 = vmatprep.subr.msk.bf16.mxu0 %vm4378_vm2, %v4374_v42 }
 0xba4   : > { %3758 = vmatprep.mubr.msk.f32.mxu0 %vm619_vm0, %v1989_v51 }
 0xba5   : > { %3759 = vmatmul.mubr.msk.f32.gmra.mrb[26].mxu0 %vm619_vm0, %v1990_v57 }
 0xba6   : > { %3769 = vmatprep.mubr.msk.f32.mxu0 %vm619_vm0, %v2101_v58 }
 0xbaa   : > { %3984 = vmatpush3.bf16.xpose.msk.msra.mxu0 %vm4378_vm2, %v4374_v42 }
 0xbab   : > { %4006 = vmatprep.subr.bf16.mxu0 %v4402_v56 }
 0xbb1   : > { %3770 = vmatmul.mubr.msk.f32.vlgmr.msra.gmra.mrb[28].mxu0 %vm619_vm0, %v2102_v59 }
 0xbb2   : > { %3772 = vmatprep.mubr.msk.f32.mxu0 %vm619_vm0, %v2103_v0  ;;  %4008 = vmatpush3.bf16.msra.mxu0 %v4402_v56 }
 0xbb3   : > { %4010 = vmatprep.subr.bf16.mxu0 %v4400_v55 }
 0xbb5   : > { %3773 = vmatmul.mubr.msk.f32.gmra.mrb[30].mxu0 %vm619_vm0, %v2104_v54 }
 0xbb6   : > { %4012 = vmatpush3.bf16.msra.mxu0 %v4400_v55 }
 0xbb7   : > { %4015 = vmatprep.subr.msk.bf16.mxu0 %vm4378_vm2, %v4385_v45 }
 0xc74   : > { %v3757_v8 = vpop.f32.mrb[24].mxu0 }
 0xc75   : > { %v2089_v9 = vsel %vm4695_vm14, %v3757_v8, 0.0  ;;  %v2069_v10 = vpop.f32.mrb[25].mxu0 }
 0xc76   : > { %v4807_v38 = vadd.f32 %v2089_v9, %v4733_v24  ;;  %v2088_v12 = vsel %vm4695_vm14, %v2069_v10, 0.0 }
 0xc77   : > { %v4812_v3 = vadd.f32 %v2088_v12, %v4738_v63 }
 0xc78   : > { %v3760_v18 = vpop.f32.mrb[26].mxu0 }
 0xc79   : > { %v2091_v13 = vsel %vm4695_vm14, %v3760_v18, 0.0  ;;  %v2079_v14 = vpop.f32.mrb[27].mxu0  ;;  %v2356_v18 = vsel %vm4843_vm6, %v4372_v39, 0.0 }
 0xc7a   : > { %v4817_v15 = vadd.f32 %v2091_v13, %v4743_v53  ;;  %v2090_v16 = vsel %vm4695_vm14, %v2079_v14, 0.0  ;;  %v2357_v13 = vsel %vm4843_vm6, %v4411_v60, 0.0  ;;  %v2358_v14 = vsel %vm4843_vm6, %v4413_v61, 0.0 }
 0xc7b   : > { %v4822_v24 = vadd.f32 %v2090_v16, %v4748_v6  ;;  %v2359_v16 = vsel %vm4843_vm6, %v4419_v62, 0.0 }
 0xc84   : > { %v3771_v17 = vpop.f32.mrb[28].mxu0 }
 0xc85   : > { %v2189_v19 = vadd.f32 %v3771_v17, %v4450_v4  ;;  %v2183_v21 = vpop.f32.mrb[29].mxu0 }
 0xc86   : > { %v2184_v63 = vadd.f32 %v2183_v21, %v4447_v2 }
 0xc87   : > { %v2205_v1 = vsel %vm619_vm0, %v2189_v19, -inf }
 0xc88   : > { %2206 = vmax.xlane.f32.xlu1 %v2205_v1  ;;  %v3774_v22 = vpop.f32.mrb[30].mxu0  ;;  %v2202_v23 = vsel %vm619_vm0, %v2184_v63, -inf }
 0xc89   : > { %v2199_v53 = vadd.f32 %v3774_v22, %v4459_v11  ;;  %v2193_v25 = vpop.f32.mrb[31].mxu0  ;;  %2203 = vmax.xlane.f32.xlu0 %v2202_v23 }
 0xc8a   : > { %v2194_v37 = vadd.f32 %v2193_v25, %v4454_v7 }
 0xc8b   : > { %v2211_v6 = vsel %vm619_vm0, %v2199_v53, -inf }
 0xc8c   : > { %2212 = vmax.xlane.f32.xlu1 %v2211_v6  ;;  %v2208_v4 = vsel %vm619_vm0, %v2194_v37, -inf  ;;  %v4896_v6 = vld [vmem:[%s4444_s24 + $0x8] sm:$0xff] }
 0xc8d   : > { %2209 = vmax.xlane.f32.xlu0 %v2208_v4 }
 0xd15   : > { %v2207_v28 = vpop.xlane.xlu1 %2206 }
 0xd16   : > { %v2215_v2 = vsub.f32 %v2189_v19, %v2207_v28  ;;  %v2204_v29 = vpop.xlane.xlu0 %2203  ;;  %v4900_v28 = vld [vmem:[%s4444_s24] sm:$0xff] }
 0xd17   : > { %v2214_v30 = vsub.f32 %v2184_v63, %v2204_v29 }
 0xd18   : > { %v2220_v5 = vmul.f32 1.442695, %v2215_v2 }
 0xd19   : > { %v2218_v31 = vmul.f32 1.442695, %v2214_v30  ;;  %v2213_v32 = vpop.xlane.xlu1 %2212  ;;  %v4906_v30 = vld [vmem:[%s4444_s24 + $0x18] sm:$0xff] }
 0xd1a   : > { %4121 = vpow2.f32 %v2220_v5  ;;  %v2217_v33 = vsub.f32 %v2199_v53, %v2213_v32  ;;  %v2210_v11 = vpop.xlane.xlu0 %2209 }
 0xd1b   : > { %4123 = vpow2.f32 %v2218_v31  ;;  %v2216_v34 = vsub.f32 %v2194_v37, %v2210_v11  ;;  %v4910_v31 = vld [vmem:[%s4444_s24 + $0x10] sm:$0xff] }
 0xd1c   : > { %v2224_v35 = vmul.f32 1.442695, %v2217_v33 }
 0xd1d   : > { %v2222_v7 = vmul.f32 1.442695, %v2216_v34 }
 0xd1e   : > { %4125 = vpow2.f32 %v2224_v35 }
 0xd1f   : > { %4127 = vpow2.f32 %v2222_v7 }
 0xd24   : > { %v4122_v36 = vpop.eup %4121 }
 0xd25   : > { %v4124_v40 = vpop.eup %4123  ;;  %v2229_v41 = vsel %vm619_vm0, %v4122_v36, 0.0 }
 0xd26   : > { %2230 = vadd.xlane.f32.xlu1 %v2229_v41  ;;  %v2226_v44 = vsel %vm619_vm0, %v4124_v40, 0.0 }
 0xd27   : > { %2227 = vadd.xlane.f32.xlu0 %v2226_v44 }
 0xd28   : > { %v4126_v46 = vpop.eup %4125 }
 0xd29   : > { %v4128_v20 = vpop.eup %4127  ;;  %v2235_v47 = vsel %vm619_vm0, %v4126_v46, 0.0 }
 0xd2a   : > { %2236 = vadd.xlane.f32.xlu1 %v2235_v47  ;;  %v2232_v48 = vsel %vm619_vm0, %v4128_v20, 0.0 }
 0xd2b   : > { %2233 = vadd.xlane.f32.xlu0 %v2232_v48 }
 0xdb3   : > { %v2231_v49 = vpop.xlane.xlu1 %2230 }
 0xdb4   : > { %4129 = vrcp.f32 %v2231_v49  ;;  %v2228_v50 = vpop.xlane.xlu0 %2227 }
 0xdb5   : > { %4131 = vrcp.f32 %v2228_v50 }
 0xdb7   : > { %v2237_v27 = vpop.xlane.xlu1 %2236 }
 0xdb8   : > { %4133 = vrcp.f32 %v2237_v27  ;;  %v2234_v51 = vpop.xlane.xlu0 %2233 }
 0xdb9   : > { %4135 = vrcp.f32 %v2234_v51 }
 0xdbe   : > { %v4130_v57 = vpop.eup %4129 }
 0xdbf   : > { %v4132_v58 = vpop.eup %4131  ;;  %v2243_v0 = vmul.f32 %v4130_v57, %v4122_v36 }
 0xdc0   : > { %v2242_v59 = vmul.f32 %v4132_v58, %v4124_v40 }
 0xdc2   : > { %v4134_v54 = vpop.eup %4133  ;;  %3783 = vmatprep.mubr.msk.f32.mxu1 %vm619_vm0, %v2242_v59 }
 0xdc3   : > { %v4136_v8 = vpop.eup %4135  ;;  %3784 = vmatmul.mubr.msk.f32.vlgmr.msra.gmra.mrb[24].mxu1 %vm619_vm0, %v2243_v0  ;;  %v2245_v12 = vmul.f32 %v4134_v54, %v4126_v46 }
 0xdc4   : > { %3998 = vmatpush3.bf16.xpose.msk.msra.mxu1 %vm4378_vm2, %v4385_v45  ;;  %v2244_v9 = vmul.f32 %v4136_v8, %v4128_v20 }
 0xdc5   : > { %4001 = vmatprep.subr.msk.bf16.mxu1 %vm4378_vm2, %v4374_v42 }
 0xdc6   : > { %3786 = vmatprep.mubr.msk.f32.mxu1 %vm619_vm0, %v2244_v9 }
 0xdc7   : > { %3787 = vmatmul.mubr.msk.f32.gmra.mrb[26].mxu1 %vm619_vm0, %v2245_v12 }
 0xdc8   : > { %3797 = vmatprep.mubr.msk.f32.mxu1 %vm619_vm0, %v2356_v18 }
 0xdcc   : > { %4004 = vmatpush3.bf16.xpose.msk.msra.mxu1 %vm4378_vm2, %v4374_v42 }
 0xdcd   : > { %4026 = vmatprep.subr.bf16.mxu1 %v4402_v56 }
 0xdd3   : > { %3798 = vmatmul.mubr.msk.f32.vlgmr.msra.gmra.mrb[28].mxu1 %vm619_vm0, %v2357_v13 }
 0xdd4   : > { %3800 = vmatprep.mubr.msk.f32.mxu1 %vm619_vm0, %v2358_v14  ;;  %4028 = vmatpush3.bf16.msra.mxu1 %v4402_v56 }
 0xdd5   : > { %4030 = vmatprep.subr.bf16.mxu1 %v4400_v55 }
 0xdd7   : > { %3801 = vmatmul.mubr.msk.f32.gmra.mrb[30].mxu1 %vm619_vm0, %v2359_v16 }
 0xdd8   : > { %4032 = vmatpush3.bf16.msra.mxu1 %v4400_v55 }
 0xe96   : > { %v3785_v17 = vpop.f32.mrb[24].mxu1 }
 0xe97   : > { %v2344_v19 = vsel %vm4769_vm3, %v3785_v17, 0.0  ;;  %v2324_v21 = vpop.f32.mrb[25].mxu1 }
 0xe98   : > { %v4878_v63 = vadd.f32 %v2344_v19, %v4807_v38  ;;  %v2343_v56 = vsel %vm4769_vm3, %v2324_v21, 0.0 }
 0xe99   : > { %v4883_v1 = vadd.f32 %v2343_v56, %v4812_v3 }
 0xe9a   : > { %v3788_v22 = vpop.f32.mrb[26].mxu1 }
 0xe9b   : > { %v2346_v55 = vsel %vm4769_vm3, %v3788_v22, 0.0  ;;  %v2334_v23 = vpop.f32.mrb[27].mxu1 }
 0xe9c   : > { %v4888_v53 = vadd.f32 %v2346_v55, %v4817_v15  ;;  %v2345_v25 = vsel %vm4769_vm3, %v2334_v23, 0.0  ;;  %v2611_v55 = vsel %vm4926_vm9, %v4372_v39, 0.0  ;;  %v2613_v23 = vsel %vm4926_vm9, %v4413_v61, 0.0 }
 0xe9d   : > { %v4893_v38 = vadd.f32 %v2345_v25, %v4822_v24  ;;  %v2614_v39 = vsel %vm4926_vm9, %v4419_v62, 0.0 }
 0xea6   : > { %v3799_v37 = vpop.f32.mrb[28].mxu1 }
 0xea7   : > { %v2444_v3 = vadd.f32 %v4896_v6, %v3799_v37  ;;  %v2438_v4 = vpop.f32.mrb[29].mxu1 }
 0xea8   : > { %v2439_v2 = vadd.f32 %v4900_v28, %v2438_v4 }
 0xea9   : > { %v2460_v15 = vsel %vm619_vm0, %v2444_v3, -inf }
 0xeaa   : > { %2461 = vmax.xlane.f32.xlu1 %v2460_v15  ;;  %v3802_v29 = vpop.f32.mrb[30].mxu1  ;;  %v2457_v52 = vsel %vm619_vm0, %v2439_v2, -inf }
 0xeab   : > { %v2454_v24 = vadd.f32 %v4906_v30, %v3802_v29  ;;  %v2448_v5 = vpop.f32.mrb[31].mxu1  ;;  %2458 = vmax.xlane.f32.xlu0 %v2457_v52 }
 0xeac   : > { %v2449_v32 = vadd.f32 %v4910_v31, %v2448_v5 }
 0xead   : > { %v2466_v33 = vsel %vm619_vm0, %v2454_v24, -inf }
 0xeae   : > { %2467 = vmax.xlane.f32.xlu1 %v2466_v33  ;;  %v2463_v11 = vsel %vm619_vm0, %v2449_v32, -inf }
 0xeaf   : > { %2464 = vmax.xlane.f32.xlu0 %v2463_v11 }
 0xf37   : > { %v2462_v34 = vpop.xlane.xlu1 %2461 }
 0xf38   : > { %v2470_v35 = vsub.f32 %v2444_v3, %v2462_v34  ;;  %v2459_v7 = vpop.xlane.xlu0 %2458 }
 0xf39   : > { %v2469_v36 = vsub.f32 %v2439_v2, %v2459_v7 }
 0xf3a   : > { %v2475_v40 = vmul.f32 1.442695, %v2470_v35 }
 0xf3b   : > { %v2473_v41 = vmul.f32 1.442695, %v2469_v36  ;;  %v2468_v44 = vpop.xlane.xlu1 %2467 }
 0xf3c   : > { %4137 = vpow2.f32 %v2475_v40  ;;  %v2472_v46 = vsub.f32 %v2454_v24, %v2468_v44  ;;  %v2465_v20 = vpop.xlane.xlu0 %2464 }
 0xf3d   : > { %4139 = vpow2.f32 %v2473_v41  ;;  %v2471_v47 = vsub.f32 %v2449_v32, %v2465_v20 }
 0xf3e   : > { %v2479_v48 = vmul.f32 1.442695, %v2472_v46 }
 0xf3f   : > { %v2477_v49 = vmul.f32 1.442695, %v2471_v47 }
 0xf40   : > { %4141 = vpow2.f32 %v2479_v48 }
 0xf41   : > { %4143 = vpow2.f32 %v2477_v49 }
 0xf46   : > { %v4138_v50 = vpop.eup %4137 }
 0xf47   : > { %v4140_v27 = vpop.eup %4139  ;;  %v2484_v51 = vsel %vm619_vm0, %v4138_v50, 0.0 }
 0xf48   : > { %2485 = vadd.xlane.f32.xlu1 %v2484_v51  ;;  %v2481_v57 = vsel %vm619_vm0, %v4140_v27, 0.0 }
 0xf49   : > { %2482 = vadd.xlane.f32.xlu0 %v2481_v57 }
 0xf4a   : > { %v4142_v58 = vpop.eup %4141 }
 0xf4b   : > { %v4144_v59 = vpop.eup %4143  ;;  %v2490_v0 = vsel %vm619_vm0, %v4142_v58, 0.0 }
 0xf4c   : > { %2491 = vadd.xlane.f32.xlu1 %v2490_v0  ;;  %v2487_v54 = vsel %vm619_vm0, %v4144_v59, 0.0 }
 0xf4d   : > { %2488 = vadd.xlane.f32.xlu0 %v2487_v54 }
 0xfd5   : > { %v2486_v8 = vpop.xlane.xlu1 %2485 }
 0xfd6   : > { %4145 = vrcp.f32 %v2486_v8  ;;  %v2483_v9 = vpop.xlane.xlu0 %2482 }
 0xfd7   : > { %4147 = vrcp.f32 %v2483_v9 }
 0xfd9   : > { %v2492_v12 = vpop.xlane.xlu1 %2491 }
 0xfda   : > { %4149 = vrcp.f32 %v2492_v12  ;;  %v2489_v18 = vpop.xlane.xlu0 %2488 }
 0xfdb   : > { %4151 = vrcp.f32 %v2489_v18 }
 0xfe0   : > { %v4146_v13 = vpop.eup %4145 }
 0xfe1   : > { %v4148_v14 = vpop.eup %4147  ;;  %v2498_v17 = vmul.f32 %v4146_v13, %v4138_v50 }
 0xfe2   : > { %v2497_v16 = vmul.f32 %v4148_v14, %v4140_v27 }
 0xfe4   : > { %v4150_v19 = vpop.eup %4149  ;;  %3811 = vmatprep.mubr.msk.f32.mxu0 %vm619_vm0, %v2497_v16 }
 0xfe5   : > { %v4152_v21 = vpop.eup %4151  ;;  %3812 = vmatmul.mubr.msk.f32.vlgmr.msra.gmra.mrb[32].mxu0 %vm619_vm0, %v2498_v17  ;;  %v2500_v26 = vmul.f32 %v4150_v19, %v4142_v58 }
 0xfe6   : > { %4018 = vmatpush3.bf16.xpose.msk.msra.mxu0 %vm4378_vm2, %v4385_v45  ;;  %v2499_v56 = vmul.f32 %v4152_v21, %v4144_v59  ;;  %v2612_v45 = vsel %vm4926_vm9, %v4411_v60, 0.0  ;;  %v2863_v21 = vld [vmem:[%s5115_s8] sm:$0xff] }
 0xfe7   : > { %4021 = vmatprep.subr.msk.bf16.mxu0 %vm4378_vm2, %v4374_v42 }
 0xfe8   : > { %3814 = vmatprep.mubr.msk.f32.mxu0 %vm619_vm0, %v2499_v56  ;;  %v2864_v56 = vld [vmem:[%s5115_s8 + $0x8] sm:$0xff] }
 0xfe9   : > { %3815 = vmatmul.mubr.msk.f32.gmra.mrb[34].mxu0 %vm619_vm0, %v2500_v26  ;;  %v2867_v26 = vpack.c.bf16 %v2864_v56, %v2863_v21  ;;  %v3014_v21 = vld [vmem:[%s5119_s12 + $0x10] sm:$0xff]  ;;  %v3015_v56 = vld [vmem:[%s5119_s12 + $0x18] sm:$0xff] }
 0xfea   : > { %3825 = vmatprep.mubr.msk.f32.mxu0 %vm619_vm0, %v2611_v55  ;;  %v2865_v55 = vld [vmem:[%s5115_s8 + $0x10] sm:$0xff] }
 0xfeb   : > { %3845 = vmatprep.subr.bf16.mxu1 %v2867_v26 }
 0xfee   : > { %4024 = vmatpush3.bf16.xpose.msk.msra.mxu0 %vm4378_vm2, %v4374_v42  ;;  %vm3105_vm2 = vcmask 523264  }
 0xff5   : > { %3826 = vmatmul.mubr.msk.f32.vlgmr.msra.gmra.mrb[36].mxu0 %vm619_vm0, %v2612_v45  ;;  %v2866_v45 = vld [vmem:[%s5115_s8 + $0x18] sm:$0xff] }
 0xff6   : > { %3828 = vmatprep.mubr.msk.f32.mxu0 %vm619_vm0, %v2613_v23  ;;  %v2868_v23 = vpack.c.bf16 %v2866_v45, %v2865_v55  ;;  %v3086_v55 = vld [vmem:[%s5121_s14] sm:$0xff]  ;;  %v3087_v45 = vld [vmem:[%s5121_s14 + $0x8] sm:$0xff] }
 0xff9   : > { %3829 = vmatmul.mubr.msk.f32.gmra.mrb[38].mxu0 %vm619_vm0, %v2614_v39 }
0x10b8   : > { %v3813_v43 = vpop.f32.mrb[32].mxu0 }
0x10b9   : > { %v2599_v42 = vsel %vm4843_vm6, %v3813_v43, 0.0  ;;  %v2579_v25 = vpop.f32.mrb[33].mxu0 }
0x10ba   : > { %v4957_v60 = vadd.f32 %v2599_v42, %v4878_v63  ;;  %v2598_v37 = vsel %vm4843_vm6, %v2579_v25, 0.0 }
0x10bb   : > { %v4962_v61 = vadd.f32 %v2598_v37, %v4883_v1 }
0x10bc   : > { %v3816_v3 = vpop.f32.mrb[34].mxu0 }
0x10bd   : > { %v2601_v62 = vsel %vm4843_vm6, %v3816_v3, 0.0  ;;  %v2589_v4 = vpop.f32.mrb[35].mxu0 }
0x10be   : > { %v4967_v2 = vadd.f32 %v2601_v62, %v4888_v53  ;;  %v2600_v15 = vsel %vm4843_vm6, %v2589_v4, 0.0 }
0x10bf   : > { %v4972_v63 = vadd.f32 %v2600_v15, %v4893_v38 }
0x10c8   : > { %v3827_v29 = vpop.f32.mrb[36].mxu0 }
0x10c9   : > { %v2699_v52 = vadd.f32 %v4896_v6, %v3827_v29  ;;  %v2693_v24 = vpop.f32.mrb[37].mxu0 }
0x10ca   : > { %v2694_v1 = vadd.f32 %v4900_v28, %v2693_v24 }
0x10cb   : > { %v2715_v5 = vsel %vm619_vm0, %v2699_v52, -inf }
0x10cc   : > { %2716 = vmax.xlane.f32.xlu1 %v2715_v5  ;;  %v3830_v32 = vpop.f32.mrb[38].mxu0  ;;  %v2712_v33 = vsel %vm619_vm0, %v2694_v1, -inf }
0x10cd   : > { %v2709_v53 = vadd.f32 %v4906_v30, %v3830_v32  ;;  %v2703_v11 = vpop.f32.mrb[39].mxu0  ;;  %2713 = vmax.xlane.f32.xlu0 %v2712_v33 }
0x10ce   : > { %v2704_v10 = vadd.f32 %v4910_v31, %v2703_v11 }
0x10cf   : > { %v2721_v38 = vsel %vm619_vm0, %v2709_v53, -inf }
0x10d0   : > { %2722 = vmax.xlane.f32.xlu1 %v2721_v38  ;;  %v2718_v6 = vsel %vm619_vm0, %v2704_v10, -inf }
0x10d1   : > { %2719 = vmax.xlane.f32.xlu0 %v2718_v6 }
0x1159   : > { %v2717_v34 = vpop.xlane.xlu1 %2716 }
0x115a   : > { %v2725_v28 = vsub.f32 %v2699_v52, %v2717_v34  ;;  %v2714_v35 = vpop.xlane.xlu0 %2713  ;;  %v4190_v34 = vld [vmem:[%s4345_s19 + $0x8] sm:$0xff] }
0x115b   : > { %v2724_v7 = vsub.f32 %v2694_v1, %v2714_v35  ;;  %v4191_v35 = vld [vmem:[%s4345_s19 + $0x10] sm:$0xff] }
0x115c   : > { %v2730_v36 = vmul.f32 1.442695, %v2725_v28 }
0x115d   : > { %v2728_v40 = vmul.f32 1.442695, %v2724_v7  ;;  %v2723_v41 = vpop.xlane.xlu1 %2722 }
0x115e   : > { %4153 = vpow2.f32 %v2730_v36  ;;  %v2727_v44 = vsub.f32 %v2709_v53, %v2723_v41  ;;  %v2720_v30 = vpop.xlane.xlu0 %2719 }
0x115f   : > { %4155 = vpow2.f32 %v2728_v40  ;;  %v2726_v46 = vsub.f32 %v2704_v10, %v2720_v30  ;;  %v4189_v10 = vld [vmem:[%s4345_s19] sm:$0xff]  ;;  %v4192_v40 = vld [vmem:[%s4345_s19 + $0x18] sm:$0xff] }
0x1160   : > { %v2734_v20 = vmul.f32 1.442695, %v2727_v44 }
0x1161   : > { %v2732_v31 = vmul.f32 1.442695, %v2726_v46 }
0x1162   : > { %4157 = vpow2.f32 %v2734_v20 }
0x1163   : > { %4159 = vpow2.f32 %v2732_v31 }
0x1168   : > { %v4154_v47 = vpop.eup %4153 }
0x1169   : > { %v4156_v48 = vpop.eup %4155  ;;  %v2739_v49 = vsel %vm619_vm0, %v4154_v47, 0.0 }
0x116a   : > { %2740 = vadd.xlane.f32.xlu1 %v2739_v49  ;;  %v2736_v50 = vsel %vm619_vm0, %v4156_v48, 0.0 }
0x116b   : > { %2737 = vadd.xlane.f32.xlu0 %v2736_v50 }
0x116c   : > { %v4158_v27 = vpop.eup %4157 }
0x116d   : > { %v4160_v51 = vpop.eup %4159  ;;  %v2745_v57 = vsel %vm619_vm0, %v4158_v27, 0.0 }
0x116e   : > { %2746 = vadd.xlane.f32.xlu1 %v2745_v57  ;;  %v2742_v58 = vsel %vm619_vm0, %v4160_v51, 0.0 }
0x116f   : > { %2743 = vadd.xlane.f32.xlu0 %v2742_v58 }
0x11f7   : > { %v2741_v59 = vpop.xlane.xlu1 %2740 }
0x11f8   : > { %4161 = vrcp.f32 %v2741_v59  ;;  %v2738_v0 = vpop.xlane.xlu0 %2737 }
0x11f9   : > { %4163 = vrcp.f32 %v2738_v0 }
0x11fb   : > { %v2747_v54 = vpop.xlane.xlu1 %2746 }
0x11fc   : > { %4165 = vrcp.f32 %v2747_v54  ;;  %v2744_v8 = vpop.xlane.xlu0 %2743 }
0x11fd   : > { %4167 = vrcp.f32 %v2744_v8 }
0x1202   : > { %v4162_v9 = vpop.eup %4161 }
0x1203   : > { %v4164_v12 = vpop.eup %4163  ;;  %v2753_v13 = vmul.f32 %v4162_v9, %v4154_v47 }
0x1204   : > { %v2752_v18 = vmul.f32 %v4164_v12, %v4156_v48 }
0x1206   : > { %v4166_v14 = vpop.eup %4165  ;;  %3839 = vmatprep.mubr.msk.f32.mxu1 %vm619_vm0, %v2752_v18 }
0x1207   : > { %v4168_v16 = vpop.eup %4167  ;;  %3840 = vmatmul.mubr.msk.f32.vlgmr.msra.gmra.mrb[32].mxu1 %vm619_vm0, %v2753_v13  ;;  %v2755_v19 = vmul.f32 %v4166_v14, %v4158_v27 }
0x1208   : > { %v2754_v17 = vmul.f32 %v4168_v16, %v4160_v51  ;;  %3846 = vmatpush3.bf16.msra.mxu1 %v2867_v26  ;;  %v3012_v16 = vld [vmem:[%s5119_s12] sm:$0xff]  ;;  %v3017_v26 = vpack.c.bf16 %v3015_v56, %v3014_v21 }
0x1209   : > { %3847 = vmatprep.subr.bf16.mxu1 %v2868_v23 }
0x120a   : > { %3842 = vmatprep.mubr.msk.f32.mxu1 %vm619_vm0, %v2754_v17  ;;  %v3013_v17 = vld [vmem:[%s5119_s12 + $0x8] sm:$0xff] }
0x120b   : > { %3843 = vmatmul.mubr.msk.f32.gmra.mrb[34].mxu1 %vm619_vm0, %v2755_v19  ;;  %v3016_v19 = vpack.c.bf16 %v3013_v17, %v3012_v16  ;;  %v3435_v17 = vld [vmem:[%s5122_s15] ss:$0 sm:$0xff] }
0x120c   : > { %3848 = vmatpush3.bf16.msra.mxu1 %v2868_v23  ;;  %v3088_v23 = vld [vmem:[%s5121_s14 + $0x10] sm:$0xff] }
0x120d   : > { %3853 = vmatprep.subr.bf16.mxu0 %v3016_v19 }
0x120e   : > { %3854 = vmatpush3.bf16.msra.mxu0 %v3016_v19 }
0x120f   : > { %3855 = vmatprep.subr.bf16.mxu0 %v3017_v26 }
0x1212   : > { %3856 = vmatpush3.bf16.msra.mxu0 %v3017_v26 }
0x12da   : > { %v3841_v39 = vpop.f32.mrb[32].mxu1 }
0x12db   : > { %v2854_v43 = vsel %vm4926_vm9, %v3841_v39, 0.0  ;;  %v2834_v42 = vpop.f32.mrb[33].mxu1  ;;  %v3094_v39 = vpack.c.bf16 %v3087_v45, %v3086_v55 }
0x12dc   : > { %v2858_v25 = vadd.f32 %v2854_v43, %v4957_v60  ;;  %v2853_v37 = vsel %vm4926_vm9, %v2834_v42, 0.0  ;;  %v3089_v43 = vld [vmem:[%s5121_s14 + $0x18] sm:$0xff] }
0x12dd   : > { %v2857_v3 = vadd.f32 %v2853_v37, %v4962_v61  ;;  %v3427_v61 = vld [vmem:[%s5116_s9] ss:$0 sm:$0xff]  ;;  %v3095_v42 = vpack.c.bf16 %v3089_v43, %v3088_v23  ;;  %3861 = vmatprep.subr.bf16.mxu1 %v3094_v39 }
0x12de   : > { %v3844_v62 = vpop.f32.mrb[34].mxu1 }
0x12df   : > { %v2861_v4 = vpack.c.bf16 %v2858_v25, %v2857_v3  ;;  %v2856_v15 = vsel %vm4926_vm9, %v3844_v62, 0.0  ;;  %v2844_v29 = vpop.f32.mrb[35].mxu1 }
0x12e0   : > { %v2860_v52 = vadd.f32 %v2856_v15, %v4967_v2  ;;  %v2855_v24 = vsel %vm4926_vm9, %v2844_v29, 0.0 }
0x12e1   : > { %v2859_v1 = vadd.f32 %v2855_v24, %v4972_v63  ;;  %3849 = vmatprep.mubr.msk.bf16.mxu1 %vm619_vm0, %v2861_v4 }
0x12e3   : > { %v2862_v60 = vpack.c.bf16 %v2860_v52, %v2859_v1 }
0x12e5   : > { %3850 = vmatmul.mubr.msk.bf16.vlgmr.msra.gmra.mrb[36].mxu1 %vm619_vm0, %v2862_v60 }
0x12e6   : > { %3862 = vmatpush3.bf16.msra.mxu1 %v3094_v39 }
0x12e7   : > { %3863 = vmatprep.subr.bf16.mxu1 %v3095_v42 }
0x12ea   : > { %3864 = vmatpush3.bf16.msra.mxu1 %v3095_v42 }
0x13b8   : > { %v3851_v5 = vpop.f32.mrb[36].mxu1 }
0x13b9   : > { %v2916_v32 = vpop.f32.mrb[37].mxu1  ;;  %v2925_v2 = vadd.f32 %v3851_v5, %v3427_v61 }
0x13ba   : > { %v2917_v33 = vadd.f32 %v3427_v61, %v2916_v32  ;;  %v3852_v22 = vpop.f32.mrb[38].mxu1  ;;  %v3430_v32 = vld [vmem:[%s5117_s10] ss:$0 sm:$0xff] }
0x13bb   : > { %v2919_v53 = vpop.f32.mrb[39].mxu1  ;;  %v2928_v11 = vadd.f32 %v3852_v22, %v3427_v61  ;;  %v2933_v7 = vadd.f32 %v4191_v35, %v2925_v2 }
0x13bc   : > { %v2920_v63 = vadd.f32 %v3427_v61, %v2919_v53  ;;  %v2931_v38 = vadd.f32 %v4189_v10, %v2917_v33 }
0x13bd   : > { %v2934_v41 = vadd.f32 %v4192_v40, %v2928_v11  ;;  %v2943_v44 = vsel %vm619_vm0, %v2933_v7, 0.0 }
0x13be   : > { %v2937_v6 = vsel %vm619_vm0, %v2931_v38, 0.0  ;;  %v2932_v28 = vadd.f32 %v4190_v34, %v2920_v63  ;;  %v3431_v63 = vld [vmem:[%s5118_s11] ss:$0 sm:$0xff] }
0x13bf   : > { %2938 = vadd.xlane.f32.xlu0 %v2937_v6  ;;  %v2946_v30 = vsel %vm619_vm0, %v2934_v41, 0.0 }
0x13c0   : > { %v2940_v36 = vsel %vm619_vm0, %v2932_v28, 0.0 }
0x13c1   : > { %2941 = vadd.xlane.f32.xlu1 %v2940_v36 }
0x13c3   : > { %2944 = vadd.xlane.f32.xlu0 %v2943_v44 }
0x13c5   : > { %2947 = vadd.xlane.f32.xlu1 %v2946_v30 }
0x144c   : > { %v2939_v46 = vpop.xlane.xlu0 %2938 }
0x144d   : > { %v2950_v20 = vmul.f32 0.03125, %v2939_v46  ;;  %v3090_v46 = vld [vmem:[%s5121_s14 + $0x20] sm:$0xff] }
0x144e   : > { %v2942_v31 = vpop.xlane.xlu1 %2941 }
0x144f   : > { %v2954_v47 = vsub.f32 %v2931_v38, %v2950_v20  ;;  %v2951_v48 = vmul.f32 0.03125, %v2942_v31  ;;  %v3091_v20 = vld [vmem:[%s5121_s14 + $0x28] sm:$0xff] }
0x1450   : > { %v2945_v49 = vpop.xlane.xlu0 %2944  ;;  %v3096_v31 = vpack.c.bf16 %v3091_v20, %v3090_v46 }
0x1451   : > { %v2955_v50 = vsub.f32 %v2932_v28, %v2951_v48  ;;  %v2952_v27 = vmul.f32 0.03125, %v2945_v49  ;;  %v2958_v51 = vmul.f32 %v2954_v47, %v2954_v47  ;;  %v3093_v48 = vld [vmem:[%s5121_s14 + $0x38] sm:$0xff] }
0x1452   : > { %v2948_v57 = vpop.xlane.xlu1 %2947  ;;  %3865 = vmatprep.subr.bf16.mxu1 %v3096_v31 }
0x1453   : > { %v2956_v58 = vsub.f32 %v2933_v7, %v2952_v27  ;;  %v2953_v59 = vmul.f32 0.03125, %v2948_v57  ;;  %v2962_v0 = vsel %vm619_vm0, %v2958_v51, 0.0  ;;  %v2959_v54 = vmul.f32 %v2955_v50, %v2955_v50  ;;  %3866 = vmatpush3.bf16.msra.mxu1 %v3096_v31 }
0x1454   : > { %2963 = vadd.xlane.f32.xlu0 %v2962_v0 }
0x1455   : > { %v2957_v8 = vsub.f32 %v2934_v41, %v2953_v59  ;;  %v2965_v9 = vsel %vm619_vm0, %v2959_v54, 0.0  ;;  %v2960_v12 = vmul.f32 %v2956_v58, %v2956_v58 }
0x1456   : > { %2966 = vadd.xlane.f32.xlu1 %v2965_v9 }
0x1457   : > { %v2968_v18 = vsel %vm619_vm0, %v2960_v12, 0.0  ;;  %v2961_v13 = vmul.f32 %v2957_v8, %v2957_v8 }
0x1458   : > { %2969 = vadd.xlane.f32.xlu0 %v2968_v18 }
0x1459   : > { %v2971_v14 = vsel %vm619_vm0, %v2961_v13, 0.0 }
0x145a   : > { %2972 = vadd.xlane.f32.xlu1 %v2971_v14 }
0x14e1   : > { %v2964_v25 = vpop.xlane.xlu0 %2963 }
0x14e2   : > { %v2974_v37 = vmul.f32 0.03125, %v2964_v25 }
0x14e3   : > { %v2967_v3 = vpop.xlane.xlu1 %2966 }
0x14e4   : > { %v2978_v62 = vadd.f32 1e-05, %v2974_v37  ;;  %v2975_v4 = vmul.f32 0.03125, %v2967_v3 }
0x14e5   : > { %v2970_v15 = vpop.xlane.xlu0 %2969 }
0x14e6   : > { %4169 = vrsqrt.f32 %v2978_v62  ;;  %v2979_v29 = vadd.f32 1e-05, %v2975_v4  ;;  %v2976_v52 = vmul.f32 0.03125, %v2970_v15 }
0x14e7   : > { %v2973_v24 = vpop.xlane.xlu1 %2972 }
0x14e8   : > { %4171 = vrsqrt.f32 %v2979_v29  ;;  %v2980_v1 = vadd.f32 1e-05, %v2976_v52  ;;  %v2977_v60 = vmul.f32 0.03125, %v2973_v24 }
0x14ea   : > { %4173 = vrsqrt.f32 %v2980_v1  ;;  %v2981_v61 = vadd.f32 1e-05, %v2977_v60 }
0x14ec   : > { %4175 = vrsqrt.f32 %v2981_v61 }
0x14f0   : > { %v4170_v5 = vpop.eup %4169 }
0x14f1   : > { %v2986_v2 = vmul.f32 %v4170_v5, %v2954_v47  ;;  %v3092_v47 = vld [vmem:[%s5121_s14 + $0x30] sm:$0xff] }
0x14f2   : > { %v4172_v33 = vpop.eup %4171  ;;  %v3097_v49 = vpack.c.bf16 %v3093_v48, %v3092_v47 }
0x14f3   : > { %v2987_v22 = vmul.f32 %v4172_v33, %v2955_v50  ;;  %v2996_v53 = vmul.f32 %v3430_v32, %v2986_v2  ;;  %v3432_v50 = vld [vmem:[%s5120_s13] ss:$0 sm:$0xff] }
0x14f4   : > { %v4174_v11 = vpop.eup %4173  ;;  %3867 = vmatprep.subr.bf16.mxu1 %v3097_v49 }
0x14f5   : > { %v2988_v10 = vmul.f32 %v4174_v11, %v2956_v58  ;;  %v2997_v38 = vmul.f32 %v3430_v32, %v2987_v22  ;;  %v3006_v35 = vadd.f32 %v3431_v63, %v2996_v53  ;;  %3868 = vmatpush3.bf16.msra.mxu1 %v3097_v49 }
0x14f6   : > { %v4176_v6 = vpop.eup %4175 }
0x14f7   : > { %v2998_v34 = vmul.f32 %v3430_v32, %v2988_v10  ;;  %v2989_v28 = vmul.f32 %v4176_v6, %v2957_v8  ;;  %v3007_v7 = vadd.f32 %v3431_v63, %v2997_v38 }
0x14f9   : > { %v2999_v36 = vmul.f32 %v3430_v32, %v2989_v28  ;;  %v3010_v40 = vpack.c.bf16 %v3007_v7, %v3006_v35  ;;  %v3008_v41 = vadd.f32 %v3431_v63, %v2998_v34 }
0x14fb   : > { %v3009_v44 = vadd.f32 %v3431_v63, %v2999_v36  ;;  %3857 = vmatprep.mubr.msk.bf16.mxu0 %vm619_vm0, %v3010_v40 }
0x14fd   : > { %v3011_v30 = vpack.c.bf16 %v3009_v44, %v3008_v41 }
0x14ff   : > { %3858 = vmatmul.mubr.msk.bf16.vlgmr.msra.gmra.mrb[40].mxu0 %vm619_vm0, %v3011_v30 }
0x15d2   : > { %v3859_v27 = vpop.f32.mrb[40].mxu0 }
0x15d3   : > { %v3074_v51 = vadd.f32 %v3859_v27, %v3432_v50  ;;  %v3065_v57 = vpop.f32.mrb[41].mxu0  ;;  %v3438_v27 = vld [vmem:[%s5123_s16] ss:$0 sm:$0xff] }
0x15d4   : > { %v3066_v58 = vadd.f32 %v3432_v50, %v3065_v57  ;;  %v3860_v59 = vpop.f32.mrb[42].mxu0 }
0x15d5   : > { %v3077_v0 = vadd.f32 %v3860_v59, %v3432_v50  ;;  %v3068_v54 = vpop.f32.mrb[43].mxu0  ;;  %v3082_v9 = vmax.f32 %v3074_v51, 0.0 }
0x15d6   : > { %v3069_v8 = vadd.f32 %v3432_v50, %v3068_v54  ;;  %v3080_v18 = vmax.f32 %v3066_v58, 0.0  ;;  %v3439_v58 = vld [vmem:[%s5124_s17] ss:$0 sm:$0xff] }
0x15d7   : > { %v3083_v12 = vmax.f32 %v3077_v0, 0.0 }
0x15d8   : > { %v3081_v13 = vmax.f32 %v3069_v8, 0.0 }
0x15d9   : > { %v3085_v14 = vpack.c.bf16 %v3083_v12, %v3082_v9 }
0x15da   : > { %v3084_v16 = vpack.c.bf16 %v3081_v13, %v3080_v18 }
0x15dc   : > { %3869 = vmatprep.mubr.msk.bf16.mxu1 %vm3105_vm2, %v3084_v16 }
0x15dd   : > { %3870 = vmatmul.mubr.msk.bf16.vlgmr.msra.gmra.mrb[40].mxu1 %vm3105_vm2, %v3085_v14 }
0x16b0   : > { %v3871_v19 = vpop.f32.mrb[40].mxu1 }
0x16b1   : > { %v3146_v21 = vpop.f32.mrb[41].mxu1  ;;  %v3155_v56 = vadd.f32 %v3871_v19, %v3435_v17 }
0x16b2   : > { %v3147_v26 = vadd.f32 %v3435_v17, %v3146_v21  ;;  %v3872_v55 = vpop.f32.mrb[42].mxu1 }
0x16b3   : > { %v3149_v45 = vpop.f32.mrb[43].mxu1  ;;  %v3158_v23 = vadd.f32 %v3872_v55, %v3435_v17  ;;  %v3163_v37 = vadd.f32 %v3155_v56, %v3008_v41 }
0x16b4   : > { %v3150_v39 = vadd.f32 %v3435_v17, %v3149_v45  ;;  %v3161_v43 = vadd.f32 %v3147_v26, %v3006_v35 }
0x16b5   : > { %v3164_v62 = vadd.f32 %v3158_v23, %v3009_v44  ;;  %v3173_v4 = vsel %vm619_vm0, %v3163_v37, 0.0 }
0x16b6   : > { %v3167_v42 = vsel %vm619_vm0, %v3161_v43, 0.0  ;;  %v3162_v25 = vadd.f32 %v3150_v39, %v3007_v7 }
0x16b7   : > { %3168 = vadd.xlane.f32.xlu0 %v3167_v42  ;;  %v3176_v15 = vsel %vm619_vm0, %v3164_v62, 0.0 }
0x16b8   : > { %v3170_v3 = vsel %vm619_vm0, %v3162_v25, 0.0 }
0x16b9   : > { %3171 = vadd.xlane.f32.xlu1 %v3170_v3 }
0x16bb   : > { %3174 = vadd.xlane.f32.xlu0 %v3173_v4 }
0x16bd   : > { %3177 = vadd.xlane.f32.xlu1 %v3176_v15 }
0x1744   : > { %v3169_v29 = vpop.xlane.xlu0 %3168 }
0x1745   : > { %v3179_v52 = vmul.f32 0.03125, %v3169_v29 }
0x1746   : > { %v3172_v24 = vpop.xlane.xlu1 %3171 }
0x1747   : > { %v3183_v1 = vsub.f32 %v3161_v43, %v3179_v52  ;;  %v3180_v60 = vmul.f32 0.03125, %v3172_v24 }
0x1748   : > { %v3175_v61 = vpop.xlane.xlu0 %3174 }
0x1749   : > { %v3184_v5 = vsub.f32 %v3162_v25, %v3180_v60  ;;  %v3181_v32 = vmul.f32 0.03125, %v3175_v61  ;;  %v3187_v2 = vmul.f32 %v3183_v1, %v3183_v1 }
0x174a   : > { %v3178_v33 = vpop.xlane.xlu1 %3177 }
0x174b   : > { %v3185_v22 = vsub.f32 %v3163_v37, %v3181_v32  ;;  %v3182_v53 = vmul.f32 0.03125, %v3178_v33  ;;  %v3191_v11 = vsel %vm619_vm0, %v3187_v2, 0.0  ;;  %v3188_v63 = vmul.f32 %v3184_v5, %v3184_v5 }
0x174c   : > { %3192 = vadd.xlane.f32.xlu0 %v3191_v11 }
0x174d   : > { %v3186_v10 = vsub.f32 %v3164_v62, %v3182_v53  ;;  %v3194_v38 = vsel %vm619_vm0, %v3188_v63, 0.0  ;;  %v3189_v6 = vmul.f32 %v3185_v22, %v3185_v22 }
0x174e   : > { %3195 = vadd.xlane.f32.xlu1 %v3194_v38 }
0x174f   : > { %v3197_v34 = vsel %vm619_vm0, %v3189_v6, 0.0  ;;  %v3190_v28 = vmul.f32 %v3186_v10, %v3186_v10 }
0x1750   : > { %3198 = vadd.xlane.f32.xlu0 %v3197_v34 }
0x1751   : > { %v3200_v35 = vsel %vm619_vm0, %v3190_v28, 0.0 }
0x1752   : > { %3201 = vadd.xlane.f32.xlu1 %v3200_v35 }
0x17d9   : > { %v3193_v7 = vpop.xlane.xlu0 %3192 }
0x17da   : > { %v3203_v36 = vmul.f32 0.03125, %v3193_v7 }
0x17db   : > { %v3196_v40 = vpop.xlane.xlu1 %3195 }
0x17dc   : > { %v3207_v41 = vadd.f32 1e-05, %v3203_v36  ;;  %v3204_v44 = vmul.f32 0.03125, %v3196_v40 }
0x17dd   : > { %v3199_v30 = vpop.xlane.xlu0 %3198 }
0x17de   : > { %4177 = vrsqrt.f32 %v3207_v41  ;;  %v3208_v46 = vadd.f32 1e-05, %v3204_v44  ;;  %v3205_v20 = vmul.f32 0.03125, %v3199_v30 }
0x17df   : > { %v3202_v31 = vpop.xlane.xlu1 %3201 }
0x17e0   : > { %4179 = vrsqrt.f32 %v3208_v46  ;;  %v3209_v47 = vadd.f32 1e-05, %v3205_v20  ;;  %v3206_v48 = vmul.f32 0.03125, %v3202_v31 }
0x17e2   : > { %4181 = vrsqrt.f32 %v3209_v47  ;;  %v3210_v49 = vadd.f32 1e-05, %v3206_v48 }
0x17e4   : > { %4183 = vrsqrt.f32 %v3210_v49 }
0x17e8   : > { %v4178_v50 = vpop.eup %4177 }
0x17e9   : > { %v3215_v51 = vmul.f32 %v4178_v50, %v3183_v1 }
0x17ea   : > { %v4180_v57 = vpop.eup %4179 }
0x17eb   : > { %v3225_v59 = vmul.f32 %v3438_v27, %v3215_v51  ;;  %v3216_v0 = vmul.f32 %v4180_v57, %v3184_v5 }
0x17ec   : > { %v4182_v54 = vpop.eup %4181 }
0x17ed   : > { %v3235_v8 = vadd.f32 %v3439_v58, %v3225_v59  ;;  %v3226_v9 = vmul.f32 %v3438_v27, %v3216_v0  ;;  %v3217_v12 = vmul.f32 %v4182_v54, %v3185_v22 }
0x17ee   : > { %v4184_v18 = vpop.eup %4183 }
0x17ef   : > { %3239 = vst.msk [vmem:[%s597_s1] sm:$0xff] %vm619_vm0, %v3235_v8  ;;  %v3236_v13 = vadd.f32 %v3439_v58, %v3226_v9  ;;  %v3227_v14 = vmul.f32 %v3438_v27, %v3217_v12  ;;  %v3218_v16 = vmul.f32 %v4184_v18, %v3186_v10 }
0x17f1   : > { %3240 = vst.msk [vmem:[%s597_s1 + $0x8] sm:$0xff] %vm619_vm0, %v3236_v13  ;;  %v3237_v17 = vadd.f32 %v3439_v58, %v3227_v14  ;;  %v3228_v19 = vmul.f32 %v3438_v27, %v3218_v16 }
0x17f3   : > { %3241 = vst.msk [vmem:[%s597_s1 + $0x10] sm:$0xff] %vm619_vm0, %v3237_v17  ;;  %v3238_v21 = vadd.f32 %v3439_v58, %v3228_v19 }
0x17f5   : > { %3242 = vst.msk [vmem:[%s597_s1 + $0x18] sm:$0xff] %vm619_vm0, %v3238_v21 }
0x17f6 PF: > { %s28_s27 = sadd.s32 1, %s4199_s27  }
0x17f7   : > { %p25_p5 = scmp.ge.s32.totalorder %s28_s27, 4  }
0x17f9   :  { %27 = sbr.rel (!%p25_p5) target bundleno = 4 (0x4), region = 125 }

</bundles_post_ra>
